<compile_context>
chip_gen: v7x
topology: tpu7x:2x2x1
jax: 0.10.0
libtpu: 0.0.40
codegen_flags: <defaults>
</compile_context>

<pallas_src>
import math
from functools import partial

import jax
import jax.numpy as jnp
from jax.experimental import pallas as pl
from jax.experimental.pallas import tpu as pltpu

NEG_INF = -1e30            # additive mask value, kept on the f32 score path
MM_DTYPE = jnp.bfloat16    # MXU operand dtype (f32 accumulation everywhere)
LN_EPS = 1e-5
VMEM_LIMIT = 32 * 1024 * 1024   # safe scoped budget on v5e / v6e / v7x


def _compiler_params():
    return pltpu.CompilerParams(
        dimension_semantics=("parallel",),
        vmem_limit_bytes=VMEM_LIMIT,
    )


def _whole_spec(a):
    """BlockSpec covering the whole array (shared by every grid step)."""
    zeros = (0,) * a.ndim
    return pl.BlockSpec(a.shape, lambda b: zeros)


# --------------------------------------------------------------------------
# Fused attention sub-layer kernel (one batch element per grid step):
#   per-head QKV projection -> scores -> softmax -> PV -> out projection
#   -> residual add -> LayerNorm
# --------------------------------------------------------------------------
def _attn_sublayer_kernel(*refs, causal, has_kpad, cross, num_heads, eps):
    it = iter(refs)
    x_ref = next(it)
    xkv_ref = next(it) if cross else None
    wq_ref, bq_ref = next(it), next(it)
    wk_ref, bk_ref = next(it), next(it)
    wv_ref, bv_ref = next(it), next(it)
    wo_ref, bo_ref = next(it), next(it)
    kp_ref = next(it) if has_kpad else None
    g_ref, beta_ref = next(it), next(it)
    o_ref = next(it)

    x = x_ref[0]                                  # (Sq, E) f32 (residual path)
    x_mm = x.astype(MM_DTYPE)
    if cross:
        xkv_mm = xkv_ref[0].astype(MM_DTYPE)      # (Sk, E)
    else:
        xkv_mm = x_mm
    Sq, E = x.shape
    Sk = xkv_mm.shape[0]

    # Additive attention bias, built ONCE and shared by all heads.
    bias = None
    if has_kpad:
        bias = jnp.broadcast_to(kp_ref[0], (Sq, Sk))          # (1,Sk)->(Sq,Sk)
    if causal:
        row = jax.lax.broadcasted_iota(jnp.int32, (Sq, Sk), 0)
        col = jax.lax.broadcasted_iota(jnp.int32, (Sq, Sk), 1)
        cmask = jnp.where(col > row, NEG_INF, 0.0).astype(jnp.float32)
        bias = cmask if bias is None else bias + cmask

    trans_b = (((1,), (1,)), ((), ()))   # contract last dims: A @ B^T, no vxpose

    acc = jnp.zeros((Sq, E), jnp.float32)
    # Static unroll over heads. Weights are pre-split per head at init into
    # (H, E, Dh)/(H, Dh, E): no lane-group slicing of activations, no concat.
    # 1/sqrt(Dh) is pre-folded into wq/bq.
    for h in range(num_heads):
        q = (jnp.dot(x_mm, wq_ref[h], preferred_element_type=jnp.float32)
             + bq_ref[h])                                      # (Sq, Dh)
        k = (jnp.dot(xkv_mm, wk_ref[h], preferred_element_type=jnp.float32)
             + bk_ref[h])                                      # (Sk, Dh)
        v = (jnp.dot(xkv_mm, wv_ref[h], preferred_element_type=jnp.float32)
             + bv_ref[h])                                      # (Sk, Dh)
        s = jax.lax.dot_general(q.astype(MM_DTYPE), k.astype(MM_DTYPE),
                                trans_b, preferred_element_type=jnp.float32)
        if bias is not None:
            s = s + bias
        m = jnp.max(s, axis=-1, keepdims=True)
        p = jnp.exp(s - m)
        l = jnp.sum(p, axis=-1, keepdims=True)
        p = p * pl.reciprocal(l, approx=True)
        o_h = jnp.dot(p.astype(MM_DTYPE), v.astype(MM_DTYPE),
                      preferred_element_type=jnp.float32)      # (Sq, Dh)
        acc = acc + jnp.dot(o_h.astype(MM_DTYPE), wo_ref[h],
                            preferred_element_type=jnp.float32)  # (Sq, E)

    y = acc + bo_ref[...]                         # output-projection bias
    z = x + y                                     # residual add (f32)
    mu = jnp.mean(z, axis=-1, keepdims=True)
    var = jnp.mean(jnp.square(z - mu), axis=-1, keepdims=True)
    o_ref[0] = (z - mu) * jax.lax.rsqrt(var + eps) * g_ref[...] + beta_ref[...]


def attn_sublayer(x, x_kv, p, num_heads, *, causal=False, kpad_bias=None):
    """One fused pallas_call per attention sub-layer, grid=(B,)."""
    B, Sq, E = x.shape
    cross = x_kv is not None
    has_kpad = kpad_bias is not None
    Sk = x_kv.shape[1] if cross else Sq

    arrays = [x]
    in_specs = [pl.BlockSpec((1, Sq, E), lambda b: (b, 0, 0))]
    if cross:
        arrays.append(x_kv)
        in_specs.append(pl.BlockSpec((1, Sk, E), lambda b: (b, 0, 0)))
    for name in ("wq", "bq", "wk", "bk", "wv", "bv", "wo", "bo"):
        arrays.append(p[name])
        in_specs.append(_whole_spec(p[name]))
    if has_kpad:
        arrays.append(kpad_bias)
        in_specs.append(pl.BlockSpec((1, 1, Sk), lambda b: (b, 0, 0)))
    arrays += [p["ln_g"], p["ln_b"]]
    in_specs += [_whole_spec(p["ln_g"]), _whole_spec(p["ln_b"])]

    # TODO(synk): at real sequence lengths add an Sk grid axis with flash-style
    # online-softmax accumulation; at these sizes the whole-sequence block is
    # tiny and fits well under the 32 MiB scoped VMEM budget (v7x-safe).
    return pl.pallas_call(
        partial(_attn_sublayer_kernel, causal=causal, has_kpad=has_kpad,
                cross=cross, num_heads=num_heads, eps=LN_EPS),
        out_shape=jax.ShapeDtypeStruct((B, Sq, E), jnp.float32),
        grid=(B,),
        in_specs=in_specs,
        out_specs=pl.BlockSpec((1, Sq, E), lambda b: (b, 0, 0)),
        compiler_params=_compiler_params(),
    )(*arrays)


# --------------------------------------------------------------------------
# Fused FFN sub-layer kernel: (x@W1+b1 -> ReLU -> @W2+b2) + residual + LN
# --------------------------------------------------------------------------
def _ffn_sublayer_kernel(x_ref, w1_ref, b1_ref, w2_ref, b2_ref,
                         g_ref, beta_ref, o_ref, *, eps):
    x = x_ref[0]                                                    # (S, E) f32
    h = (jnp.dot(x.astype(MM_DTYPE), w1_ref[...],
                 preferred_element_type=jnp.float32) + b1_ref[...])
    h = jnp.maximum(h, 0.0)                                         # fused ReLU
    y = (jnp.dot(h.astype(MM_DTYPE), w2_ref[...],
                 preferred_element_type=jnp.float32) + b2_ref[...])
    z = x + y                                                       # residual
    mu = jnp.mean(z, axis=-1, keepdims=True)
    var = jnp.mean(jnp.square(z - mu), axis=-1, keepdims=True)
    o_ref[0] = (z - mu) * jax.lax.rsqrt(var + eps) * g_ref[...] + beta_ref[...]


def ffn_sublayer(x, p):
    """One fused pallas_call per FFN sub-layer, grid=(B,).
    TODO(synk): for large dim_feedforward, tile F in-kernel (emit_pipeline)
    instead of holding the whole (S, F) intermediate in VMEM."""
    B, S, E = x.shape
    return pl.pallas_call(
        partial(_ffn_sublayer_kernel, eps=LN_EPS),
        out_shape=jax.ShapeDtypeStruct((B, S, E), jnp.float32),
        grid=(B,),
        in_specs=[pl.BlockSpec((1, S, E), lambda b: (b, 0, 0)),
                  _whole_spec(p["w1"]), _whole_spec(p["b1"]),
                  _whole_spec(p["w2"]), _whole_spec(p["b2"]),
                  _whole_spec(p["ln_g"]), _whole_spec(p["ln_b"])],
        out_specs=pl.BlockSpec((1, S, E), lambda b: (b, 0, 0)),
        compiler_params=_compiler_params(),
    )(x, p["w1"], p["b1"], p["w2"], p["b2"], p["ln_g"], p["ln_b"])


# --------------------------------------------------------------------------
# Standalone LayerNorm (final encoder / decoder norms only)
# --------------------------------------------------------------------------
def _ln_kernel(x_ref, g_ref, b_ref, o_ref, *, eps):
    x = x_ref[0]
    mu = jnp.mean(x, axis=-1, keepdims=True)
    var = jnp.mean(jnp.square(x - mu), axis=-1, keepdims=True)
    o_ref[0] = (x - mu) * jax.lax.rsqrt(var + eps) * g_ref[...] + b_ref[...]


def layer_norm(x, g, b):
    B, S, E = x.shape
    return pl.pallas_call(
        partial(_ln_kernel, eps=LN_EPS),
        out_shape=jax.ShapeDtypeStruct((B, S, E), jnp.float32),
        grid=(B,),
        in_specs=[pl.BlockSpec((1, S, E), lambda i: (i, 0, 0)),
                  _whole_spec(g), _whole_spec(b)],
        out_specs=pl.BlockSpec((1, S, E), lambda i: (i, 0, 0)),
        compiler_params=_compiler_params(),
    )(x, g, b)


# --------------------------------------------------------------------------
# Output vocabulary projection (single reduction step, no accumulator needed)
# --------------------------------------------------------------------------
def _out_proj_kernel(x_ref, w_ref, b_ref, o_ref):
    o_ref[0] = (jnp.dot(x_ref[0].astype(MM_DTYPE), w_ref[...],
                        preferred_element_type=jnp.float32) + b_ref[...])


def out_proj(x, w, b):
    B, S, E = x.shape
    V = w.shape[1]
    return pl.pallas_call(
        _out_proj_kernel,
        out_shape=jax.ShapeDtypeStruct((B, S, V), jnp.float32),
        grid=(B,),
        in_specs=[pl.BlockSpec((1, S, E), lambda i: (i, 0, 0)),
                  _whole_spec(w), _whole_spec(b)],
        out_specs=pl.BlockSpec((1, S, V), lambda i: (i, 0, 0)),
        compiler_params=_compiler_params(),
    )(x, w, b)


# --------------------------------------------------------------------------
# Model forward
# --------------------------------------------------------------------------
def model_forward(params, src, trg, *, num_heads, src_pad_idx):
    """src: (B, S_src) int32 tokens, trg: (B, S_trg) int32 tokens."""
    B, S_src = src.shape
    _, S_trg = trg.shape

    # --- embeddings + positional embeddings (gather stays in JAX glue) ---
    # TODO(synk): embedding gathers have no dedicated Pallas kernel here;
    # dropout is identity (eval-mode semantics).
    src_pos = jnp.arange(S_src)
    trg_pos = jnp.arange(S_trg)
    embed_src = (jnp.take(params["src_word_emb"], src, axis=0)
                 + jnp.take(params["src_pos_emb"], src_pos, axis=0)[None])
    embed_trg = (jnp.take(params["trg_word_emb"], trg, axis=0)
                 + jnp.take(params["trg_pos_emb"], trg_pos, axis=0)[None])

    # tiny per-batch additive key-padding bias, shared by every head/layer
    enc_kpad_bias = jnp.where(src == src_pad_idx, NEG_INF, 0.0
                              ).astype(jnp.float32)[:, None, :]

    # --- encoder: 2 fused pallas_calls per layer ---
    x = embed_src
    for lp in params["encoder_layers"]:
        x = attn_sublayer(x, None, lp["self_attn"], num_heads,
                          kpad_bias=enc_kpad_bias)
        x = ffn_sublayer(x, lp["ffn"])
    memory = layer_norm(x, params["enc_norm_g"], params["enc_norm_b"])

    # --- decoder: 3 fused pallas_calls per layer ---
    # (nn.Transformer passes no memory mask, so cross-attention is unmasked,
    #  matching the reference module's forward.)
    y = embed_trg
    for lp in params["decoder_layers"]:
        y = attn_sublayer(y, None, lp["self_attn"], num_heads, causal=True)
        y = attn_sublayer(y, memory, lp["cross_attn"], num_heads)
        y = ffn_sublayer(y, lp["ffn"])
    y = layer_norm(y, params["dec_norm_g"], params["dec_norm_b"])

    return out_proj(y, params["fc_w"], params["fc_b"])


# --------------------------------------------------------------------------
# Deterministic parameter construction (all layout prep done ONCE here)
# --------------------------------------------------------------------------
def init_params(key, *, E, H, F, n_enc, n_dec, src_vocab, trg_vocab, max_len):
    assert E % H == 0
    Dh = E // H
    scale = 1.0 / math.sqrt(Dh)
    keys = iter(jax.random.split(key, 1024))

    def dense(fan_in, fan_out):
        return (jax.random.normal(next(keys), (fan_in, fan_out), jnp.float32)
                * 0.02)

    def ln_pair():
        return jnp.ones((1, E), jnp.float32), jnp.zeros((1, E), jnp.float32)

    def attn_params():
        # Per-head pre-split weights: (H, E, Dh) for q/k/v, (H, Dh, E) for the
        # output projection, cast to the MXU operand dtype once. The softmax
        # scale 1/sqrt(Dh) is folded into the query projection (its bias is
        # zero here; a nonzero bias would need the same scaling).
        wq = (dense(E, E) * scale).reshape(E, H, Dh).transpose(1, 0, 2)
        wk = dense(E, E).reshape(E, H, Dh).transpose(1, 0, 2)
        wv = dense(E, E).reshape(E, H, Dh).transpose(1, 0, 2)
        wo = dense(E, E).reshape(H, Dh, E)
        g, b = ln_pair()
        return dict(
            wq=wq.astype(MM_DTYPE), bq=jnp.zeros((H, 1, Dh), jnp.float32),
            wk=wk.astype(MM_DTYPE), bk=jnp.zeros((H, 1, Dh), jnp.float32),
            wv=wv.astype(MM_DTYPE), bv=jnp.zeros((H, 1, Dh), jnp.float32),
            wo=wo.astype(MM_DTYPE), bo=jnp.zeros((1, E), jnp.float32),
            ln_g=g, ln_b=b)

    def ffn_params():
        g, b = ln_pair()
        return dict(
            w1=dense(E, F).astype(MM_DTYPE), b1=jnp.zeros((1, F), jnp.float32),
            w2=dense(F, E).astype(MM_DTYPE), b2=jnp.zeros((1, E), jnp.float32),
            ln_g=g, ln_b=b)

    def enc_layer():
        return dict(self_attn=attn_params(), ffn=ffn_params())

    def dec_layer():
        return dict(self_attn=attn_params(), cross_attn=attn_params(),
                    ffn=ffn_params())

    enc_g, enc_b = ln_pair()
    dec_g, dec_b = ln_pair()
    return dict(
        src_word_emb=dense(src_vocab, E),
        src_pos_emb=dense(max_len, E),
        trg_word_emb=dense(trg_vocab, E),
        trg_pos_emb=dense(max_len, E),
        encoder_layers=[enc_layer() for _ in range(n_enc)],
        decoder_layers=[dec_layer() for _ in range(n_dec)],
        enc_norm_g=enc_g, enc_norm_b=enc_b,
        dec_norm_g=dec_g, dec_norm_b=dec_b,
        fc_w=dense(E, trg_vocab).astype(MM_DTYPE),
        fc_b=jnp.zeros((1, trg_vocab), jnp.float32),
    )


# --------------------------------------------------------------------------
if __name__ == "__main__":
    E, H, F = 32, 4, 64            # embedding_size, num_heads, forward_expansion
    N_ENC, N_DEC = 2, 2
    SRC_VOCAB, TRG_VOCAB = 50, 60
    MAX_LEN = 16
    SRC_PAD_IDX = 0
    B, S_SRC, S_TRG = 2, 10, 8

    key = jax.random.PRNGKey(0)
    k_params, k_src, k_trg = jax.random.split(key, 3)

    params = init_params(k_params, E=E, H=H, F=F, n_enc=N_ENC, n_dec=N_DEC,
                         src_vocab=SRC_VOCAB, trg_vocab=TRG_VOCAB,
                         max_len=MAX_LEN)

    src = jax.random.randint(k_src, (B, S_SRC), 1, SRC_VOCAB, dtype=jnp.int32)
    src = src.at[:, -2:].set(SRC_PAD_IDX)   # some padding tokens
    trg = jax.random.randint(k_trg, (B, S_TRG), 1, TRG_VOCAB, dtype=jnp.int32)

    fwd = jax.jit(partial(model_forward, num_heads=H, src_pad_idx=SRC_PAD_IDX))
    out = jax.block_until_ready(fwd(params, src, trg))

    assert out.shape == (B, S_TRG, TRG_VOCAB), out.shape
    assert bool(jnp.all(jnp.isfinite(out)))
    print("KERNEL_OK")
</pallas_src>

<mosaic_0001>
module attributes {stable_mosaic.version = 11 : i64} {
  func.func @_attn_sublayer_kernel(%arg0: i32, %arg1: memref<1x10x32xf32, #tpu.memory_space<vmem>>, %arg2: memref<4x32x8xbf16, #tpu.memory_space<vmem>>, %arg3: memref<4x1x8xf32, #tpu.memory_space<vmem>>, %arg4: memref<4x32x8xbf16, #tpu.memory_space<vmem>>, %arg5: memref<4x1x8xf32, #tpu.memory_space<vmem>>, %arg6: memref<4x32x8xbf16, #tpu.memory_space<vmem>>, %arg7: memref<4x1x8xf32, #tpu.memory_space<vmem>>, %arg8: memref<4x8x32xbf16, #tpu.memory_space<vmem>>, %arg9: memref<1x32xf32, #tpu.memory_space<vmem>>, %arg10: memref<1x1x10xf32, #tpu.memory_space<vmem>>, %arg11: memref<1x32xf32, #tpu.memory_space<vmem>>, %arg12: memref<1x32xf32, #tpu.memory_space<vmem>>, %arg13: memref<1x10x32xf32, #tpu.memory_space<vmem>>) attributes {dimension_semantics = [#tpu.dimension_semantics<parallel>], iteration_bounds = array<i64: 2>, scalar_prefetch = 0 : i64, scratch_operands = 0 : i64, tpu.core_type = #tpu.core_type<tc>, window_params = [{transform_indices = @transform_0, window_bounds = array<i64: 1, 10, 32>}, {pipeline_mode = #tpu.pipeline_mode<synchronous>, transform_indices = @transform_1, window_bounds = array<i64: 4, 32, 8>}, {pipeline_mode = #tpu.pipeline_mode<synchronous>, transform_indices = @transform_2, window_bounds = array<i64: 4, 1, 8>}, {pipeline_mode = #tpu.pipeline_mode<synchronous>, transform_indices = @transform_3, window_bounds = array<i64: 4, 32, 8>}, {pipeline_mode = #tpu.pipeline_mode<synchronous>, transform_indices = @transform_4, window_bounds = array<i64: 4, 1, 8>}, {pipeline_mode = #tpu.pipeline_mode<synchronous>, transform_indices = @transform_5, window_bounds = array<i64: 4, 32, 8>}, {pipeline_mode = #tpu.pipeline_mode<synchronous>, transform_indices = @transform_6, window_bounds = array<i64: 4, 1, 8>}, {pipeline_mode = #tpu.pipeline_mode<synchronous>, transform_indices = @transform_7, window_bounds = array<i64: 4, 8, 32>}, {pipeline_mode = #tpu.pipeline_mode<synchronous>, transform_indices = @transform_8, window_bounds = array<i64: 1, 32>}, {transform_indices = @transform_9, window_bounds = array<i64: 1, 1, 10>}, {pipeline_mode = #tpu.pipeline_mode<synchronous>, transform_indices = @transform_10, window_bounds = array<i64: 1, 32>}, {pipeline_mode = #tpu.pipeline_mode<synchronous>, transform_indices = @transform_11, window_bounds = array<i64: 1, 32>}, {transform_indices = @transform_12, window_bounds = array<i64: 1, 10, 32>}]} {
    %c0 = arith.constant 0 : index
    %c0_0 = arith.constant 0 : index
    %c0_1 = arith.constant 0 : index
    %0 = vector.load %arg1[%c0, %c0_0, %c0_1] : memref<1x10x32xf32, #tpu.memory_space<vmem>>, vector<1x10x32xf32>
    %1 = vector.shape_cast %0 : vector<1x10x32xf32> to vector<10x32xf32>
    %2 = arith.truncf %1 : vector<10x32xf32> to vector<10x32xbf16>
    %c0_2 = arith.constant 0 : index
    %c0_3 = arith.constant 0 : index
    %c0_4 = arith.constant 0 : index
    %3 = vector.load %arg10[%c0_2, %c0_3, %c0_4] : memref<1x1x10xf32, #tpu.memory_space<vmem>>, vector<1x1x10xf32>
    %4 = vector.shape_cast %3 : vector<1x1x10xf32> to vector<1x10xf32>
    %5 = vector.shape_cast %4 : vector<1x10xf32> to vector<1x10xf32>
    %6 = vector.broadcast %5 : vector<1x10xf32> to vector<10x10xf32>
    %cst = arith.constant 0.000000e+00 : f32
    %7 = vector.broadcast %cst : f32 to vector<10x32xf32>
    %c0_5 = arith.constant 0 : index
    %c0_6 = arith.constant 0 : index
    %c0_7 = arith.constant 0 : index
    %8 = vector.load %arg2[%c0_5, %c0_6, %c0_7] : memref<4x32x8xbf16, #tpu.memory_space<vmem>>, vector<1x32x8xbf16>
    %9 = vector.shape_cast %8 : vector<1x32x8xbf16> to vector<32x8xbf16>
    %cst_8 = arith.constant dense<0.000000e+00> : vector<10x8xf32>
    %10 = tpu.matmul %2, %9, %cst_8 {dimension_numbers = #tpu.dot_dimension_numbers<[1], [0], [0], [1], [0, 0, 1, 1], [], []>} : vector<10x32xbf16>, vector<32x8xbf16>, vector<10x8xf32> -> vector<10x8xf32>
    %c0_9 = arith.constant 0 : index
    %c0_10 = arith.constant 0 : index
    %c0_11 = arith.constant 0 : index
    %11 = vector.load %arg3[%c0_9, %c0_10, %c0_11] : memref<4x1x8xf32, #tpu.memory_space<vmem>>, vector<1x1x8xf32>
    %12 = vector.shape_cast %11 : vector<1x1x8xf32> to vector<1x8xf32>
    %13 = vector.broadcast %12 : vector<1x8xf32> to vector<10x8xf32>
    %14 = arith.addf %10, %13 : vector<10x8xf32>
    %c0_12 = arith.constant 0 : index
    %c0_13 = arith.constant 0 : index
    %c0_14 = arith.constant 0 : index
    %15 = vector.load %arg4[%c0_12, %c0_13, %c0_14] : memref<4x32x8xbf16, #tpu.memory_space<vmem>>, vector<1x32x8xbf16>
    %16 = vector.shape_cast %15 : vector<1x32x8xbf16> to vector<32x8xbf16>
    %cst_15 = arith.constant dense<0.000000e+00> : vector<10x8xf32>
    %17 = tpu.matmul %2, %16, %cst_15 {dimension_numbers = #tpu.dot_dimension_numbers<[1], [0], [0], [1], [0, 0, 1, 1], [], []>} : vector<10x32xbf16>, vector<32x8xbf16>, vector<10x8xf32> -> vector<10x8xf32>
    %c0_16 = arith.constant 0 : index
    %c0_17 = arith.constant 0 : index
    %c0_18 = arith.constant 0 : index
    %18 = vector.load %arg5[%c0_16, %c0_17, %c0_18] : memref<4x1x8xf32, #tpu.memory_space<vmem>>, vector<1x1x8xf32>
    %19 = vector.shape_cast %18 : vector<1x1x8xf32> to vector<1x8xf32>
    %20 = vector.broadcast %19 : vector<1x8xf32> to vector<10x8xf32>
    %21 = arith.addf %17, %20 : vector<10x8xf32>
    %c0_19 = arith.constant 0 : index
    %c0_20 = arith.constant 0 : index
    %c0_21 = arith.constant 0 : index
    %22 = vector.load %arg6[%c0_19, %c0_20, %c0_21] : memref<4x32x8xbf16, #tpu.memory_space<vmem>>, vector<1x32x8xbf16>
    %23 = vector.shape_cast %22 : vector<1x32x8xbf16> to vector<32x8xbf16>
    %cst_22 = arith.constant dense<0.000000e+00> : vector<10x8xf32>
    %24 = tpu.matmul %2, %23, %cst_22 {dimension_numbers = #tpu.dot_dimension_numbers<[1], [0], [0], [1], [0, 0, 1, 1], [], []>} : vector<10x32xbf16>, vector<32x8xbf16>, vector<10x8xf32> -> vector<10x8xf32>
    %c0_23 = arith.constant 0 : index
    %c0_24 = arith.constant 0 : index
    %c0_25 = arith.constant 0 : index
    %25 = vector.load %arg7[%c0_23, %c0_24, %c0_25] : memref<4x1x8xf32, #tpu.memory_space<vmem>>, vector<1x1x8xf32>
    %26 = vector.shape_cast %25 : vector<1x1x8xf32> to vector<1x8xf32>
    %27 = vector.broadcast %26 : vector<1x8xf32> to vector<10x8xf32>
    %28 = arith.addf %24, %27 : vector<10x8xf32>
    %29 = arith.truncf %14 : vector<10x8xf32> to vector<10x8xbf16>
    %30 = arith.truncf %21 : vector<10x8xf32> to vector<10x8xbf16>
    %cst_26 = arith.constant dense<0.000000e+00> : vector<10x10xf32>
    %31 = tpu.matmul %29, %30, %cst_26 {dimension_numbers = #tpu.dot_dimension_numbers<[1], [1], [0], [0], [0, 0, 1, 0], [], []>} : vector<10x8xbf16>, vector<10x8xbf16>, vector<10x10xf32> -> vector<10x10xf32>
    %32 = arith.addf %31, %6 : vector<10x10xf32>
    %cst_27 = arith.constant dense<0xFF800000> : vector<10xf32>
    %33 = vector.multi_reduction <maximumf>, %32, %cst_27 [1] : vector<10x10xf32> to vector<10xf32>
    %34 = vector.shape_cast %33 : vector<10xf32> to vector<10x1xf32>
    %35 = vector.broadcast %34 : vector<10x1xf32> to vector<10x10xf32>
    %36 = arith.subf %32, %35 : vector<10x10xf32>
    %37 = math.exp %36 : vector<10x10xf32>
    %cst_28 = arith.constant dense<0.000000e+00> : vector<10xf32>
    %38 = vector.multi_reduction <add>, %37, %cst_28 [1] : vector<10x10xf32> to vector<10xf32>
    %39 = vector.shape_cast %38 : vector<10xf32> to vector<10x1xf32>
    %40 = tpu.reciprocal %39 {approx = true} : vector<10x1xf32> -> vector<10x1xf32>
    %41 = vector.broadcast %40 : vector<10x1xf32> to vector<10x10xf32>
    %42 = arith.mulf %37, %41 : vector<10x10xf32>
    %43 = arith.truncf %42 : vector<10x10xf32> to vector<10x10xbf16>
    %44 = arith.truncf %28 : vector<10x8xf32> to vector<10x8xbf16>
    %cst_29 = arith.constant dense<0.000000e+00> : vector<10x8xf32>
    %45 = tpu.matmul %43, %44, %cst_29 {dimension_numbers = #tpu.dot_dimension_numbers<[1], [0], [0], [1], [0, 0, 1, 1], [], []>} : vector<10x10xbf16>, vector<10x8xbf16>, vector<10x8xf32> -> vector<10x8xf32>
    %46 = arith.truncf %45 : vector<10x8xf32> to vector<10x8xbf16>
    %c0_30 = arith.constant 0 : index
    %c0_31 = arith.constant 0 : index
    %c0_32 = arith.constant 0 : index
    %47 = vector.load %arg8[%c0_30, %c0_31, %c0_32] : memref<4x8x32xbf16, #tpu.memory_space<vmem>>, vector<1x8x32xbf16>
    %48 = vector.shape_cast %47 : vector<1x8x32xbf16> to vector<8x32xbf16>
    %cst_33 = arith.constant dense<0.000000e+00> : vector<10x32xf32>
    %49 = tpu.matmul %46, %48, %cst_33 {dimension_numbers = #tpu.dot_dimension_numbers<[1], [0], [0], [1], [0, 0, 1, 1], [], []>} : vector<10x8xbf16>, vector<8x32xbf16>, vector<10x32xf32> -> vector<10x32xf32>
    %50 = arith.addf %7, %49 : vector<10x32xf32>
    %c1 = arith.constant 1 : index
    %c0_34 = arith.constant 0 : index
    %c0_35 = arith.constant 0 : index
    %51 = vector.load %arg2[%c1, %c0_34, %c0_35] : memref<4x32x8xbf16, #tpu.memory_space<vmem>>, vector<1x32x8xbf16>
    %52 = vector.shape_cast %51 : vector<1x32x8xbf16> to vector<32x8xbf16>
    %cst_36 = arith.constant dense<0.000000e+00> : vector<10x8xf32>
    %53 = tpu.matmul %2, %52, %cst_36 {dimension_numbers = #tpu.dot_dimension_numbers<[1], [0], [0], [1], [0, 0, 1, 1], [], []>} : vector<10x32xbf16>, vector<32x8xbf16>, vector<10x8xf32> -> vector<10x8xf32>
    %c1_37 = arith.constant 1 : index
    %c0_38 = arith.constant 0 : index
    %c0_39 = arith.constant 0 : index
    %54 = vector.load %arg3[%c1_37, %c0_38, %c0_39] : memref<4x1x8xf32, #tpu.memory_space<vmem>>, vector<1x1x8xf32>
    %55 = vector.shape_cast %54 : vector<1x1x8xf32> to vector<1x8xf32>
    %56 = vector.broadcast %55 : vector<1x8xf32> to vector<10x8xf32>
    %57 = arith.addf %53, %56 : vector<10x8xf32>
    %c1_40 = arith.constant 1 : index
    %c0_41 = arith.constant 0 : index
    %c0_42 = arith.constant 0 : index
    %58 = vector.load %arg4[%c1_40, %c0_41, %c0_42] : memref<4x32x8xbf16, #tpu.memory_space<vmem>>, vector<1x32x8xbf16>
    %59 = vector.shape_cast %58 : vector<1x32x8xbf16> to vector<32x8xbf16>
    %cst_43 = arith.constant dense<0.000000e+00> : vector<10x8xf32>
    %60 = tpu.matmul %2, %59, %cst_43 {dimension_numbers = #tpu.dot_dimension_numbers<[1], [0], [0], [1], [0, 0, 1, 1], [], []>} : vector<10x32xbf16>, vector<32x8xbf16>, vector<10x8xf32> -> vector<10x8xf32>
    %c1_44 = arith.constant 1 : index
    %c0_45 = arith.constant 0 : index
    %c0_46 = arith.constant 0 : index
    %61 = vector.load %arg5[%c1_44, %c0_45, %c0_46] : memref<4x1x8xf32, #tpu.memory_space<vmem>>, vector<1x1x8xf32>
    %62 = vector.shape_cast %61 : vector<1x1x8xf32> to vector<1x8xf32>
    %63 = vector.broadcast %62 : vector<1x8xf32> to vector<10x8xf32>
    %64 = arith.addf %60, %63 : vector<10x8xf32>
    %c1_47 = arith.constant 1 : index
    %c0_48 = arith.constant 0 : index
    %c0_49 = arith.constant 0 : index
    %65 = vector.load %arg6[%c1_47, %c0_48, %c0_49] : memref<4x32x8xbf16, #tpu.memory_space<vmem>>, vector<1x32x8xbf16>
    %66 = vector.shape_cast %65 : vector<1x32x8xbf16> to vector<32x8xbf16>
    %cst_50 = arith.constant dense<0.000000e+00> : vector<10x8xf32>
    %67 = tpu.matmul %2, %66, %cst_50 {dimension_numbers = #tpu.dot_dimension_numbers<[1], [0], [0], [1], [0, 0, 1, 1], [], []>} : vector<10x32xbf16>, vector<32x8xbf16>, vector<10x8xf32> -> vector<10x8xf32>
    %c1_51 = arith.constant 1 : index
    %c0_52 = arith.constant 0 : index
    %c0_53 = arith.constant 0 : index
    %68 = vector.load %arg7[%c1_51, %c0_52, %c0_53] : memref<4x1x8xf32, #tpu.memory_space<vmem>>, vector<1x1x8xf32>
    %69 = vector.shape_cast %68 : vector<1x1x8xf32> to vector<1x8xf32>
    %70 = vector.broadcast %69 : vector<1x8xf32> to vector<10x8xf32>
    %71 = arith.addf %67, %70 : vector<10x8xf32>
    %72 = arith.truncf %57 : vector<10x8xf32> to vector<10x8xbf16>
    %73 = arith.truncf %64 : vector<10x8xf32> to vector<10x8xbf16>
    %cst_54 = arith.constant dense<0.000000e+00> : vector<10x10xf32>
    %74 = tpu.matmul %72, %73, %cst_54 {dimension_numbers = #tpu.dot_dimension_numbers<[1], [1], [0], [0], [0, 0, 1, 0], [], []>} : vector<10x8xbf16>, vector<10x8xbf16>, vector<10x10xf32> -> vector<10x10xf32>
    %75 = arith.addf %74, %6 : vector<10x10xf32>
    %cst_55 = arith.constant dense<0xFF800000> : vector<10xf32>
    %76 = vector.multi_reduction <maximumf>, %75, %cst_55 [1] : vector<10x10xf32> to vector<10xf32>
    %77 = vector.shape_cast %76 : vector<10xf32> to vector<10x1xf32>
    %78 = vector.broadcast %77 : vector<10x1xf32> to vector<10x10xf32>
    %79 = arith.subf %75, %78 : vector<10x10xf32>
    %80 = math.exp %79 : vector<10x10xf32>
    %cst_56 = arith.constant dense<0.000000e+00> : vector<10xf32>
    %81 = vector.multi_reduction <add>, %80, %cst_56 [1] : vector<10x10xf32> to vector<10xf32>
    %82 = vector.shape_cast %81 : vector<10xf32> to vector<10x1xf32>
    %83 = tpu.reciprocal %82 {approx = true} : vector<10x1xf32> -> vector<10x1xf32>
    %84 = vector.broadcast %83 : vector<10x1xf32> to vector<10x10xf32>
    %85 = arith.mulf %80, %84 : vector<10x10xf32>
    %86 = arith.truncf %85 : vector<10x10xf32> to vector<10x10xbf16>
    %87 = arith.truncf %71 : vector<10x8xf32> to vector<10x8xbf16>
    %cst_57 = arith.constant dense<0.000000e+00> : vector<10x8xf32>
    %88 = tpu.matmul %86, %87, %cst_57 {dimension_numbers = #tpu.dot_dimension_numbers<[1], [0], [0], [1], [0, 0, 1, 1], [], []>} : vector<10x10xbf16>, vector<10x8xbf16>, vector<10x8xf32> -> vector<10x8xf32>
    %89 = arith.truncf %88 : vector<10x8xf32> to vector<10x8xbf16>
    %c1_58 = arith.constant 1 : index
    %c0_59 = arith.constant 0 : index
    %c0_60 = arith.constant 0 : index
    %90 = vector.load %arg8[%c1_58, %c0_59, %c0_60] : memref<4x8x32xbf16, #tpu.memory_space<vmem>>, vector<1x8x32xbf16>
    %91 = vector.shape_cast %90 : vector<1x8x32xbf16> to vector<8x32xbf16>
    %cst_61 = arith.constant dense<0.000000e+00> : vector<10x32xf32>
    %92 = tpu.matmul %89, %91, %cst_61 {dimension_numbers = #tpu.dot_dimension_numbers<[1], [0], [0], [1], [0, 0, 1, 1], [], []>} : vector<10x8xbf16>, vector<8x32xbf16>, vector<10x32xf32> -> vector<10x32xf32>
    %93 = arith.addf %50, %92 : vector<10x32xf32>
    %c2 = arith.constant 2 : index
    %c0_62 = arith.constant 0 : index
    %c0_63 = arith.constant 0 : index
    %94 = vector.load %arg2[%c2, %c0_62, %c0_63] : memref<4x32x8xbf16, #tpu.memory_space<vmem>>, vector<1x32x8xbf16>
    %95 = vector.shape_cast %94 : vector<1x32x8xbf16> to vector<32x8xbf16>
    %cst_64 = arith.constant dense<0.000000e+00> : vector<10x8xf32>
    %96 = tpu.matmul %2, %95, %cst_64 {dimension_numbers = #tpu.dot_dimension_numbers<[1], [0], [0], [1], [0, 0, 1, 1], [], []>} : vector<10x32xbf16>, vector<32x8xbf16>, vector<10x8xf32> -> vector<10x8xf32>
    %c2_65 = arith.constant 2 : index
    %c0_66 = arith.constant 0 : index
    %c0_67 = arith.constant 0 : index
    %97 = vector.load %arg3[%c2_65, %c0_66, %c0_67] : memref<4x1x8xf32, #tpu.memory_space<vmem>>, vector<1x1x8xf32>
    %98 = vector.shape_cast %97 : vector<1x1x8xf32> to vector<1x8xf32>
    %99 = vector.broadcast %98 : vector<1x8xf32> to vector<10x8xf32>
    %100 = arith.addf %96, %99 : vector<10x8xf32>
    %c2_68 = arith.constant 2 : index
    %c0_69 = arith.constant 0 : index
    %c0_70 = arith.constant 0 : index
    %101 = vector.load %arg4[%c2_68, %c0_69, %c0_70] : memref<4x32x8xbf16, #tpu.memory_space<vmem>>, vector<1x32x8xbf16>
    %102 = vector.shape_cast %101 : vector<1x32x8xbf16> to vector<32x8xbf16>
    %cst_71 = arith.constant dense<0.000000e+00> : vector<10x8xf32>
    %103 = tpu.matmul %2, %102, %cst_71 {dimension_numbers = #tpu.dot_dimension_numbers<[1], [0], [0], [1], [0, 0, 1, 1], [], []>} : vector<10x32xbf16>, vector<32x8xbf16>, vector<10x8xf32> -> vector<10x8xf32>
    %c2_72 = arith.constant 2 : index
    %c0_73 = arith.constant 0 : index
    %c0_74 = arith.constant 0 : index
    %104 = vector.load %arg5[%c2_72, %c0_73, %c0_74] : memref<4x1x8xf32, #tpu.memory_space<vmem>>, vector<1x1x8xf32>
    %105 = vector.shape_cast %104 : vector<1x1x8xf32> to vector<1x8xf32>
    %106 = vector.broadcast %105 : vector<1x8xf32> to vector<10x8xf32>
    %107 = arith.addf %103, %106 : vector<10x8xf32>
    %c2_75 = arith.constant 2 : index
    %c0_76 = arith.constant 0 : index
    %c0_77 = arith.constant 0 : index
    %108 = vector.load %arg6[%c2_75, %c0_76, %c0_77] : memref<4x32x8xbf16, #tpu.memory_space<vmem>>, vector<1x32x8xbf16>
    %109 = vector.shape_cast %108 : vector<1x32x8xbf16> to vector<32x8xbf16>
    %cst_78 = arith.constant dense<0.000000e+00> : vector<10x8xf32>
    %110 = tpu.matmul %2, %109, %cst_78 {dimension_numbers = #tpu.dot_dimension_numbers<[1], [0], [0], [1], [0, 0, 1, 1], [], []>} : vector<10x32xbf16>, vector<32x8xbf16>, vector<10x8xf32> -> vector<10x8xf32>
    %c2_79 = arith.constant 2 : index
    %c0_80 = arith.constant 0 : index
    %c0_81 = arith.constant 0 : index
    %111 = vector.load %arg7[%c2_79, %c0_80, %c0_81] : memref<4x1x8xf32, #tpu.memory_space<vmem>>, vector<1x1x8xf32>
    %112 = vector.shape_cast %111 : vector<1x1x8xf32> to vector<1x8xf32>
    %113 = vector.broadcast %112 : vector<1x8xf32> to vector<10x8xf32>
    %114 = arith.addf %110, %113 : vector<10x8xf32>
    %115 = arith.truncf %100 : vector<10x8xf32> to vector<10x8xbf16>
    %116 = arith.truncf %107 : vector<10x8xf32> to vector<10x8xbf16>
    %cst_82 = arith.constant dense<0.000000e+00> : vector<10x10xf32>
    %117 = tpu.matmul %115, %116, %cst_82 {dimension_numbers = #tpu.dot_dimension_numbers<[1], [1], [0], [0], [0, 0, 1, 0], [], []>} : vector<10x8xbf16>, vector<10x8xbf16>, vector<10x10xf32> -> vector<10x10xf32>
    %118 = arith.addf %117, %6 : vector<10x10xf32>
    %cst_83 = arith.constant dense<0xFF800000> : vector<10xf32>
    %119 = vector.multi_reduction <maximumf>, %118, %cst_83 [1] : vector<10x10xf32> to vector<10xf32>
    %120 = vector.shape_cast %119 : vector<10xf32> to vector<10x1xf32>
    %121 = vector.broadcast %120 : vector<10x1xf32> to vector<10x10xf32>
    %122 = arith.subf %118, %121 : vector<10x10xf32>
    %123 = math.exp %122 : vector<10x10xf32>
    %cst_84 = arith.constant dense<0.000000e+00> : vector<10xf32>
    %124 = vector.multi_reduction <add>, %123, %cst_84 [1] : vector<10x10xf32> to vector<10xf32>
    %125 = vector.shape_cast %124 : vector<10xf32> to vector<10x1xf32>
    %126 = tpu.reciprocal %125 {approx = true} : vector<10x1xf32> -> vector<10x1xf32>
    %127 = vector.broadcast %126 : vector<10x1xf32> to vector<10x10xf32>
    %128 = arith.mulf %123, %127 : vector<10x10xf32>
    %129 = arith.truncf %128 : vector<10x10xf32> to vector<10x10xbf16>
    %130 = arith.truncf %114 : vector<10x8xf32> to vector<10x8xbf16>
    %cst_85 = arith.constant dense<0.000000e+00> : vector<10x8xf32>
    %131 = tpu.matmul %129, %130, %cst_85 {dimension_numbers = #tpu.dot_dimension_numbers<[1], [0], [0], [1], [0, 0, 1, 1], [], []>} : vector<10x10xbf16>, vector<10x8xbf16>, vector<10x8xf32> -> vector<10x8xf32>
    %132 = arith.truncf %131 : vector<10x8xf32> to vector<10x8xbf16>
    %c2_86 = arith.constant 2 : index
    %c0_87 = arith.constant 0 : index
    %c0_88 = arith.constant 0 : index
    %133 = vector.load %arg8[%c2_86, %c0_87, %c0_88] : memref<4x8x32xbf16, #tpu.memory_space<vmem>>, vector<1x8x32xbf16>
    %134 = vector.shape_cast %133 : vector<1x8x32xbf16> to vector<8x32xbf16>
    %cst_89 = arith.constant dense<0.000000e+00> : vector<10x32xf32>
    %135 = tpu.matmul %132, %134, %cst_89 {dimension_numbers = #tpu.dot_dimension_numbers<[1], [0], [0], [1], [0, 0, 1, 1], [], []>} : vector<10x8xbf16>, vector<8x32xbf16>, vector<10x32xf32> -> vector<10x32xf32>
    %136 = arith.addf %93, %135 : vector<10x32xf32>
    %c3 = arith.constant 3 : index
    %c0_90 = arith.constant 0 : index
    %c0_91 = arith.constant 0 : index
    %137 = vector.load %arg2[%c3, %c0_90, %c0_91] : memref<4x32x8xbf16, #tpu.memory_space<vmem>>, vector<1x32x8xbf16>
    %138 = vector.shape_cast %137 : vector<1x32x8xbf16> to vector<32x8xbf16>
    %cst_92 = arith.constant dense<0.000000e+00> : vector<10x8xf32>
    %139 = tpu.matmul %2, %138, %cst_92 {dimension_numbers = #tpu.dot_dimension_numbers<[1], [0], [0], [1], [0, 0, 1, 1], [], []>} : vector<10x32xbf16>, vector<32x8xbf16>, vector<10x8xf32> -> vector<10x8xf32>
    %c3_93 = arith.constant 3 : index
    %c0_94 = arith.constant 0 : index
    %c0_95 = arith.constant 0 : index
    %140 = vector.load %arg3[%c3_93, %c0_94, %c0_95] : memref<4x1x8xf32, #tpu.memory_space<vmem>>, vector<1x1x8xf32>
    %141 = vector.shape_cast %140 : vector<1x1x8xf32> to vector<1x8xf32>
    %142 = vector.broadcast %141 : vector<1x8xf32> to vector<10x8xf32>
    %143 = arith.addf %139, %142 : vector<10x8xf32>
    %c3_96 = arith.constant 3 : index
    %c0_97 = arith.constant 0 : index
    %c0_98 = arith.constant 0 : index
    %144 = vector.load %arg4[%c3_96, %c0_97, %c0_98] : memref<4x32x8xbf16, #tpu.memory_space<vmem>>, vector<1x32x8xbf16>
    %145 = vector.shape_cast %144 : vector<1x32x8xbf16> to vector<32x8xbf16>
    %cst_99 = arith.constant dense<0.000000e+00> : vector<10x8xf32>
    %146 = tpu.matmul %2, %145, %cst_99 {dimension_numbers = #tpu.dot_dimension_numbers<[1], [0], [0], [1], [0, 0, 1, 1], [], []>} : vector<10x32xbf16>, vector<32x8xbf16>, vector<10x8xf32> -> vector<10x8xf32>
    %c3_100 = arith.constant 3 : index
    %c0_101 = arith.constant 0 : index
    %c0_102 = arith.constant 0 : index
    %147 = vector.load %arg5[%c3_100, %c0_101, %c0_102] : memref<4x1x8xf32, #tpu.memory_space<vmem>>, vector<1x1x8xf32>
    %148 = vector.shape_cast %147 : vector<1x1x8xf32> to vector<1x8xf32>
    %149 = vector.broadcast %148 : vector<1x8xf32> to vector<10x8xf32>
    %150 = arith.addf %146, %149 : vector<10x8xf32>
    %c3_103 = arith.constant 3 : index
    %c0_104 = arith.constant 0 : index
    %c0_105 = arith.constant 0 : index
    %151 = vector.load %arg6[%c3_103, %c0_104, %c0_105] : memref<4x32x8xbf16, #tpu.memory_space<vmem>>, vector<1x32x8xbf16>
    %152 = vector.shape_cast %151 : vector<1x32x8xbf16> to vector<32x8xbf16>
    %cst_106 = arith.constant dense<0.000000e+00> : vector<10x8xf32>
    %153 = tpu.matmul %2, %152, %cst_106 {dimension_numbers = #tpu.dot_dimension_numbers<[1], [0], [0], [1], [0, 0, 1, 1], [], []>} : vector<10x32xbf16>, vector<32x8xbf16>, vector<10x8xf32> -> vector<10x8xf32>
    %c3_107 = arith.constant 3 : index
    %c0_108 = arith.constant 0 : index
    %c0_109 = arith.constant 0 : index
    %154 = vector.load %arg7[%c3_107, %c0_108, %c0_109] : memref<4x1x8xf32, #tpu.memory_space<vmem>>, vector<1x1x8xf32>
    %155 = vector.shape_cast %154 : vector<1x1x8xf32> to vector<1x8xf32>
    %156 = vector.broadcast %155 : vector<1x8xf32> to vector<10x8xf32>
    %157 = arith.addf %153, %156 : vector<10x8xf32>
    %158 = arith.truncf %143 : vector<10x8xf32> to vector<10x8xbf16>
    %159 = arith.truncf %150 : vector<10x8xf32> to vector<10x8xbf16>
    %cst_110 = arith.constant dense<0.000000e+00> : vector<10x10xf32>
    %160 = tpu.matmul %158, %159, %cst_110 {dimension_numbers = #tpu.dot_dimension_numbers<[1], [1], [0], [0], [0, 0, 1, 0], [], []>} : vector<10x8xbf16>, vector<10x8xbf16>, vector<10x10xf32> -> vector<10x10xf32>
    %161 = arith.addf %160, %6 : vector<10x10xf32>
    %cst_111 = arith.constant dense<0xFF800000> : vector<10xf32>
    %162 = vector.multi_reduction <maximumf>, %161, %cst_111 [1] : vector<10x10xf32> to vector<10xf32>
    %163 = vector.shape_cast %162 : vector<10xf32> to vector<10x1xf32>
    %164 = vector.broadcast %163 : vector<10x1xf32> to vector<10x10xf32>
    %165 = arith.subf %161, %164 : vector<10x10xf32>
    %166 = math.exp %165 : vector<10x10xf32>
    %cst_112 = arith.constant dense<0.000000e+00> : vector<10xf32>
    %167 = vector.multi_reduction <add>, %166, %cst_112 [1] : vector<10x10xf32> to vector<10xf32>
    %168 = vector.shape_cast %167 : vector<10xf32> to vector<10x1xf32>
    %169 = tpu.reciprocal %168 {approx = true} : vector<10x1xf32> -> vector<10x1xf32>
    %170 = vector.broadcast %169 : vector<10x1xf32> to vector<10x10xf32>
    %171 = arith.mulf %166, %170 : vector<10x10xf32>
    %172 = arith.truncf %171 : vector<10x10xf32> to vector<10x10xbf16>
    %173 = arith.truncf %157 : vector<10x8xf32> to vector<10x8xbf16>
    %cst_113 = arith.constant dense<0.000000e+00> : vector<10x8xf32>
    %174 = tpu.matmul %172, %173, %cst_113 {dimension_numbers = #tpu.dot_dimension_numbers<[1], [0], [0], [1], [0, 0, 1, 1], [], []>} : vector<10x10xbf16>, vector<10x8xbf16>, vector<10x8xf32> -> vector<10x8xf32>
    %175 = arith.truncf %174 : vector<10x8xf32> to vector<10x8xbf16>
    %c3_114 = arith.constant 3 : index
    %c0_115 = arith.constant 0 : index
    %c0_116 = arith.constant 0 : index
    %176 = vector.load %arg8[%c3_114, %c0_115, %c0_116] : memref<4x8x32xbf16, #tpu.memory_space<vmem>>, vector<1x8x32xbf16>
    %177 = vector.shape_cast %176 : vector<1x8x32xbf16> to vector<8x32xbf16>
    %cst_117 = arith.constant dense<0.000000e+00> : vector<10x32xf32>
    %178 = tpu.matmul %175, %177, %cst_117 {dimension_numbers = #tpu.dot_dimension_numbers<[1], [0], [0], [1], [0, 0, 1, 1], [], []>} : vector<10x8xbf16>, vector<8x32xbf16>, vector<10x32xf32> -> vector<10x32xf32>
    %179 = arith.addf %136, %178 : vector<10x32xf32>
    %c0_118 = arith.constant 0 : index
    %c0_119 = arith.constant 0 : index
    %180 = vector.load %arg9[%c0_118, %c0_119] : memref<1x32xf32, #tpu.memory_space<vmem>>, vector<1x32xf32>
    %181 = vector.broadcast %180 : vector<1x32xf32> to vector<10x32xf32>
    %182 = arith.addf %179, %181 : vector<10x32xf32>
    %183 = arith.addf %1, %182 : vector<10x32xf32>
    %cst_120 = arith.constant dense<0.000000e+00> : vector<10xf32>
    %184 = vector.multi_reduction <add>, %183, %cst_120 [1] : vector<10x32xf32> to vector<10xf32>
    %185 = vector.shape_cast %184 : vector<10xf32> to vector<10x1xf32>
    %cst_121 = arith.constant 3.200000e+01 : f32
    %186 = vector.broadcast %cst_121 : f32 to vector<10x1xf32>
    %187 = arith.divf %185, %186 : vector<10x1xf32>
    %188 = vector.broadcast %187 : vector<10x1xf32> to vector<10x32xf32>
    %189 = arith.subf %183, %188 : vector<10x32xf32>
    %190 = arith.mulf %189, %189 : vector<10x32xf32>
    %cst_122 = arith.constant dense<0.000000e+00> : vector<10xf32>
    %191 = vector.multi_reduction <add>, %190, %cst_122 [1] : vector<10x32xf32> to vector<10xf32>
    %192 = vector.shape_cast %191 : vector<10xf32> to vector<10x1xf32>
    %cst_123 = arith.constant 3.200000e+01 : f32
    %193 = vector.broadcast %cst_123 : f32 to vector<10x1xf32>
    %194 = arith.divf %192, %193 : vector<10x1xf32>
    %195 = vector.broadcast %187 : vector<10x1xf32> to vector<10x32xf32>
    %196 = arith.subf %183, %195 : vector<10x32xf32>
    %cst_124 = arith.constant 9.99999974E-6 : f32
    %197 = vector.broadcast %cst_124 : f32 to vector<10x1xf32>
    %198 = arith.addf %194, %197 : vector<10x1xf32>
    %199 = math.rsqrt %198 : vector<10x1xf32>
    %200 = vector.broadcast %199 : vector<10x1xf32> to vector<10x32xf32>
    %201 = arith.mulf %196, %200 : vector<10x32xf32>
    %c0_125 = arith.constant 0 : index
    %c0_126 = arith.constant 0 : index
    %202 = vector.load %arg11[%c0_125, %c0_126] : memref<1x32xf32, #tpu.memory_space<vmem>>, vector<1x32xf32>
    %203 = vector.broadcast %202 : vector<1x32xf32> to vector<10x32xf32>
    %204 = arith.mulf %201, %203 : vector<10x32xf32>
    %c0_127 = arith.constant 0 : index
    %c0_128 = arith.constant 0 : index
    %205 = vector.load %arg12[%c0_127, %c0_128] : memref<1x32xf32, #tpu.memory_space<vmem>>, vector<1x32xf32>
    %206 = vector.broadcast %205 : vector<1x32xf32> to vector<10x32xf32>
    %207 = arith.addf %204, %206 : vector<10x32xf32>
    %c0_129 = arith.constant 0 : index
    %c0_130 = arith.constant 0 : index
    %c0_131 = arith.constant 0 : index
    %208 = vector.load %arg13[%c0_129, %c0_130, %c0_131] : memref<1x10x32xf32, #tpu.memory_space<vmem>>, vector<1x10x32xf32>
    %209 = vector.shape_cast %208 : vector<1x10x32xf32> to vector<10x32xf32>
    %210 = vector.shape_cast %207 : vector<10x32xf32> to vector<1x10x32xf32>
    tpu.vector_store %arg13[%c0_129, %c0_130, %c0_131], %210 {strides = array<i32>} : memref<1x10x32xf32, #tpu.memory_space<vmem>>, vector<1x10x32xf32>,
    return
  }
  func.func @transform_0(%arg0: i32) -> (i32, i32, i32) {
    %c0_i32 = arith.constant 0 : i32
    %c0_i32_0 = arith.constant 0 : i32
    %c0_i32_1 = arith.constant 0 : i32
    return %arg0, %c0_i32, %c0_i32_0 : i32, i32, i32
  }
  func.func @transform_1(%arg0: i32) -> (i32, i32, i32) {
    %c0_i32 = arith.constant 0 : i32
    %c0_i32_0 = arith.constant 0 : i32
    %c0_i32_1 = arith.constant 0 : i32
    %c0_i32_2 = arith.constant 0 : i32
    return %c0_i32, %c0_i32_0, %c0_i32_1 : i32, i32, i32
  }
  func.func @transform_2(%arg0: i32) -> (i32, i32, i32) {
    %c0_i32 = arith.constant 0 : i32
    %c0_i32_0 = arith.constant 0 : i32
    %c0_i32_1 = arith.constant 0 : i32
    %c0_i32_2 = arith.constant 0 : i32
    return %c0_i32, %c0_i32_0, %c0_i32_1 : i32, i32, i32
  }
  func.func @transform_3(%arg0: i32) -> (i32, i32, i32) {
    %c0_i32 = arith.constant 0 : i32
    %c0_i32_0 = arith.constant 0 : i32
    %c0_i32_1 = arith.constant 0 : i32
    %c0_i32_2 = arith.constant 0 : i32
    return %c0_i32, %c0_i32_0, %c0_i32_1 : i32, i32, i32
  }
  func.func @transform_4(%arg0: i32) -> (i32, i32, i32) {
    %c0_i32 = arith.constant 0 : i32
    %c0_i32_0 = arith.constant 0 : i32
    %c0_i32_1 = arith.constant 0 : i32
    %c0_i32_2 = arith.constant 0 : i32
    return %c0_i32, %c0_i32_0, %c0_i32_1 : i32, i32, i32
  }
  func.func @transform_5(%arg0: i32) -> (i32, i32, i32) {
    %c0_i32 = arith.constant 0 : i32
    %c0_i32_0 = arith.constant 0 : i32
    %c0_i32_1 = arith.constant 0 : i32
    %c0_i32_2 = arith.constant 0 : i32
    return %c0_i32, %c0_i32_0, %c0_i32_1 : i32, i32, i32
  }
  func.func @transform_6(%arg0: i32) -> (i32, i32, i32) {
    %c0_i32 = arith.constant 0 : i32
    %c0_i32_0 = arith.constant 0 : i32
    %c0_i32_1 = arith.constant 0 : i32
    %c0_i32_2 = arith.constant 0 : i32
    return %c0_i32, %c0_i32_0, %c0_i32_1 : i32, i32, i32
  }
  func.func @transform_7(%arg0: i32) -> (i32, i32, i32) {
    %c0_i32 = arith.constant 0 : i32
    %c0_i32_0 = arith.constant 0 : i32
    %c0_i32_1 = arith.constant 0 : i32
    %c0_i32_2 = arith.constant 0 : i32
    return %c0_i32, %c0_i32_0, %c0_i32_1 : i32, i32, i32
  }
  func.func @transform_8(%arg0: i32) -> (i32, i32) {
    %c0_i32 = arith.constant 0 : i32
    %c0_i32_0 = arith.constant 0 : i32
    %c0_i32_1 = arith.constant 0 : i32
    return %c0_i32, %c0_i32_0 : i32, i32
  }
  func.func @transform_9(%arg0: i32) -> (i32, i32, i32) {
    %c0_i32 = arith.constant 0 : i32
    %c0_i32_0 = arith.constant 0 : i32
    %c0_i32_1 = arith.constant 0 : i32
    return %arg0, %c0_i32, %c0_i32_0 : i32, i32, i32
  }
  func.func @transform_10(%arg0: i32) -> (i32, i32) {
    %c0_i32 = arith.constant 0 : i32
    %c0_i32_0 = arith.constant 0 : i32
    %c0_i32_1 = arith.constant 0 : i32
    return %c0_i32, %c0_i32_0 : i32, i32
  }
  func.func @transform_11(%arg0: i32) -> (i32, i32) {
    %c0_i32 = arith.constant 0 : i32
    %c0_i32_0 = arith.constant 0 : i32
    %c0_i32_1 = arith.constant 0 : i32
    return %c0_i32, %c0_i32_0 : i32, i32
  }
  func.func @transform_12(%arg0: i32) -> (i32, i32, i32) {
    %c0_i32 = arith.constant 0 : i32
    %c0_i32_0 = arith.constant 0 : i32
    %c0_i32_1 = arith.constant 0 : i32
    return %arg0, %c0_i32, %c0_i32_0 : i32, i32, i32
  }
}

module attributes {stable_mosaic.version = 11 : i64} {
  func.func @_ln_kernel(%arg0: i32, %arg1: memref<1x10x32xf32, #tpu.memory_space<vmem>>, %arg2: memref<1x32xf32, #tpu.memory_space<vmem>>, %arg3: memref<1x32xf32, #tpu.memory_space<vmem>>, %arg4: memref<1x10x32xf32, #tpu.memory_space<vmem>>) attributes {dimension_semantics = [#tpu.dimension_semantics<parallel>], iteration_bounds = array<i64: 2>, scalar_prefetch = 0 : i64, scratch_operands = 0 : i64, tpu.core_type = #tpu.core_type<tc>, window_params = [{transform_indices = @transform_0, window_bounds = array<i64: 1, 10, 32>}, {pipeline_mode = #tpu.pipeline_mode<synchronous>, transform_indices = @transform_1, window_bounds = array<i64: 1, 32>}, {pipeline_mode = #tpu.pipeline_mode<synchronous>, transform_indices = @transform_2, window_bounds = array<i64: 1, 32>}, {transform_indices = @transform_3, window_bounds = array<i64: 1, 10, 32>}]} {
    %c0 = arith.constant 0 : index
    %c0_0 = arith.constant 0 : index
    %c0_1 = arith.constant 0 : index
    %0 = vector.load %arg1[%c0, %c0_0, %c0_1] : memref<1x10x32xf32, #tpu.memory_space<vmem>>, vector<1x10x32xf32>
    %1 = vector.shape_cast %0 : vector<1x10x32xf32> to vector<10x32xf32>
    %cst = arith.constant dense<0.000000e+00> : vector<10xf32>
    %2 = vector.multi_reduction <add>, %1, %cst [1] : vector<10x32xf32> to vector<10xf32>
    %3 = vector.shape_cast %2 : vector<10xf32> to vector<10x1xf32>
    %cst_2 = arith.constant 3.200000e+01 : f32
    %4 = vector.broadcast %cst_2 : f32 to vector<10x1xf32>
    %5 = arith.divf %3, %4 : vector<10x1xf32>
    %6 = vector.broadcast %5 : vector<10x1xf32> to vector<10x32xf32>
    %7 = arith.subf %1, %6 : vector<10x32xf32>
    %8 = arith.mulf %7, %7 : vector<10x32xf32>
    %cst_3 = arith.constant dense<0.000000e+00> : vector<10xf32>
    %9 = vector.multi_reduction <add>, %8, %cst_3 [1] : vector<10x32xf32> to vector<10xf32>
    %10 = vector.shape_cast %9 : vector<10xf32> to vector<10x1xf32>
    %cst_4 = arith.constant 3.200000e+01 : f32
    %11 = vector.broadcast %cst_4 : f32 to vector<10x1xf32>
    %12 = arith.divf %10, %11 : vector<10x1xf32>
    %13 = vector.broadcast %5 : vector<10x1xf32> to vector<10x32xf32>
    %14 = arith.subf %1, %13 : vector<10x32xf32>
    %cst_5 = arith.constant 9.99999974E-6 : f32
    %15 = vector.broadcast %cst_5 : f32 to vector<10x1xf32>
    %16 = arith.addf %12, %15 : vector<10x1xf32>
    %17 = math.rsqrt %16 : vector<10x1xf32>
    %18 = vector.broadcast %17 : vector<10x1xf32> to vector<10x32xf32>
    %19 = arith.mulf %14, %18 : vector<10x32xf32>
    %c0_6 = arith.constant 0 : index
    %c0_7 = arith.constant 0 : index
    %20 = vector.load %arg2[%c0_6, %c0_7] : memref<1x32xf32, #tpu.memory_space<vmem>>, vector<1x32xf32>
    %21 = vector.broadcast %20 : vector<1x32xf32> to vector<10x32xf32>
    %22 = arith.mulf %19, %21 : vector<10x32xf32>
    %c0_8 = arith.constant 0 : index
    %c0_9 = arith.constant 0 : index
    %23 = vector.load %arg3[%c0_8, %c0_9] : memref<1x32xf32, #tpu.memory_space<vmem>>, vector<1x32xf32>
    %24 = vector.broadcast %23 : vector<1x32xf32> to vector<10x32xf32>
    %25 = arith.addf %22, %24 : vector<10x32xf32>
    %c0_10 = arith.constant 0 : index
    %c0_11 = arith.constant 0 : index
    %c0_12 = arith.constant 0 : index
    %26 = vector.load %arg4[%c0_10, %c0_11, %c0_12] : memref<1x10x32xf32, #tpu.memory_space<vmem>>, vector<1x10x32xf32>
    %27 = vector.shape_cast %26 : vector<1x10x32xf32> to vector<10x32xf32>
    %28 = vector.shape_cast %25 : vector<10x32xf32> to vector<1x10x32xf32>
    tpu.vector_store %arg4[%c0_10, %c0_11, %c0_12], %28 {strides = array<i32>} : memref<1x10x32xf32, #tpu.memory_space<vmem>>, vector<1x10x32xf32>,
    return
  }
  func.func @transform_0(%arg0: i32) -> (i32, i32, i32) {
    %c0_i32 = arith.constant 0 : i32
    %c0_i32_0 = arith.constant 0 : i32
    %c0_i32_1 = arith.constant 0 : i32
    return %arg0, %c0_i32, %c0_i32_0 : i32, i32, i32
  }
  func.func @transform_1(%arg0: i32) -> (i32, i32) {
    %c0_i32 = arith.constant 0 : i32
    %c0_i32_0 = arith.constant 0 : i32
    %c0_i32_1 = arith.constant 0 : i32
    return %c0_i32, %c0_i32_0 : i32, i32
  }
  func.func @transform_2(%arg0: i32) -> (i32, i32) {
    %c0_i32 = arith.constant 0 : i32
    %c0_i32_0 = arith.constant 0 : i32
    %c0_i32_1 = arith.constant 0 : i32
    return %c0_i32, %c0_i32_0 : i32, i32
  }
  func.func @transform_3(%arg0: i32) -> (i32, i32, i32) {
    %c0_i32 = arith.constant 0 : i32
    %c0_i32_0 = arith.constant 0 : i32
    %c0_i32_1 = arith.constant 0 : i32
    return %arg0, %c0_i32, %c0_i32_0 : i32, i32, i32
  }
}

module attributes {stable_mosaic.version = 11 : i64} {
  func.func @_ffn_sublayer_kernel(%arg0: i32, %arg1: memref<1x10x32xf32, #tpu.memory_space<vmem>>, %arg2: memref<32x64xbf16, #tpu.memory_space<vmem>>, %arg3: memref<1x64xf32, #tpu.memory_space<vmem>>, %arg4: memref<64x32xbf16, #tpu.memory_space<vmem>>, %arg5: memref<1x32xf32, #tpu.memory_space<vmem>>, %arg6: memref<1x32xf32, #tpu.memory_space<vmem>>, %arg7: memref<1x32xf32, #tpu.memory_space<vmem>>, %arg8: memref<1x10x32xf32, #tpu.memory_space<vmem>>) attributes {dimension_semantics = [#tpu.dimension_semantics<parallel>], iteration_bounds = array<i64: 2>, scalar_prefetch = 0 : i64, scratch_operands = 0 : i64, tpu.core_type = #tpu.core_type<tc>, window_params = [{transform_indices = @transform_0, window_bounds = array<i64: 1, 10, 32>}, {pipeline_mode = #tpu.pipeline_mode<synchronous>, transform_indices = @transform_1, window_bounds = array<i64: 32, 64>}, {pipeline_mode = #tpu.pipeline_mode<synchronous>, transform_indices = @transform_2, window_bounds = array<i64: 1, 64>}, {pipeline_mode = #tpu.pipeline_mode<synchronous>, transform_indices = @transform_3, window_bounds = array<i64: 64, 32>}, {pipeline_mode = #tpu.pipeline_mode<synchronous>, transform_indices = @transform_4, window_bounds = array<i64: 1, 32>}, {pipeline_mode = #tpu.pipeline_mode<synchronous>, transform_indices = @transform_5, window_bounds = array<i64: 1, 32>}, {pipeline_mode = #tpu.pipeline_mode<synchronous>, transform_indices = @transform_6, window_bounds = array<i64: 1, 32>}, {transform_indices = @transform_7, window_bounds = array<i64: 1, 10, 32>}]} {
    %c0 = arith.constant 0 : index
    %c0_0 = arith.constant 0 : index
    %c0_1 = arith.constant 0 : index
    %0 = vector.load %arg1[%c0, %c0_0, %c0_1] : memref<1x10x32xf32, #tpu.memory_space<vmem>>, vector<1x10x32xf32>
    %1 = vector.shape_cast %0 : vector<1x10x32xf32> to vector<10x32xf32>
    %2 = arith.truncf %1 : vector<10x32xf32> to vector<10x32xbf16>
    %c0_2 = arith.constant 0 : index
    %c0_3 = arith.constant 0 : index
    %3 = vector.load %arg2[%c0_2, %c0_3] : memref<32x64xbf16, #tpu.memory_space<vmem>>, vector<32x64xbf16>
    %cst = arith.constant dense<0.000000e+00> : vector<10x64xf32>
    %4 = tpu.matmul %2, %3, %cst {dimension_numbers = #tpu.dot_dimension_numbers<[1], [0], [0], [1], [0, 0, 1, 1], [], []>} : vector<10x32xbf16>, vector<32x64xbf16>, vector<10x64xf32> -> vector<10x64xf32>
    %c0_4 = arith.constant 0 : index
    %c0_5 = arith.constant 0 : index
    %5 = vector.load %arg3[%c0_4, %c0_5] : memref<1x64xf32, #tpu.memory_space<vmem>>, vector<1x64xf32>
    %6 = vector.broadcast %5 : vector<1x64xf32> to vector<10x64xf32>
    %7 = arith.addf %4, %6 : vector<10x64xf32>
    %cst_6 = arith.constant 0.000000e+00 : f32
    %8 = vector.broadcast %cst_6 : f32 to vector<10x64xf32>
    %9 = arith.maximumf %7, %8 : vector<10x64xf32>
    %10 = arith.truncf %9 : vector<10x64xf32> to vector<10x64xbf16>
    %c0_7 = arith.constant 0 : index
    %c0_8 = arith.constant 0 : index
    %11 = vector.load %arg4[%c0_7, %c0_8] : memref<64x32xbf16, #tpu.memory_space<vmem>>, vector<64x32xbf16>
    %cst_9 = arith.constant dense<0.000000e+00> : vector<10x32xf32>
    %12 = tpu.matmul %10, %11, %cst_9 {dimension_numbers = #tpu.dot_dimension_numbers<[1], [0], [0], [1], [0, 0, 1, 1], [], []>} : vector<10x64xbf16>, vector<64x32xbf16>, vector<10x32xf32> -> vector<10x32xf32>
    %c0_10 = arith.constant 0 : index
    %c0_11 = arith.constant 0 : index
    %13 = vector.load %arg5[%c0_10, %c0_11] : memref<1x32xf32, #tpu.memory_space<vmem>>, vector<1x32xf32>
    %14 = vector.broadcast %13 : vector<1x32xf32> to vector<10x32xf32>
    %15 = arith.addf %12, %14 : vector<10x32xf32>
    %16 = arith.addf %1, %15 : vector<10x32xf32>
    %cst_12 = arith.constant dense<0.000000e+00> : vector<10xf32>
    %17 = vector.multi_reduction <add>, %16, %cst_12 [1] : vector<10x32xf32> to vector<10xf32>
    %18 = vector.shape_cast %17 : vector<10xf32> to vector<10x1xf32>
    %cst_13 = arith.constant 3.200000e+01 : f32
    %19 = vector.broadcast %cst_13 : f32 to vector<10x1xf32>
    %20 = arith.divf %18, %19 : vector<10x1xf32>
    %21 = vector.broadcast %20 : vector<10x1xf32> to vector<10x32xf32>
    %22 = arith.subf %16, %21 : vector<10x32xf32>
    %23 = arith.mulf %22, %22 : vector<10x32xf32>
    %cst_14 = arith.constant dense<0.000000e+00> : vector<10xf32>
    %24 = vector.multi_reduction <add>, %23, %cst_14 [1] : vector<10x32xf32> to vector<10xf32>
    %25 = vector.shape_cast %24 : vector<10xf32> to vector<10x1xf32>
    %cst_15 = arith.constant 3.200000e+01 : f32
    %26 = vector.broadcast %cst_15 : f32 to vector<10x1xf32>
    %27 = arith.divf %25, %26 : vector<10x1xf32>
    %28 = vector.broadcast %20 : vector<10x1xf32> to vector<10x32xf32>
    %29 = arith.subf %16, %28 : vector<10x32xf32>
    %cst_16 = arith.constant 9.99999974E-6 : f32
    %30 = vector.broadcast %cst_16 : f32 to vector<10x1xf32>
    %31 = arith.addf %27, %30 : vector<10x1xf32>
    %32 = math.rsqrt %31 : vector<10x1xf32>
    %33 = vector.broadcast %32 : vector<10x1xf32> to vector<10x32xf32>
    %34 = arith.mulf %29, %33 : vector<10x32xf32>
    %c0_17 = arith.constant 0 : index
    %c0_18 = arith.constant 0 : index
    %35 = vector.load %arg6[%c0_17, %c0_18] : memref<1x32xf32, #tpu.memory_space<vmem>>, vector<1x32xf32>
    %36 = vector.broadcast %35 : vector<1x32xf32> to vector<10x32xf32>
    %37 = arith.mulf %34, %36 : vector<10x32xf32>
    %c0_19 = arith.constant 0 : index
    %c0_20 = arith.constant 0 : index
    %38 = vector.load %arg7[%c0_19, %c0_20] : memref<1x32xf32, #tpu.memory_space<vmem>>, vector<1x32xf32>
    %39 = vector.broadcast %38 : vector<1x32xf32> to vector<10x32xf32>
    %40 = arith.addf %37, %39 : vector<10x32xf32>
    %c0_21 = arith.constant 0 : index
    %c0_22 = arith.constant 0 : index
    %c0_23 = arith.constant 0 : index
    %41 = vector.load %arg8[%c0_21, %c0_22, %c0_23] : memref<1x10x32xf32, #tpu.memory_space<vmem>>, vector<1x10x32xf32>
    %42 = vector.shape_cast %41 : vector<1x10x32xf32> to vector<10x32xf32>
    %43 = vector.shape_cast %40 : vector<10x32xf32> to vector<1x10x32xf32>
    tpu.vector_store %arg8[%c0_21, %c0_22, %c0_23], %43 {strides = array<i32>} : memref<1x10x32xf32, #tpu.memory_space<vmem>>, vector<1x10x32xf32>,
    return
  }
  func.func @transform_0(%arg0: i32) -> (i32, i32, i32) {
    %c0_i32 = arith.constant 0 : i32
    %c0_i32_0 = arith.constant 0 : i32
    %c0_i32_1 = arith.constant 0 : i32
    return %arg0, %c0_i32, %c0_i32_0 : i32, i32, i32
  }
  func.func @transform_1(%arg0: i32) -> (i32, i32) {
    %c0_i32 = arith.constant 0 : i32
    %c0_i32_0 = arith.constant 0 : i32
    %c0_i32_1 = arith.constant 0 : i32
    return %c0_i32, %c0_i32_0 : i32, i32
  }
  func.func @transform_2(%arg0: i32) -> (i32, i32) {
    %c0_i32 = arith.constant 0 : i32
    %c0_i32_0 = arith.constant 0 : i32
    %c0_i32_1 = arith.constant 0 : i32
    return %c0_i32, %c0_i32_0 : i32, i32
  }
  func.func @transform_3(%arg0: i32) -> (i32, i32) {
    %c0_i32 = arith.constant 0 : i32
    %c0_i32_0 = arith.constant 0 : i32
    %c0_i32_1 = arith.constant 0 : i32
    return %c0_i32, %c0_i32_0 : i32, i32
  }
  func.func @transform_4(%arg0: i32) -> (i32, i32) {
    %c0_i32 = arith.constant 0 : i32
    %c0_i32_0 = arith.constant 0 : i32
    %c0_i32_1 = arith.constant 0 : i32
    return %c0_i32, %c0_i32_0 : i32, i32
  }
  func.func @transform_5(%arg0: i32) -> (i32, i32) {
    %c0_i32 = arith.constant 0 : i32
    %c0_i32_0 = arith.constant 0 : i32
    %c0_i32_1 = arith.constant 0 : i32
    return %c0_i32, %c0_i32_0 : i32, i32
  }
  func.func @transform_6(%arg0: i32) -> (i32, i32) {
    %c0_i32 = arith.constant 0 : i32
    %c0_i32_0 = arith.constant 0 : i32
    %c0_i32_1 = arith.constant 0 : i32
    return %c0_i32, %c0_i32_0 : i32, i32
  }
  func.func @transform_7(%arg0: i32) -> (i32, i32, i32) {
    %c0_i32 = arith.constant 0 : i32
    %c0_i32_0 = arith.constant 0 : i32
    %c0_i32_1 = arith.constant 0 : i32
    return %arg0, %c0_i32, %c0_i32_0 : i32, i32, i32
  }
}

module attributes {stable_mosaic.version = 11 : i64} {
  func.func @_attn_sublayer_kernel(%arg0: i32, %arg1: memref<1x8x32xf32, #tpu.memory_space<vmem>>, %arg2: memref<4x32x8xbf16, #tpu.memory_space<vmem>>, %arg3: memref<4x1x8xf32, #tpu.memory_space<vmem>>, %arg4: memref<4x32x8xbf16, #tpu.memory_space<vmem>>, %arg5: memref<4x1x8xf32, #tpu.memory_space<vmem>>, %arg6: memref<4x32x8xbf16, #tpu.memory_space<vmem>>, %arg7: memref<4x1x8xf32, #tpu.memory_space<vmem>>, %arg8: memref<4x8x32xbf16, #tpu.memory_space<vmem>>, %arg9: memref<1x32xf32, #tpu.memory_space<vmem>>, %arg10: memref<1x32xf32, #tpu.memory_space<vmem>>, %arg11: memref<1x32xf32, #tpu.memory_space<vmem>>, %arg12: memref<1x8x32xf32, #tpu.memory_space<vmem>>) attributes {dimension_semantics = [#tpu.dimension_semantics<parallel>], iteration_bounds = array<i64: 2>, scalar_prefetch = 0 : i64, scratch_operands = 0 : i64, tpu.core_type = #tpu.core_type<tc>, window_params = [{transform_indices = @transform_0, window_bounds = array<i64: 1, 8, 32>}, {pipeline_mode = #tpu.pipeline_mode<synchronous>, transform_indices = @transform_1, window_bounds = array<i64: 4, 32, 8>}, {pipeline_mode = #tpu.pipeline_mode<synchronous>, transform_indices = @transform_2, window_bounds = array<i64: 4, 1, 8>}, {pipeline_mode = #tpu.pipeline_mode<synchronous>, transform_indices = @transform_3, window_bounds = array<i64: 4, 32, 8>}, {pipeline_mode = #tpu.pipeline_mode<synchronous>, transform_indices = @transform_4, window_bounds = array<i64: 4, 1, 8>}, {pipeline_mode = #tpu.pipeline_mode<synchronous>, transform_indices = @transform_5, window_bounds = array<i64: 4, 32, 8>}, {pipeline_mode = #tpu.pipeline_mode<synchronous>, transform_indices = @transform_6, window_bounds = array<i64: 4, 1, 8>}, {pipeline_mode = #tpu.pipeline_mode<synchronous>, transform_indices = @transform_7, window_bounds = array<i64: 4, 8, 32>}, {pipeline_mode = #tpu.pipeline_mode<synchronous>, transform_indices = @transform_8, window_bounds = array<i64: 1, 32>}, {pipeline_mode = #tpu.pipeline_mode<synchronous>, transform_indices = @transform_9, window_bounds = array<i64: 1, 32>}, {pipeline_mode = #tpu.pipeline_mode<synchronous>, transform_indices = @transform_10, window_bounds = array<i64: 1, 32>}, {transform_indices = @transform_11, window_bounds = array<i64: 1, 8, 32>}]} {
    %c0 = arith.constant 0 : index
    %c0_0 = arith.constant 0 : index
    %c0_1 = arith.constant 0 : index
    %0 = vector.load %arg1[%c0, %c0_0, %c0_1] : memref<1x8x32xf32, #tpu.memory_space<vmem>>, vector<1x8x32xf32>
    %1 = vector.shape_cast %0 : vector<1x8x32xf32> to vector<8x32xf32>
    %2 = arith.truncf %1 : vector<8x32xf32> to vector<8x32xbf16>
    %3 = tpu.iota {dimensions = array<i32: 0>} : vector<8x8xi32>
    %4 = tpu.iota {dimensions = array<i32: 1>} : vector<8x8xi32>
    %5 = arith.cmpi sgt, %4, %3 : vector<8x8xi32>
    %cst = arith.constant -1.000000e+30 : f32
    %cst_2 = arith.constant 0.000000e+00 : f32
    %6 = vector.broadcast %cst : f32 to vector<8x8xf32>
    %7 = vector.broadcast %cst_2 : f32 to vector<8x8xf32>
    %8 = arith.select %5, %6, %7 : vector<8x8xi1>, vector<8x8xf32>
    %cst_3 = arith.constant 0.000000e+00 : f32
    %9 = vector.broadcast %cst_3 : f32 to vector<8x32xf32>
    %c0_4 = arith.constant 0 : index
    %c0_5 = arith.constant 0 : index
    %c0_6 = arith.constant 0 : index
    %10 = vector.load %arg2[%c0_4, %c0_5, %c0_6] : memref<4x32x8xbf16, #tpu.memory_space<vmem>>, vector<1x32x8xbf16>
    %11 = vector.shape_cast %10 : vector<1x32x8xbf16> to vector<32x8xbf16>
    %cst_7 = arith.constant dense<0.000000e+00> : vector<8x8xf32>
    %12 = tpu.matmul %2, %11, %cst_7 {dimension_numbers = #tpu.dot_dimension_numbers<[1], [0], [0], [1], [0, 0, 1, 1], [], []>} : vector<8x32xbf16>, vector<32x8xbf16>, vector<8x8xf32> -> vector<8x8xf32>
    %c0_8 = arith.constant 0 : index
    %c0_9 = arith.constant 0 : index
    %c0_10 = arith.constant 0 : index
    %13 = vector.load %arg3[%c0_8, %c0_9, %c0_10] : memref<4x1x8xf32, #tpu.memory_space<vmem>>, vector<1x1x8xf32>
    %14 = vector.shape_cast %13 : vector<1x1x8xf32> to vector<1x8xf32>
    %15 = vector.broadcast %14 : vector<1x8xf32> to vector<8x8xf32>
    %16 = arith.addf %12, %15 : vector<8x8xf32>
    %c0_11 = arith.constant 0 : index
    %c0_12 = arith.constant 0 : index
    %c0_13 = arith.constant 0 : index
    %17 = vector.load %arg4[%c0_11, %c0_12, %c0_13] : memref<4x32x8xbf16, #tpu.memory_space<vmem>>, vector<1x32x8xbf16>
    %18 = vector.shape_cast %17 : vector<1x32x8xbf16> to vector<32x8xbf16>
    %cst_14 = arith.constant dense<0.000000e+00> : vector<8x8xf32>
    %19 = tpu.matmul %2, %18, %cst_14 {dimension_numbers = #tpu.dot_dimension_numbers<[1], [0], [0], [1], [0, 0, 1, 1], [], []>} : vector<8x32xbf16>, vector<32x8xbf16>, vector<8x8xf32> -> vector<8x8xf32>
    %c0_15 = arith.constant 0 : index
    %c0_16 = arith.constant 0 : index
    %c0_17 = arith.constant 0 : index
    %20 = vector.load %arg5[%c0_15, %c0_16, %c0_17] : memref<4x1x8xf32, #tpu.memory_space<vmem>>, vector<1x1x8xf32>
    %21 = vector.shape_cast %20 : vector<1x1x8xf32> to vector<1x8xf32>
    %22 = vector.broadcast %21 : vector<1x8xf32> to vector<8x8xf32>
    %23 = arith.addf %19, %22 : vector<8x8xf32>
    %c0_18 = arith.constant 0 : index
    %c0_19 = arith.constant 0 : index
    %c0_20 = arith.constant 0 : index
    %24 = vector.load %arg6[%c0_18, %c0_19, %c0_20] : memref<4x32x8xbf16, #tpu.memory_space<vmem>>, vector<1x32x8xbf16>
    %25 = vector.shape_cast %24 : vector<1x32x8xbf16> to vector<32x8xbf16>
    %cst_21 = arith.constant dense<0.000000e+00> : vector<8x8xf32>
    %26 = tpu.matmul %2, %25, %cst_21 {dimension_numbers = #tpu.dot_dimension_numbers<[1], [0], [0], [1], [0, 0, 1, 1], [], []>} : vector<8x32xbf16>, vector<32x8xbf16>, vector<8x8xf32> -> vector<8x8xf32>
    %c0_22 = arith.constant 0 : index
    %c0_23 = arith.constant 0 : index
    %c0_24 = arith.constant 0 : index
    %27 = vector.load %arg7[%c0_22, %c0_23, %c0_24] : memref<4x1x8xf32, #tpu.memory_space<vmem>>, vector<1x1x8xf32>
    %28 = vector.shape_cast %27 : vector<1x1x8xf32> to vector<1x8xf32>
    %29 = vector.broadcast %28 : vector<1x8xf32> to vector<8x8xf32>
    %30 = arith.addf %26, %29 : vector<8x8xf32>
    %31 = arith.truncf %16 : vector<8x8xf32> to vector<8x8xbf16>
    %32 = arith.truncf %23 : vector<8x8xf32> to vector<8x8xbf16>
    %cst_25 = arith.constant dense<0.000000e+00> : vector<8x8xf32>
    %33 = tpu.matmul %31, %32, %cst_25 {dimension_numbers = #tpu.dot_dimension_numbers<[1], [1], [0], [0], [0, 0, 1, 0], [], []>} : vector<8x8xbf16>, vector<8x8xbf16>, vector<8x8xf32> -> vector<8x8xf32>
    %34 = arith.addf %33, %8 : vector<8x8xf32>
    %cst_26 = arith.constant dense<0xFF800000> : vector<8xf32>
    %35 = vector.multi_reduction <maximumf>, %34, %cst_26 [1] : vector<8x8xf32> to vector<8xf32>
    %36 = vector.shape_cast %35 : vector<8xf32> to vector<8x1xf32>
    %37 = vector.broadcast %36 : vector<8x1xf32> to vector<8x8xf32>
    %38 = arith.subf %34, %37 : vector<8x8xf32>
    %39 = math.exp %38 : vector<8x8xf32>
    %cst_27 = arith.constant dense<0.000000e+00> : vector<8xf32>
    %40 = vector.multi_reduction <add>, %39, %cst_27 [1] : vector<8x8xf32> to vector<8xf32>
    %41 = vector.shape_cast %40 : vector<8xf32> to vector<8x1xf32>
    %42 = tpu.reciprocal %41 {approx = true} : vector<8x1xf32> -> vector<8x1xf32>
    %43 = vector.broadcast %42 : vector<8x1xf32> to vector<8x8xf32>
    %44 = arith.mulf %39, %43 : vector<8x8xf32>
    %45 = arith.truncf %44 : vector<8x8xf32> to vector<8x8xbf16>
    %46 = arith.truncf %30 : vector<8x8xf32> to vector<8x8xbf16>
    %cst_28 = arith.constant dense<0.000000e+00> : vector<8x8xf32>
    %47 = tpu.matmul %45, %46, %cst_28 {dimension_numbers = #tpu.dot_dimension_numbers<[1], [0], [0], [1], [0, 0, 1, 1], [], []>} : vector<8x8xbf16>, vector<8x8xbf16>, vector<8x8xf32> -> vector<8x8xf32>
    %48 = arith.truncf %47 : vector<8x8xf32> to vector<8x8xbf16>
    %c0_29 = arith.constant 0 : index
    %c0_30 = arith.constant 0 : index
    %c0_31 = arith.constant 0 : index
    %49 = vector.load %arg8[%c0_29, %c0_30, %c0_31] : memref<4x8x32xbf16, #tpu.memory_space<vmem>>, vector<1x8x32xbf16>
    %50 = vector.shape_cast %49 : vector<1x8x32xbf16> to vector<8x32xbf16>
    %cst_32 = arith.constant dense<0.000000e+00> : vector<8x32xf32>
    %51 = tpu.matmul %48, %50, %cst_32 {dimension_numbers = #tpu.dot_dimension_numbers<[1], [0], [0], [1], [0, 0, 1, 1], [], []>} : vector<8x8xbf16>, vector<8x32xbf16>, vector<8x32xf32> -> vector<8x32xf32>
    %52 = arith.addf %9, %51 : vector<8x32xf32>
    %c1 = arith.constant 1 : index
    %c0_33 = arith.constant 0 : index
    %c0_34 = arith.constant 0 : index
    %53 = vector.load %arg2[%c1, %c0_33, %c0_34] : memref<4x32x8xbf16, #tpu.memory_space<vmem>>, vector<1x32x8xbf16>
    %54 = vector.shape_cast %53 : vector<1x32x8xbf16> to vector<32x8xbf16>
    %cst_35 = arith.constant dense<0.000000e+00> : vector<8x8xf32>
    %55 = tpu.matmul %2, %54, %cst_35 {dimension_numbers = #tpu.dot_dimension_numbers<[1], [0], [0], [1], [0, 0, 1, 1], [], []>} : vector<8x32xbf16>, vector<32x8xbf16>, vector<8x8xf32> -> vector<8x8xf32>
    %c1_36 = arith.constant 1 : index
    %c0_37 = arith.constant 0 : index
    %c0_38 = arith.constant 0 : index
    %56 = vector.load %arg3[%c1_36, %c0_37, %c0_38] : memref<4x1x8xf32, #tpu.memory_space<vmem>>, vector<1x1x8xf32>
    %57 = vector.shape_cast %56 : vector<1x1x8xf32> to vector<1x8xf32>
    %58 = vector.broadcast %57 : vector<1x8xf32> to vector<8x8xf32>
    %59 = arith.addf %55, %58 : vector<8x8xf32>
    %c1_39 = arith.constant 1 : index
    %c0_40 = arith.constant 0 : index
    %c0_41 = arith.constant 0 : index
    %60 = vector.load %arg4[%c1_39, %c0_40, %c0_41] : memref<4x32x8xbf16, #tpu.memory_space<vmem>>, vector<1x32x8xbf16>
    %61 = vector.shape_cast %60 : vector<1x32x8xbf16> to vector<32x8xbf16>
    %cst_42 = arith.constant dense<0.000000e+00> : vector<8x8xf32>
    %62 = tpu.matmul %2, %61, %cst_42 {dimension_numbers = #tpu.dot_dimension_numbers<[1], [0], [0], [1], [0, 0, 1, 1], [], []>} : vector<8x32xbf16>, vector<32x8xbf16>, vector<8x8xf32> -> vector<8x8xf32>
    %c1_43 = arith.constant 1 : index
    %c0_44 = arith.constant 0 : index
    %c0_45 = arith.constant 0 : index
    %63 = vector.load %arg5[%c1_43, %c0_44, %c0_45] : memref<4x1x8xf32, #tpu.memory_space<vmem>>, vector<1x1x8xf32>
    %64 = vector.shape_cast %63 : vector<1x1x8xf32> to vector<1x8xf32>
    %65 = vector.broadcast %64 : vector<1x8xf32> to vector<8x8xf32>
    %66 = arith.addf %62, %65 : vector<8x8xf32>
    %c1_46 = arith.constant 1 : index
    %c0_47 = arith.constant 0 : index
    %c0_48 = arith.constant 0 : index
    %67 = vector.load %arg6[%c1_46, %c0_47, %c0_48] : memref<4x32x8xbf16, #tpu.memory_space<vmem>>, vector<1x32x8xbf16>
    %68 = vector.shape_cast %67 : vector<1x32x8xbf16> to vector<32x8xbf16>
    %cst_49 = arith.constant dense<0.000000e+00> : vector<8x8xf32>
    %69 = tpu.matmul %2, %68, %cst_49 {dimension_numbers = #tpu.dot_dimension_numbers<[1], [0], [0], [1], [0, 0, 1, 1], [], []>} : vector<8x32xbf16>, vector<32x8xbf16>, vector<8x8xf32> -> vector<8x8xf32>
    %c1_50 = arith.constant 1 : index
    %c0_51 = arith.constant 0 : index
    %c0_52 = arith.constant 0 : index
    %70 = vector.load %arg7[%c1_50, %c0_51, %c0_52] : memref<4x1x8xf32, #tpu.memory_space<vmem>>, vector<1x1x8xf32>
    %71 = vector.shape_cast %70 : vector<1x1x8xf32> to vector<1x8xf32>
    %72 = vector.broadcast %71 : vector<1x8xf32> to vector<8x8xf32>
    %73 = arith.addf %69, %72 : vector<8x8xf32>
    %74 = arith.truncf %59 : vector<8x8xf32> to vector<8x8xbf16>
    %75 = arith.truncf %66 : vector<8x8xf32> to vector<8x8xbf16>
    %cst_53 = arith.constant dense<0.000000e+00> : vector<8x8xf32>
    %76 = tpu.matmul %74, %75, %cst_53 {dimension_numbers = #tpu.dot_dimension_numbers<[1], [1], [0], [0], [0, 0, 1, 0], [], []>} : vector<8x8xbf16>, vector<8x8xbf16>, vector<8x8xf32> -> vector<8x8xf32>
    %77 = arith.addf %76, %8 : vector<8x8xf32>
    %cst_54 = arith.constant dense<0xFF800000> : vector<8xf32>
    %78 = vector.multi_reduction <maximumf>, %77, %cst_54 [1] : vector<8x8xf32> to vector<8xf32>
    %79 = vector.shape_cast %78 : vector<8xf32> to vector<8x1xf32>
    %80 = vector.broadcast %79 : vector<8x1xf32> to vector<8x8xf32>
    %81 = arith.subf %77, %80 : vector<8x8xf32>
    %82 = math.exp %81 : vector<8x8xf32>
    %cst_55 = arith.constant dense<0.000000e+00> : vector<8xf32>
    %83 = vector.multi_reduction <add>, %82, %cst_55 [1] : vector<8x8xf32> to vector<8xf32>
    %84 = vector.shape_cast %83 : vector<8xf32> to vector<8x1xf32>
    %85 = tpu.reciprocal %84 {approx = true} : vector<8x1xf32> -> vector<8x1xf32>
    %86 = vector.broadcast %85 : vector<8x1xf32> to vector<8x8xf32>
    %87 = arith.mulf %82, %86 : vector<8x8xf32>
    %88 = arith.truncf %87 : vector<8x8xf32> to vector<8x8xbf16>
    %89 = arith.truncf %73 : vector<8x8xf32> to vector<8x8xbf16>
    %cst_56 = arith.constant dense<0.000000e+00> : vector<8x8xf32>
    %90 = tpu.matmul %88, %89, %cst_56 {dimension_numbers = #tpu.dot_dimension_numbers<[1], [0], [0], [1], [0, 0, 1, 1], [], []>} : vector<8x8xbf16>, vector<8x8xbf16>, vector<8x8xf32> -> vector<8x8xf32>
    %91 = arith.truncf %90 : vector<8x8xf32> to vector<8x8xbf16>
    %c1_57 = arith.constant 1 : index
    %c0_58 = arith.constant 0 : index
    %c0_59 = arith.constant 0 : index
    %92 = vector.load %arg8[%c1_57, %c0_58, %c0_59] : memref<4x8x32xbf16, #tpu.memory_space<vmem>>, vector<1x8x32xbf16>
    %93 = vector.shape_cast %92 : vector<1x8x32xbf16> to vector<8x32xbf16>
    %cst_60 = arith.constant dense<0.000000e+00> : vector<8x32xf32>
    %94 = tpu.matmul %91, %93, %cst_60 {dimension_numbers = #tpu.dot_dimension_numbers<[1], [0], [0], [1], [0, 0, 1, 1], [], []>} : vector<8x8xbf16>, vector<8x32xbf16>, vector<8x32xf32> -> vector<8x32xf32>
    %95 = arith.addf %52, %94 : vector<8x32xf32>
    %c2 = arith.constant 2 : index
    %c0_61 = arith.constant 0 : index
    %c0_62 = arith.constant 0 : index
    %96 = vector.load %arg2[%c2, %c0_61, %c0_62] : memref<4x32x8xbf16, #tpu.memory_space<vmem>>, vector<1x32x8xbf16>
    %97 = vector.shape_cast %96 : vector<1x32x8xbf16> to vector<32x8xbf16>
    %cst_63 = arith.constant dense<0.000000e+00> : vector<8x8xf32>
    %98 = tpu.matmul %2, %97, %cst_63 {dimension_numbers = #tpu.dot_dimension_numbers<[1], [0], [0], [1], [0, 0, 1, 1], [], []>} : vector<8x32xbf16>, vector<32x8xbf16>, vector<8x8xf32> -> vector<8x8xf32>
    %c2_64 = arith.constant 2 : index
    %c0_65 = arith.constant 0 : index
    %c0_66 = arith.constant 0 : index
    %99 = vector.load %arg3[%c2_64, %c0_65, %c0_66] : memref<4x1x8xf32, #tpu.memory_space<vmem>>, vector<1x1x8xf32>
    %100 = vector.shape_cast %99 : vector<1x1x8xf32> to vector<1x8xf32>
    %101 = vector.broadcast %100 : vector<1x8xf32> to vector<8x8xf32>
    %102 = arith.addf %98, %101 : vector<8x8xf32>
    %c2_67 = arith.constant 2 : index
    %c0_68 = arith.constant 0 : index
    %c0_69 = arith.constant 0 : index
    %103 = vector.load %arg4[%c2_67, %c0_68, %c0_69] : memref<4x32x8xbf16, #tpu.memory_space<vmem>>, vector<1x32x8xbf16>
    %104 = vector.shape_cast %103 : vector<1x32x8xbf16> to vector<32x8xbf16>
    %cst_70 = arith.constant dense<0.000000e+00> : vector<8x8xf32>
    %105 = tpu.matmul %2, %104, %cst_70 {dimension_numbers = #tpu.dot_dimension_numbers<[1], [0], [0], [1], [0, 0, 1, 1], [], []>} : vector<8x32xbf16>, vector<32x8xbf16>, vector<8x8xf32> -> vector<8x8xf32>
    %c2_71 = arith.constant 2 : index
    %c0_72 = arith.constant 0 : index
    %c0_73 = arith.constant 0 : index
    %106 = vector.load %arg5[%c2_71, %c0_72, %c0_73] : memref<4x1x8xf32, #tpu.memory_space<vmem>>, vector<1x1x8xf32>
    %107 = vector.shape_cast %106 : vector<1x1x8xf32> to vector<1x8xf32>
    %108 = vector.broadcast %107 : vector<1x8xf32> to vector<8x8xf32>
    %109 = arith.addf %105, %108 : vector<8x8xf32>
    %c2_74 = arith.constant 2 : index
    %c0_75 = arith.constant 0 : index
    %c0_76 = arith.constant 0 : index
    %110 = vector.load %arg6[%c2_74, %c0_75, %c0_76] : memref<4x32x8xbf16, #tpu.memory_space<vmem>>, vector<1x32x8xbf16>
    %111 = vector.shape_cast %110 : vector<1x32x8xbf16> to vector<32x8xbf16>
    %cst_77 = arith.constant dense<0.000000e+00> : vector<8x8xf32>
    %112 = tpu.matmul %2, %111, %cst_77 {dimension_numbers = #tpu.dot_dimension_numbers<[1], [0], [0], [1], [0, 0, 1, 1], [], []>} : vector<8x32xbf16>, vector<32x8xbf16>, vector<8x8xf32> -> vector<8x8xf32>
    %c2_78 = arith.constant 2 : index
    %c0_79 = arith.constant 0 : index
    %c0_80 = arith.constant 0 : index
    %113 = vector.load %arg7[%c2_78, %c0_79, %c0_80] : memref<4x1x8xf32, #tpu.memory_space<vmem>>, vector<1x1x8xf32>
    %114 = vector.shape_cast %113 : vector<1x1x8xf32> to vector<1x8xf32>
    %115 = vector.broadcast %114 : vector<1x8xf32> to vector<8x8xf32>
    %116 = arith.addf %112, %115 : vector<8x8xf32>
    %117 = arith.truncf %102 : vector<8x8xf32> to vector<8x8xbf16>
    %118 = arith.truncf %109 : vector<8x8xf32> to vector<8x8xbf16>
    %cst_81 = arith.constant dense<0.000000e+00> : vector<8x8xf32>
    %119 = tpu.matmul %117, %118, %cst_81 {dimension_numbers = #tpu.dot_dimension_numbers<[1], [1], [0], [0], [0, 0, 1, 0], [], []>} : vector<8x8xbf16>, vector<8x8xbf16>, vector<8x8xf32> -> vector<8x8xf32>
    %120 = arith.addf %119, %8 : vector<8x8xf32>
    %cst_82 = arith.constant dense<0xFF800000> : vector<8xf32>
    %121 = vector.multi_reduction <maximumf>, %120, %cst_82 [1] : vector<8x8xf32> to vector<8xf32>
    %122 = vector.shape_cast %121 : vector<8xf32> to vector<8x1xf32>
    %123 = vector.broadcast %122 : vector<8x1xf32> to vector<8x8xf32>
    %124 = arith.subf %120, %123 : vector<8x8xf32>
    %125 = math.exp %124 : vector<8x8xf32>
    %cst_83 = arith.constant dense<0.000000e+00> : vector<8xf32>
    %126 = vector.multi_reduction <add>, %125, %cst_83 [1] : vector<8x8xf32> to vector<8xf32>
    %127 = vector.shape_cast %126 : vector<8xf32> to vector<8x1xf32>
    %128 = tpu.reciprocal %127 {approx = true} : vector<8x1xf32> -> vector<8x1xf32>
    %129 = vector.broadcast %128 : vector<8x1xf32> to vector<8x8xf32>
    %130 = arith.mulf %125, %129 : vector<8x8xf32>
    %131 = arith.truncf %130 : vector<8x8xf32> to vector<8x8xbf16>
    %132 = arith.truncf %116 : vector<8x8xf32> to vector<8x8xbf16>
    %cst_84 = arith.constant dense<0.000000e+00> : vector<8x8xf32>
    %133 = tpu.matmul %131, %132, %cst_84 {dimension_numbers = #tpu.dot_dimension_numbers<[1], [0], [0], [1], [0, 0, 1, 1], [], []>} : vector<8x8xbf16>, vector<8x8xbf16>, vector<8x8xf32> -> vector<8x8xf32>
    %134 = arith.truncf %133 : vector<8x8xf32> to vector<8x8xbf16>
    %c2_85 = arith.constant 2 : index
    %c0_86 = arith.constant 0 : index
    %c0_87 = arith.constant 0 : index
    %135 = vector.load %arg8[%c2_85, %c0_86, %c0_87] : memref<4x8x32xbf16, #tpu.memory_space<vmem>>, vector<1x8x32xbf16>
    %136 = vector.shape_cast %135 : vector<1x8x32xbf16> to vector<8x32xbf16>
    %cst_88 = arith.constant dense<0.000000e+00> : vector<8x32xf32>
    %137 = tpu.matmul %134, %136, %cst_88 {dimension_numbers = #tpu.dot_dimension_numbers<[1], [0], [0], [1], [0, 0, 1, 1], [], []>} : vector<8x8xbf16>, vector<8x32xbf16>, vector<8x32xf32> -> vector<8x32xf32>
    %138 = arith.addf %95, %137 : vector<8x32xf32>
    %c3 = arith.constant 3 : index
    %c0_89 = arith.constant 0 : index
    %c0_90 = arith.constant 0 : index
    %139 = vector.load %arg2[%c3, %c0_89, %c0_90] : memref<4x32x8xbf16, #tpu.memory_space<vmem>>, vector<1x32x8xbf16>
    %140 = vector.shape_cast %139 : vector<1x32x8xbf16> to vector<32x8xbf16>
    %cst_91 = arith.constant dense<0.000000e+00> : vector<8x8xf32>
    %141 = tpu.matmul %2, %140, %cst_91 {dimension_numbers = #tpu.dot_dimension_numbers<[1], [0], [0], [1], [0, 0, 1, 1], [], []>} : vector<8x32xbf16>, vector<32x8xbf16>, vector<8x8xf32> -> vector<8x8xf32>
    %c3_92 = arith.constant 3 : index
    %c0_93 = arith.constant 0 : index
    %c0_94 = arith.constant 0 : index
    %142 = vector.load %arg3[%c3_92, %c0_93, %c0_94] : memref<4x1x8xf32, #tpu.memory_space<vmem>>, vector<1x1x8xf32>
    %143 = vector.shape_cast %142 : vector<1x1x8xf32> to vector<1x8xf32>
    %144 = vector.broadcast %143 : vector<1x8xf32> to vector<8x8xf32>
    %145 = arith.addf %141, %144 : vector<8x8xf32>
    %c3_95 = arith.constant 3 : index
    %c0_96 = arith.constant 0 : index
    %c0_97 = arith.constant 0 : index
    %146 = vector.load %arg4[%c3_95, %c0_96, %c0_97] : memref<4x32x8xbf16, #tpu.memory_space<vmem>>, vector<1x32x8xbf16>
    %147 = vector.shape_cast %146 : vector<1x32x8xbf16> to vector<32x8xbf16>
    %cst_98 = arith.constant dense<0.000000e+00> : vector<8x8xf32>
    %148 = tpu.matmul %2, %147, %cst_98 {dimension_numbers = #tpu.dot_dimension_numbers<[1], [0], [0], [1], [0, 0, 1, 1], [], []>} : vector<8x32xbf16>, vector<32x8xbf16>, vector<8x8xf32> -> vector<8x8xf32>
    %c3_99 = arith.constant 3 : index
    %c0_100 = arith.constant 0 : index
    %c0_101 = arith.constant 0 : index
    %149 = vector.load %arg5[%c3_99, %c0_100, %c0_101] : memref<4x1x8xf32, #tpu.memory_space<vmem>>, vector<1x1x8xf32>
    %150 = vector.shape_cast %149 : vector<1x1x8xf32> to vector<1x8xf32>
    %151 = vector.broadcast %150 : vector<1x8xf32> to vector<8x8xf32>
    %152 = arith.addf %148, %151 : vector<8x8xf32>
    %c3_102 = arith.constant 3 : index
    %c0_103 = arith.constant 0 : index
    %c0_104 = arith.constant 0 : index
    %153 = vector.load %arg6[%c3_102, %c0_103, %c0_104] : memref<4x32x8xbf16, #tpu.memory_space<vmem>>, vector<1x32x8xbf16>
    %154 = vector.shape_cast %153 : vector<1x32x8xbf16> to vector<32x8xbf16>
    %cst_105 = arith.constant dense<0.000000e+00> : vector<8x8xf32>
    %155 = tpu.matmul %2, %154, %cst_105 {dimension_numbers = #tpu.dot_dimension_numbers<[1], [0], [0], [1], [0, 0, 1, 1], [], []>} : vector<8x32xbf16>, vector<32x8xbf16>, vector<8x8xf32> -> vector<8x8xf32>
    %c3_106 = arith.constant 3 : index
    %c0_107 = arith.constant 0 : index
    %c0_108 = arith.constant 0 : index
    %156 = vector.load %arg7[%c3_106, %c0_107, %c0_108] : memref<4x1x8xf32, #tpu.memory_space<vmem>>, vector<1x1x8xf32>
    %157 = vector.shape_cast %156 : vector<1x1x8xf32> to vector<1x8xf32>
    %158 = vector.broadcast %157 : vector<1x8xf32> to vector<8x8xf32>
    %159 = arith.addf %155, %158 : vector<8x8xf32>
    %160 = arith.truncf %145 : vector<8x8xf32> to vector<8x8xbf16>
    %161 = arith.truncf %152 : vector<8x8xf32> to vector<8x8xbf16>
    %cst_109 = arith.constant dense<0.000000e+00> : vector<8x8xf32>
    %162 = tpu.matmul %160, %161, %cst_109 {dimension_numbers = #tpu.dot_dimension_numbers<[1], [1], [0], [0], [0, 0, 1, 0], [], []>} : vector<8x8xbf16>, vector<8x8xbf16>, vector<8x8xf32> -> vector<8x8xf32>
    %163 = arith.addf %162, %8 : vector<8x8xf32>
    %cst_110 = arith.constant dense<0xFF800000> : vector<8xf32>
    %164 = vector.multi_reduction <maximumf>, %163, %cst_110 [1] : vector<8x8xf32> to vector<8xf32>
    %165 = vector.shape_cast %164 : vector<8xf32> to vector<8x1xf32>
    %166 = vector.broadcast %165 : vector<8x1xf32> to vector<8x8xf32>
    %167 = arith.subf %163, %166 : vector<8x8xf32>
    %168 = math.exp %167 : vector<8x8xf32>
    %cst_111 = arith.constant dense<0.000000e+00> : vector<8xf32>
    %169 = vector.multi_reduction <add>, %168, %cst_111 [1] : vector<8x8xf32> to vector<8xf32>
    %170 = vector.shape_cast %169 : vector<8xf32> to vector<8x1xf32>
    %171 = tpu.reciprocal %170 {approx = true} : vector<8x1xf32> -> vector<8x1xf32>
    %172 = vector.broadcast %171 : vector<8x1xf32> to vector<8x8xf32>
    %173 = arith.mulf %168, %172 : vector<8x8xf32>
    %174 = arith.truncf %173 : vector<8x8xf32> to vector<8x8xbf16>
    %175 = arith.truncf %159 : vector<8x8xf32> to vector<8x8xbf16>
    %cst_112 = arith.constant dense<0.000000e+00> : vector<8x8xf32>
    %176 = tpu.matmul %174, %175, %cst_112 {dimension_numbers = #tpu.dot_dimension_numbers<[1], [0], [0], [1], [0, 0, 1, 1], [], []>} : vector<8x8xbf16>, vector<8x8xbf16>, vector<8x8xf32> -> vector<8x8xf32>
    %177 = arith.truncf %176 : vector<8x8xf32> to vector<8x8xbf16>
    %c3_113 = arith.constant 3 : index
    %c0_114 = arith.constant 0 : index
    %c0_115 = arith.constant 0 : index
    %178 = vector.load %arg8[%c3_113, %c0_114, %c0_115] : memref<4x8x32xbf16, #tpu.memory_space<vmem>>, vector<1x8x32xbf16>
    %179 = vector.shape_cast %178 : vector<1x8x32xbf16> to vector<8x32xbf16>
    %cst_116 = arith.constant dense<0.000000e+00> : vector<8x32xf32>
    %180 = tpu.matmul %177, %179, %cst_116 {dimension_numbers = #tpu.dot_dimension_numbers<[1], [0], [0], [1], [0, 0, 1, 1], [], []>} : vector<8x8xbf16>, vector<8x32xbf16>, vector<8x32xf32> -> vector<8x32xf32>
    %181 = arith.addf %138, %180 : vector<8x32xf32>
    %c0_117 = arith.constant 0 : index
    %c0_118 = arith.constant 0 : index
    %182 = vector.load %arg9[%c0_117, %c0_118] : memref<1x32xf32, #tpu.memory_space<vmem>>, vector<1x32xf32>
    %183 = vector.broadcast %182 : vector<1x32xf32> to vector<8x32xf32>
    %184 = arith.addf %181, %183 : vector<8x32xf32>
    %185 = arith.addf %1, %184 : vector<8x32xf32>
    %cst_119 = arith.constant dense<0.000000e+00> : vector<8xf32>
    %186 = vector.multi_reduction <add>, %185, %cst_119 [1] : vector<8x32xf32> to vector<8xf32>
    %187 = vector.shape_cast %186 : vector<8xf32> to vector<8x1xf32>
    %cst_120 = arith.constant 3.200000e+01 : f32
    %188 = vector.broadcast %cst_120 : f32 to vector<8x1xf32>
    %189 = arith.divf %187, %188 : vector<8x1xf32>
    %190 = vector.broadcast %189 : vector<8x1xf32> to vector<8x32xf32>
    %191 = arith.subf %185, %190 : vector<8x32xf32>
    %192 = arith.mulf %191, %191 : vector<8x32xf32>
    %cst_121 = arith.constant dense<0.000000e+00> : vector<8xf32>
    %193 = vector.multi_reduction <add>, %192, %cst_121 [1] : vector<8x32xf32> to vector<8xf32>
    %194 = vector.shape_cast %193 : vector<8xf32> to vector<8x1xf32>
    %cst_122 = arith.constant 3.200000e+01 : f32
    %195 = vector.broadcast %cst_122 : f32 to vector<8x1xf32>
    %196 = arith.divf %194, %195 : vector<8x1xf32>
    %197 = vector.broadcast %189 : vector<8x1xf32> to vector<8x32xf32>
    %198 = arith.subf %185, %197 : vector<8x32xf32>
    %cst_123 = arith.constant 9.99999974E-6 : f32
    %199 = vector.broadcast %cst_123 : f32 to vector<8x1xf32>
    %200 = arith.addf %196, %199 : vector<8x1xf32>
    %201 = math.rsqrt %200 : vector<8x1xf32>
    %202 = vector.broadcast %201 : vector<8x1xf32> to vector<8x32xf32>
    %203 = arith.mulf %198, %202 : vector<8x32xf32>
    %c0_124 = arith.constant 0 : index
    %c0_125 = arith.constant 0 : index
    %204 = vector.load %arg10[%c0_124, %c0_125] : memref<1x32xf32, #tpu.memory_space<vmem>>, vector<1x32xf32>
    %205 = vector.broadcast %204 : vector<1x32xf32> to vector<8x32xf32>
    %206 = arith.mulf %203, %205 : vector<8x32xf32>
    %c0_126 = arith.constant 0 : index
    %c0_127 = arith.constant 0 : index
    %207 = vector.load %arg11[%c0_126, %c0_127] : memref<1x32xf32, #tpu.memory_space<vmem>>, vector<1x32xf32>
    %208 = vector.broadcast %207 : vector<1x32xf32> to vector<8x32xf32>
    %209 = arith.addf %206, %208 : vector<8x32xf32>
    %c0_128 = arith.constant 0 : index
    %c0_129 = arith.constant 0 : index
    %c0_130 = arith.constant 0 : index
    %210 = vector.load %arg12[%c0_128, %c0_129, %c0_130] : memref<1x8x32xf32, #tpu.memory_space<vmem>>, vector<1x8x32xf32>
    %211 = vector.shape_cast %210 : vector<1x8x32xf32> to vector<8x32xf32>
    %212 = vector.shape_cast %209 : vector<8x32xf32> to vector<1x8x32xf32>
    tpu.vector_store %arg12[%c0_128, %c0_129, %c0_130], %212 {strides = array<i32>} : memref<1x8x32xf32, #tpu.memory_space<vmem>>, vector<1x8x32xf32>,
    return
  }
  func.func @transform_0(%arg0: i32) -> (i32, i32, i32) {
    %c0_i32 = arith.constant 0 : i32
    %c0_i32_0 = arith.constant 0 : i32
    %c0_i32_1 = arith.constant 0 : i32
    return %arg0, %c0_i32, %c0_i32_0 : i32, i32, i32
  }
  func.func @transform_1(%arg0: i32) -> (i32, i32, i32) {
    %c0_i32 = arith.constant 0 : i32
    %c0_i32_0 = arith.constant 0 : i32
    %c0_i32_1 = arith.constant 0 : i32
    %c0_i32_2 = arith.constant 0 : i32
    return %c0_i32, %c0_i32_0, %c0_i32_1 : i32, i32, i32
  }
  func.func @transform_2(%arg0: i32) -> (i32, i32, i32) {
    %c0_i32 = arith.constant 0 : i32
    %c0_i32_0 = arith.constant 0 : i32
    %c0_i32_1 = arith.constant 0 : i32
    %c0_i32_2 = arith.constant 0 : i32
    return %c0_i32, %c0_i32_0, %c0_i32_1 : i32, i32, i32
  }
  func.func @transform_3(%arg0: i32) -> (i32, i32, i32) {
    %c0_i32 = arith.constant 0 : i32
    %c0_i32_0 = arith.constant 0 : i32
    %c0_i32_1 = arith.constant 0 : i32
    %c0_i32_2 = arith.constant 0 : i32
    return %c0_i32, %c0_i32_0, %c0_i32_1 : i32, i32, i32
  }
  func.func @transform_4(%arg0: i32) -> (i32, i32, i32) {
    %c0_i32 = arith.constant 0 : i32
    %c0_i32_0 = arith.constant 0 : i32
    %c0_i32_1 = arith.constant 0 : i32
    %c0_i32_2 = arith.constant 0 : i32
    return %c0_i32, %c0_i32_0, %c0_i32_1 : i32, i32, i32
  }
  func.func @transform_5(%arg0: i32) -> (i32, i32, i32) {
    %c0_i32 = arith.constant 0 : i32
    %c0_i32_0 = arith.constant 0 : i32
    %c0_i32_1 = arith.constant 0 : i32
    %c0_i32_2 = arith.constant 0 : i32
    return %c0_i32, %c0_i32_0, %c0_i32_1 : i32, i32, i32
  }
  func.func @transform_6(%arg0: i32) -> (i32, i32, i32) {
    %c0_i32 = arith.constant 0 : i32
    %c0_i32_0 = arith.constant 0 : i32
    %c0_i32_1 = arith.constant 0 : i32
    %c0_i32_2 = arith.constant 0 : i32
    return %c0_i32, %c0_i32_0, %c0_i32_1 : i32, i32, i32
  }
  func.func @transform_7(%arg0: i32) -> (i32, i32, i32) {
    %c0_i32 = arith.constant 0 : i32
    %c0_i32_0 = arith.constant 0 : i32
    %c0_i32_1 = arith.constant 0 : i32
    %c0_i32_2 = arith.constant 0 : i32
    return %c0_i32, %c0_i32_0, %c0_i32_1 : i32, i32, i32
  }
  func.func @transform_8(%arg0: i32) -> (i32, i32) {
    %c0_i32 = arith.constant 0 : i32
    %c0_i32_0 = arith.constant 0 : i32
    %c0_i32_1 = arith.constant 0 : i32
    return %c0_i32, %c0_i32_0 : i32, i32
  }
  func.func @transform_9(%arg0: i32) -> (i32, i32) {
    %c0_i32 = arith.constant 0 : i32
    %c0_i32_0 = arith.constant 0 : i32
    %c0_i32_1 = arith.constant 0 : i32
    return %c0_i32, %c0_i32_0 : i32, i32
  }
  func.func @transform_10(%arg0: i32) -> (i32, i32) {
    %c0_i32 = arith.constant 0 : i32
    %c0_i32_0 = arith.constant 0 : i32
    %c0_i32_1 = arith.constant 0 : i32
    return %c0_i32, %c0_i32_0 : i32, i32
  }
  func.func @transform_11(%arg0: i32) -> (i32, i32, i32) {
    %c0_i32 = arith.constant 0 : i32
    %c0_i32_0 = arith.constant 0 : i32
    %c0_i32_1 = arith.constant 0 : i32
    return %arg0, %c0_i32, %c0_i32_0 : i32, i32, i32
  }
}

module attributes {stable_mosaic.version = 11 : i64} {
  func.func @_attn_sublayer_kernel(%arg0: i32, %arg1: memref<1x8x32xf32, #tpu.memory_space<vmem>>, %arg2: memref<1x10x32xf32, #tpu.memory_space<vmem>>, %arg3: memref<4x32x8xbf16, #tpu.memory_space<vmem>>, %arg4: memref<4x1x8xf32, #tpu.memory_space<vmem>>, %arg5: memref<4x32x8xbf16, #tpu.memory_space<vmem>>, %arg6: memref<4x1x8xf32, #tpu.memory_space<vmem>>, %arg7: memref<4x32x8xbf16, #tpu.memory_space<vmem>>, %arg8: memref<4x1x8xf32, #tpu.memory_space<vmem>>, %arg9: memref<4x8x32xbf16, #tpu.memory_space<vmem>>, %arg10: memref<1x32xf32, #tpu.memory_space<vmem>>, %arg11: memref<1x32xf32, #tpu.memory_space<vmem>>, %arg12: memref<1x32xf32, #tpu.memory_space<vmem>>, %arg13: memref<1x8x32xf32, #tpu.memory_space<vmem>>) attributes {dimension_semantics = [#tpu.dimension_semantics<parallel>], iteration_bounds = array<i64: 2>, scalar_prefetch = 0 : i64, scratch_operands = 0 : i64, tpu.core_type = #tpu.core_type<tc>, window_params = [{transform_indices = @transform_0, window_bounds = array<i64: 1, 8, 32>}, {transform_indices = @transform_1, window_bounds = array<i64: 1, 10, 32>}, {pipeline_mode = #tpu.pipeline_mode<synchronous>, transform_indices = @transform_2, window_bounds = array<i64: 4, 32, 8>}, {pipeline_mode = #tpu.pipeline_mode<synchronous>, transform_indices = @transform_3, window_bounds = array<i64: 4, 1, 8>}, {pipeline_mode = #tpu.pipeline_mode<synchronous>, transform_indices = @transform_4, window_bounds = array<i64: 4, 32, 8>}, {pipeline_mode = #tpu.pipeline_mode<synchronous>, transform_indices = @transform_5, window_bounds = array<i64: 4, 1, 8>}, {pipeline_mode = #tpu.pipeline_mode<synchronous>, transform_indices = @transform_6, window_bounds = array<i64: 4, 32, 8>}, {pipeline_mode = #tpu.pipeline_mode<synchronous>, transform_indices = @transform_7, window_bounds = array<i64: 4, 1, 8>}, {pipeline_mode = #tpu.pipeline_mode<synchronous>, transform_indices = @transform_8, window_bounds = array<i64: 4, 8, 32>}, {pipeline_mode = #tpu.pipeline_mode<synchronous>, transform_indices = @transform_9, window_bounds = array<i64: 1, 32>}, {pipeline_mode = #tpu.pipeline_mode<synchronous>, transform_indices = @transform_10, window_bounds = array<i64: 1, 32>}, {pipeline_mode = #tpu.pipeline_mode<synchronous>, transform_indices = @transform_11, window_bounds = array<i64: 1, 32>}, {transform_indices = @transform_12, window_bounds = array<i64: 1, 8, 32>}]} {
    %c0 = arith.constant 0 : index
    %c0_0 = arith.constant 0 : index
    %c0_1 = arith.constant 0 : index
    %0 = vector.load %arg1[%c0, %c0_0, %c0_1] : memref<1x8x32xf32, #tpu.memory_space<vmem>>, vector<1x8x32xf32>
    %1 = vector.shape_cast %0 : vector<1x8x32xf32> to vector<8x32xf32>
    %2 = arith.truncf %1 : vector<8x32xf32> to vector<8x32xbf16>
    %c0_2 = arith.constant 0 : index
    %c0_3 = arith.constant 0 : index
    %c0_4 = arith.constant 0 : index
    %3 = vector.load %arg2[%c0_2, %c0_3, %c0_4] : memref<1x10x32xf32, #tpu.memory_space<vmem>>, vector<1x10x32xf32>
    %4 = vector.shape_cast %3 : vector<1x10x32xf32> to vector<10x32xf32>
    %5 = arith.truncf %4 : vector<10x32xf32> to vector<10x32xbf16>
    %cst = arith.constant 0.000000e+00 : f32
    %6 = vector.broadcast %cst : f32 to vector<8x32xf32>
    %c0_5 = arith.constant 0 : index
    %c0_6 = arith.constant 0 : index
    %c0_7 = arith.constant 0 : index
    %7 = vector.load %arg3[%c0_5, %c0_6, %c0_7] : memref<4x32x8xbf16, #tpu.memory_space<vmem>>, vector<1x32x8xbf16>
    %8 = vector.shape_cast %7 : vector<1x32x8xbf16> to vector<32x8xbf16>
    %cst_8 = arith.constant dense<0.000000e+00> : vector<8x8xf32>
    %9 = tpu.matmul %2, %8, %cst_8 {dimension_numbers = #tpu.dot_dimension_numbers<[1], [0], [0], [1], [0, 0, 1, 1], [], []>} : vector<8x32xbf16>, vector<32x8xbf16>, vector<8x8xf32> -> vector<8x8xf32>
    %c0_9 = arith.constant 0 : index
    %c0_10 = arith.constant 0 : index
    %c0_11 = arith.constant 0 : index
    %10 = vector.load %arg4[%c0_9, %c0_10, %c0_11] : memref<4x1x8xf32, #tpu.memory_space<vmem>>, vector<1x1x8xf32>
    %11 = vector.shape_cast %10 : vector<1x1x8xf32> to vector<1x8xf32>
    %12 = vector.broadcast %11 : vector<1x8xf32> to vector<8x8xf32>
    %13 = arith.addf %9, %12 : vector<8x8xf32>
    %c0_12 = arith.constant 0 : index
    %c0_13 = arith.constant 0 : index
    %c0_14 = arith.constant 0 : index
    %14 = vector.load %arg5[%c0_12, %c0_13, %c0_14] : memref<4x32x8xbf16, #tpu.memory_space<vmem>>, vector<1x32x8xbf16>
    %15 = vector.shape_cast %14 : vector<1x32x8xbf16> to vector<32x8xbf16>
    %cst_15 = arith.constant dense<0.000000e+00> : vector<10x8xf32>
    %16 = tpu.matmul %5, %15, %cst_15 {dimension_numbers = #tpu.dot_dimension_numbers<[1], [0], [0], [1], [0, 0, 1, 1], [], []>} : vector<10x32xbf16>, vector<32x8xbf16>, vector<10x8xf32> -> vector<10x8xf32>
    %c0_16 = arith.constant 0 : index
    %c0_17 = arith.constant 0 : index
    %c0_18 = arith.constant 0 : index
    %17 = vector.load %arg6[%c0_16, %c0_17, %c0_18] : memref<4x1x8xf32, #tpu.memory_space<vmem>>, vector<1x1x8xf32>
    %18 = vector.shape_cast %17 : vector<1x1x8xf32> to vector<1x8xf32>
    %19 = vector.broadcast %18 : vector<1x8xf32> to vector<10x8xf32>
    %20 = arith.addf %16, %19 : vector<10x8xf32>
    %c0_19 = arith.constant 0 : index
    %c0_20 = arith.constant 0 : index
    %c0_21 = arith.constant 0 : index
    %21 = vector.load %arg7[%c0_19, %c0_20, %c0_21] : memref<4x32x8xbf16, #tpu.memory_space<vmem>>, vector<1x32x8xbf16>
    %22 = vector.shape_cast %21 : vector<1x32x8xbf16> to vector<32x8xbf16>
    %cst_22 = arith.constant dense<0.000000e+00> : vector<10x8xf32>
    %23 = tpu.matmul %5, %22, %cst_22 {dimension_numbers = #tpu.dot_dimension_numbers<[1], [0], [0], [1], [0, 0, 1, 1], [], []>} : vector<10x32xbf16>, vector<32x8xbf16>, vector<10x8xf32> -> vector<10x8xf32>
    %c0_23 = arith.constant 0 : index
    %c0_24 = arith.constant 0 : index
    %c0_25 = arith.constant 0 : index
    %24 = vector.load %arg8[%c0_23, %c0_24, %c0_25] : memref<4x1x8xf32, #tpu.memory_space<vmem>>, vector<1x1x8xf32>
    %25 = vector.shape_cast %24 : vector<1x1x8xf32> to vector<1x8xf32>
    %26 = vector.broadcast %25 : vector<1x8xf32> to vector<10x8xf32>
    %27 = arith.addf %23, %26 : vector<10x8xf32>
    %28 = arith.truncf %13 : vector<8x8xf32> to vector<8x8xbf16>
    %29 = arith.truncf %20 : vector<10x8xf32> to vector<10x8xbf16>
    %cst_26 = arith.constant dense<0.000000e+00> : vector<8x10xf32>
    %30 = tpu.matmul %28, %29, %cst_26 {dimension_numbers = #tpu.dot_dimension_numbers<[1], [1], [0], [0], [0, 0, 1, 0], [], []>} : vector<8x8xbf16>, vector<10x8xbf16>, vector<8x10xf32> -> vector<8x10xf32>
    %cst_27 = arith.constant dense<0xFF800000> : vector<8xf32>
    %31 = vector.multi_reduction <maximumf>, %30, %cst_27 [1] : vector<8x10xf32> to vector<8xf32>
    %32 = vector.shape_cast %31 : vector<8xf32> to vector<8x1xf32>
    %33 = vector.broadcast %32 : vector<8x1xf32> to vector<8x10xf32>
    %34 = arith.subf %30, %33 : vector<8x10xf32>
    %35 = math.exp %34 : vector<8x10xf32>
    %cst_28 = arith.constant dense<0.000000e+00> : vector<8xf32>
    %36 = vector.multi_reduction <add>, %35, %cst_28 [1] : vector<8x10xf32> to vector<8xf32>
    %37 = vector.shape_cast %36 : vector<8xf32> to vector<8x1xf32>
    %38 = tpu.reciprocal %37 {approx = true} : vector<8x1xf32> -> vector<8x1xf32>
    %39 = vector.broadcast %38 : vector<8x1xf32> to vector<8x10xf32>
    %40 = arith.mulf %35, %39 : vector<8x10xf32>
    %41 = arith.truncf %40 : vector<8x10xf32> to vector<8x10xbf16>
    %42 = arith.truncf %27 : vector<10x8xf32> to vector<10x8xbf16>
    %cst_29 = arith.constant dense<0.000000e+00> : vector<8x8xf32>
    %43 = tpu.matmul %41, %42, %cst_29 {dimension_numbers = #tpu.dot_dimension_numbers<[1], [0], [0], [1], [0, 0, 1, 1], [], []>} : vector<8x10xbf16>, vector<10x8xbf16>, vector<8x8xf32> -> vector<8x8xf32>
    %44 = arith.truncf %43 : vector<8x8xf32> to vector<8x8xbf16>
    %c0_30 = arith.constant 0 : index
    %c0_31 = arith.constant 0 : index
    %c0_32 = arith.constant 0 : index
    %45 = vector.load %arg9[%c0_30, %c0_31, %c0_32] : memref<4x8x32xbf16, #tpu.memory_space<vmem>>, vector<1x8x32xbf16>
    %46 = vector.shape_cast %45 : vector<1x8x32xbf16> to vector<8x32xbf16>
    %cst_33 = arith.constant dense<0.000000e+00> : vector<8x32xf32>
    %47 = tpu.matmul %44, %46, %cst_33 {dimension_numbers = #tpu.dot_dimension_numbers<[1], [0], [0], [1], [0, 0, 1, 1], [], []>} : vector<8x8xbf16>, vector<8x32xbf16>, vector<8x32xf32> -> vector<8x32xf32>
    %48 = arith.addf %6, %47 : vector<8x32xf32>
    %c1 = arith.constant 1 : index
    %c0_34 = arith.constant 0 : index
    %c0_35 = arith.constant 0 : index
    %49 = vector.load %arg3[%c1, %c0_34, %c0_35] : memref<4x32x8xbf16, #tpu.memory_space<vmem>>, vector<1x32x8xbf16>
    %50 = vector.shape_cast %49 : vector<1x32x8xbf16> to vector<32x8xbf16>
    %cst_36 = arith.constant dense<0.000000e+00> : vector<8x8xf32>
    %51 = tpu.matmul %2, %50, %cst_36 {dimension_numbers = #tpu.dot_dimension_numbers<[1], [0], [0], [1], [0, 0, 1, 1], [], []>} : vector<8x32xbf16>, vector<32x8xbf16>, vector<8x8xf32> -> vector<8x8xf32>
    %c1_37 = arith.constant 1 : index
    %c0_38 = arith.constant 0 : index
    %c0_39 = arith.constant 0 : index
    %52 = vector.load %arg4[%c1_37, %c0_38, %c0_39] : memref<4x1x8xf32, #tpu.memory_space<vmem>>, vector<1x1x8xf32>
    %53 = vector.shape_cast %52 : vector<1x1x8xf32> to vector<1x8xf32>
    %54 = vector.broadcast %53 : vector<1x8xf32> to vector<8x8xf32>
    %55 = arith.addf %51, %54 : vector<8x8xf32>
    %c1_40 = arith.constant 1 : index
    %c0_41 = arith.constant 0 : index
    %c0_42 = arith.constant 0 : index
    %56 = vector.load %arg5[%c1_40, %c0_41, %c0_42] : memref<4x32x8xbf16, #tpu.memory_space<vmem>>, vector<1x32x8xbf16>
    %57 = vector.shape_cast %56 : vector<1x32x8xbf16> to vector<32x8xbf16>
    %cst_43 = arith.constant dense<0.000000e+00> : vector<10x8xf32>
    %58 = tpu.matmul %5, %57, %cst_43 {dimension_numbers = #tpu.dot_dimension_numbers<[1], [0], [0], [1], [0, 0, 1, 1], [], []>} : vector<10x32xbf16>, vector<32x8xbf16>, vector<10x8xf32> -> vector<10x8xf32>
    %c1_44 = arith.constant 1 : index
    %c0_45 = arith.constant 0 : index
    %c0_46 = arith.constant 0 : index
    %59 = vector.load %arg6[%c1_44, %c0_45, %c0_46] : memref<4x1x8xf32, #tpu.memory_space<vmem>>, vector<1x1x8xf32>
    %60 = vector.shape_cast %59 : vector<1x1x8xf32> to vector<1x8xf32>
    %61 = vector.broadcast %60 : vector<1x8xf32> to vector<10x8xf32>
    %62 = arith.addf %58, %61 : vector<10x8xf32>
    %c1_47 = arith.constant 1 : index
    %c0_48 = arith.constant 0 : index
    %c0_49 = arith.constant 0 : index
    %63 = vector.load %arg7[%c1_47, %c0_48, %c0_49] : memref<4x32x8xbf16, #tpu.memory_space<vmem>>, vector<1x32x8xbf16>
    %64 = vector.shape_cast %63 : vector<1x32x8xbf16> to vector<32x8xbf16>
    %cst_50 = arith.constant dense<0.000000e+00> : vector<10x8xf32>
    %65 = tpu.matmul %5, %64, %cst_50 {dimension_numbers = #tpu.dot_dimension_numbers<[1], [0], [0], [1], [0, 0, 1, 1], [], []>} : vector<10x32xbf16>, vector<32x8xbf16>, vector<10x8xf32> -> vector<10x8xf32>
    %c1_51 = arith.constant 1 : index
    %c0_52 = arith.constant 0 : index
    %c0_53 = arith.constant 0 : index
    %66 = vector.load %arg8[%c1_51, %c0_52, %c0_53] : memref<4x1x8xf32, #tpu.memory_space<vmem>>, vector<1x1x8xf32>
    %67 = vector.shape_cast %66 : vector<1x1x8xf32> to vector<1x8xf32>
    %68 = vector.broadcast %67 : vector<1x8xf32> to vector<10x8xf32>
    %69 = arith.addf %65, %68 : vector<10x8xf32>
    %70 = arith.truncf %55 : vector<8x8xf32> to vector<8x8xbf16>
    %71 = arith.truncf %62 : vector<10x8xf32> to vector<10x8xbf16>
    %cst_54 = arith.constant dense<0.000000e+00> : vector<8x10xf32>
    %72 = tpu.matmul %70, %71, %cst_54 {dimension_numbers = #tpu.dot_dimension_numbers<[1], [1], [0], [0], [0, 0, 1, 0], [], []>} : vector<8x8xbf16>, vector<10x8xbf16>, vector<8x10xf32> -> vector<8x10xf32>
    %cst_55 = arith.constant dense<0xFF800000> : vector<8xf32>
    %73 = vector.multi_reduction <maximumf>, %72, %cst_55 [1] : vector<8x10xf32> to vector<8xf32>
    %74 = vector.shape_cast %73 : vector<8xf32> to vector<8x1xf32>
    %75 = vector.broadcast %74 : vector<8x1xf32> to vector<8x10xf32>
    %76 = arith.subf %72, %75 : vector<8x10xf32>
    %77 = math.exp %76 : vector<8x10xf32>
    %cst_56 = arith.constant dense<0.000000e+00> : vector<8xf32>
    %78 = vector.multi_reduction <add>, %77, %cst_56 [1] : vector<8x10xf32> to vector<8xf32>
    %79 = vector.shape_cast %78 : vector<8xf32> to vector<8x1xf32>
    %80 = tpu.reciprocal %79 {approx = true} : vector<8x1xf32> -> vector<8x1xf32>
    %81 = vector.broadcast %80 : vector<8x1xf32> to vector<8x10xf32>
    %82 = arith.mulf %77, %81 : vector<8x10xf32>
    %83 = arith.truncf %82 : vector<8x10xf32> to vector<8x10xbf16>
    %84 = arith.truncf %69 : vector<10x8xf32> to vector<10x8xbf16>
    %cst_57 = arith.constant dense<0.000000e+00> : vector<8x8xf32>
    %85 = tpu.matmul %83, %84, %cst_57 {dimension_numbers = #tpu.dot_dimension_numbers<[1], [0], [0], [1], [0, 0, 1, 1], [], []>} : vector<8x10xbf16>, vector<10x8xbf16>, vector<8x8xf32> -> vector<8x8xf32>
    %86 = arith.truncf %85 : vector<8x8xf32> to vector<8x8xbf16>
    %c1_58 = arith.constant 1 : index
    %c0_59 = arith.constant 0 : index
    %c0_60 = arith.constant 0 : index
    %87 = vector.load %arg9[%c1_58, %c0_59, %c0_60] : memref<4x8x32xbf16, #tpu.memory_space<vmem>>, vector<1x8x32xbf16>
    %88 = vector.shape_cast %87 : vector<1x8x32xbf16> to vector<8x32xbf16>
    %cst_61 = arith.constant dense<0.000000e+00> : vector<8x32xf32>
    %89 = tpu.matmul %86, %88, %cst_61 {dimension_numbers = #tpu.dot_dimension_numbers<[1], [0], [0], [1], [0, 0, 1, 1], [], []>} : vector<8x8xbf16>, vector<8x32xbf16>, vector<8x32xf32> -> vector<8x32xf32>
    %90 = arith.addf %48, %89 : vector<8x32xf32>
    %c2 = arith.constant 2 : index
    %c0_62 = arith.constant 0 : index
    %c0_63 = arith.constant 0 : index
    %91 = vector.load %arg3[%c2, %c0_62, %c0_63] : memref<4x32x8xbf16, #tpu.memory_space<vmem>>, vector<1x32x8xbf16>
    %92 = vector.shape_cast %91 : vector<1x32x8xbf16> to vector<32x8xbf16>
    %cst_64 = arith.constant dense<0.000000e+00> : vector<8x8xf32>
    %93 = tpu.matmul %2, %92, %cst_64 {dimension_numbers = #tpu.dot_dimension_numbers<[1], [0], [0], [1], [0, 0, 1, 1], [], []>} : vector<8x32xbf16>, vector<32x8xbf16>, vector<8x8xf32> -> vector<8x8xf32>
    %c2_65 = arith.constant 2 : index
    %c0_66 = arith.constant 0 : index
    %c0_67 = arith.constant 0 : index
    %94 = vector.load %arg4[%c2_65, %c0_66, %c0_67] : memref<4x1x8xf32, #tpu.memory_space<vmem>>, vector<1x1x8xf32>
    %95 = vector.shape_cast %94 : vector<1x1x8xf32> to vector<1x8xf32>
    %96 = vector.broadcast %95 : vector<1x8xf32> to vector<8x8xf32>
    %97 = arith.addf %93, %96 : vector<8x8xf32>
    %c2_68 = arith.constant 2 : index
    %c0_69 = arith.constant 0 : index
    %c0_70 = arith.constant 0 : index
    %98 = vector.load %arg5[%c2_68, %c0_69, %c0_70] : memref<4x32x8xbf16, #tpu.memory_space<vmem>>, vector<1x32x8xbf16>
    %99 = vector.shape_cast %98 : vector<1x32x8xbf16> to vector<32x8xbf16>
    %cst_71 = arith.constant dense<0.000000e+00> : vector<10x8xf32>
    %100 = tpu.matmul %5, %99, %cst_71 {dimension_numbers = #tpu.dot_dimension_numbers<[1], [0], [0], [1], [0, 0, 1, 1], [], []>} : vector<10x32xbf16>, vector<32x8xbf16>, vector<10x8xf32> -> vector<10x8xf32>
    %c2_72 = arith.constant 2 : index
    %c0_73 = arith.constant 0 : index
    %c0_74 = arith.constant 0 : index
    %101 = vector.load %arg6[%c2_72, %c0_73, %c0_74] : memref<4x1x8xf32, #tpu.memory_space<vmem>>, vector<1x1x8xf32>
    %102 = vector.shape_cast %101 : vector<1x1x8xf32> to vector<1x8xf32>
    %103 = vector.broadcast %102 : vector<1x8xf32> to vector<10x8xf32>
    %104 = arith.addf %100, %103 : vector<10x8xf32>
    %c2_75 = arith.constant 2 : index
    %c0_76 = arith.constant 0 : index
    %c0_77 = arith.constant 0 : index
    %105 = vector.load %arg7[%c2_75, %c0_76, %c0_77] : memref<4x32x8xbf16, #tpu.memory_space<vmem>>, vector<1x32x8xbf16>
    %106 = vector.shape_cast %105 : vector<1x32x8xbf16> to vector<32x8xbf16>
    %cst_78 = arith.constant dense<0.000000e+00> : vector<10x8xf32>
    %107 = tpu.matmul %5, %106, %cst_78 {dimension_numbers = #tpu.dot_dimension_numbers<[1], [0], [0], [1], [0, 0, 1, 1], [], []>} : vector<10x32xbf16>, vector<32x8xbf16>, vector<10x8xf32> -> vector<10x8xf32>
    %c2_79 = arith.constant 2 : index
    %c0_80 = arith.constant 0 : index
    %c0_81 = arith.constant 0 : index
    %108 = vector.load %arg8[%c2_79, %c0_80, %c0_81] : memref<4x1x8xf32, #tpu.memory_space<vmem>>, vector<1x1x8xf32>
    %109 = vector.shape_cast %108 : vector<1x1x8xf32> to vector<1x8xf32>
    %110 = vector.broadcast %109 : vector<1x8xf32> to vector<10x8xf32>
    %111 = arith.addf %107, %110 : vector<10x8xf32>
    %112 = arith.truncf %97 : vector<8x8xf32> to vector<8x8xbf16>
    %113 = arith.truncf %104 : vector<10x8xf32> to vector<10x8xbf16>
    %cst_82 = arith.constant dense<0.000000e+00> : vector<8x10xf32>
    %114 = tpu.matmul %112, %113, %cst_82 {dimension_numbers = #tpu.dot_dimension_numbers<[1], [1], [0], [0], [0, 0, 1, 0], [], []>} : vector<8x8xbf16>, vector<10x8xbf16>, vector<8x10xf32> -> vector<8x10xf32>
    %cst_83 = arith.constant dense<0xFF800000> : vector<8xf32>
    %115 = vector.multi_reduction <maximumf>, %114, %cst_83 [1] : vector<8x10xf32> to vector<8xf32>
    %116 = vector.shape_cast %115 : vector<8xf32> to vector<8x1xf32>
    %117 = vector.broadcast %116 : vector<8x1xf32> to vector<8x10xf32>
    %118 = arith.subf %114, %117 : vector<8x10xf32>
    %119 = math.exp %118 : vector<8x10xf32>
    %cst_84 = arith.constant dense<0.000000e+00> : vector<8xf32>
    %120 = vector.multi_reduction <add>, %119, %cst_84 [1] : vector<8x10xf32> to vector<8xf32>
    %121 = vector.shape_cast %120 : vector<8xf32> to vector<8x1xf32>
    %122 = tpu.reciprocal %121 {approx = true} : vector<8x1xf32> -> vector<8x1xf32>
    %123 = vector.broadcast %122 : vector<8x1xf32> to vector<8x10xf32>
    %124 = arith.mulf %119, %123 : vector<8x10xf32>
    %125 = arith.truncf %124 : vector<8x10xf32> to vector<8x10xbf16>
    %126 = arith.truncf %111 : vector<10x8xf32> to vector<10x8xbf16>
    %cst_85 = arith.constant dense<0.000000e+00> : vector<8x8xf32>
    %127 = tpu.matmul %125, %126, %cst_85 {dimension_numbers = #tpu.dot_dimension_numbers<[1], [0], [0], [1], [0, 0, 1, 1], [], []>} : vector<8x10xbf16>, vector<10x8xbf16>, vector<8x8xf32> -> vector<8x8xf32>
    %128 = arith.truncf %127 : vector<8x8xf32> to vector<8x8xbf16>
    %c2_86 = arith.constant 2 : index
    %c0_87 = arith.constant 0 : index
    %c0_88 = arith.constant 0 : index
    %129 = vector.load %arg9[%c2_86, %c0_87, %c0_88] : memref<4x8x32xbf16, #tpu.memory_space<vmem>>, vector<1x8x32xbf16>
    %130 = vector.shape_cast %129 : vector<1x8x32xbf16> to vector<8x32xbf16>
    %cst_89 = arith.constant dense<0.000000e+00> : vector<8x32xf32>
    %131 = tpu.matmul %128, %130, %cst_89 {dimension_numbers = #tpu.dot_dimension_numbers<[1], [0], [0], [1], [0, 0, 1, 1], [], []>} : vector<8x8xbf16>, vector<8x32xbf16>, vector<8x32xf32> -> vector<8x32xf32>
    %132 = arith.addf %90, %131 : vector<8x32xf32>
    %c3 = arith.constant 3 : index
    %c0_90 = arith.constant 0 : index
    %c0_91 = arith.constant 0 : index
    %133 = vector.load %arg3[%c3, %c0_90, %c0_91] : memref<4x32x8xbf16, #tpu.memory_space<vmem>>, vector<1x32x8xbf16>
    %134 = vector.shape_cast %133 : vector<1x32x8xbf16> to vector<32x8xbf16>
    %cst_92 = arith.constant dense<0.000000e+00> : vector<8x8xf32>
    %135 = tpu.matmul %2, %134, %cst_92 {dimension_numbers = #tpu.dot_dimension_numbers<[1], [0], [0], [1], [0, 0, 1, 1], [], []>} : vector<8x32xbf16>, vector<32x8xbf16>, vector<8x8xf32> -> vector<8x8xf32>
    %c3_93 = arith.constant 3 : index
    %c0_94 = arith.constant 0 : index
    %c0_95 = arith.constant 0 : index
    %136 = vector.load %arg4[%c3_93, %c0_94, %c0_95] : memref<4x1x8xf32, #tpu.memory_space<vmem>>, vector<1x1x8xf32>
    %137 = vector.shape_cast %136 : vector<1x1x8xf32> to vector<1x8xf32>
    %138 = vector.broadcast %137 : vector<1x8xf32> to vector<8x8xf32>
    %139 = arith.addf %135, %138 : vector<8x8xf32>
    %c3_96 = arith.constant 3 : index
    %c0_97 = arith.constant 0 : index
    %c0_98 = arith.constant 0 : index
    %140 = vector.load %arg5[%c3_96, %c0_97, %c0_98] : memref<4x32x8xbf16, #tpu.memory_space<vmem>>, vector<1x32x8xbf16>
    %141 = vector.shape_cast %140 : vector<1x32x8xbf16> to vector<32x8xbf16>
    %cst_99 = arith.constant dense<0.000000e+00> : vector<10x8xf32>
    %142 = tpu.matmul %5, %141, %cst_99 {dimension_numbers = #tpu.dot_dimension_numbers<[1], [0], [0], [1], [0, 0, 1, 1], [], []>} : vector<10x32xbf16>, vector<32x8xbf16>, vector<10x8xf32> -> vector<10x8xf32>
    %c3_100 = arith.constant 3 : index
    %c0_101 = arith.constant 0 : index
    %c0_102 = arith.constant 0 : index
    %143 = vector.load %arg6[%c3_100, %c0_101, %c0_102] : memref<4x1x8xf32, #tpu.memory_space<vmem>>, vector<1x1x8xf32>
    %144 = vector.shape_cast %143 : vector<1x1x8xf32> to vector<1x8xf32>
    %145 = vector.broadcast %144 : vector<1x8xf32> to vector<10x8xf32>
    %146 = arith.addf %142, %145 : vector<10x8xf32>
    %c3_103 = arith.constant 3 : index
    %c0_104 = arith.constant 0 : index
    %c0_105 = arith.constant 0 : index
    %147 = vector.load %arg7[%c3_103, %c0_104, %c0_105] : memref<4x32x8xbf16, #tpu.memory_space<vmem>>, vector<1x32x8xbf16>
    %148 = vector.shape_cast %147 : vector<1x32x8xbf16> to vector<32x8xbf16>
    %cst_106 = arith.constant dense<0.000000e+00> : vector<10x8xf32>
    %149 = tpu.matmul %5, %148, %cst_106 {dimension_numbers = #tpu.dot_dimension_numbers<[1], [0], [0], [1], [0, 0, 1, 1], [], []>} : vector<10x32xbf16>, vector<32x8xbf16>, vector<10x8xf32> -> vector<10x8xf32>
    %c3_107 = arith.constant 3 : index
    %c0_108 = arith.constant 0 : index
    %c0_109 = arith.constant 0 : index
    %150 = vector.load %arg8[%c3_107, %c0_108, %c0_109] : memref<4x1x8xf32, #tpu.memory_space<vmem>>, vector<1x1x8xf32>
    %151 = vector.shape_cast %150 : vector<1x1x8xf32> to vector<1x8xf32>
    %152 = vector.broadcast %151 : vector<1x8xf32> to vector<10x8xf32>
    %153 = arith.addf %149, %152 : vector<10x8xf32>
    %154 = arith.truncf %139 : vector<8x8xf32> to vector<8x8xbf16>
    %155 = arith.truncf %146 : vector<10x8xf32> to vector<10x8xbf16>
    %cst_110 = arith.constant dense<0.000000e+00> : vector<8x10xf32>
    %156 = tpu.matmul %154, %155, %cst_110 {dimension_numbers = #tpu.dot_dimension_numbers<[1], [1], [0], [0], [0, 0, 1, 0], [], []>} : vector<8x8xbf16>, vector<10x8xbf16>, vector<8x10xf32> -> vector<8x10xf32>
    %cst_111 = arith.constant dense<0xFF800000> : vector<8xf32>
    %157 = vector.multi_reduction <maximumf>, %156, %cst_111 [1] : vector<8x10xf32> to vector<8xf32>
    %158 = vector.shape_cast %157 : vector<8xf32> to vector<8x1xf32>
    %159 = vector.broadcast %158 : vector<8x1xf32> to vector<8x10xf32>
    %160 = arith.subf %156, %159 : vector<8x10xf32>
    %161 = math.exp %160 : vector<8x10xf32>
    %cst_112 = arith.constant dense<0.000000e+00> : vector<8xf32>
    %162 = vector.multi_reduction <add>, %161, %cst_112 [1] : vector<8x10xf32> to vector<8xf32>
    %163 = vector.shape_cast %162 : vector<8xf32> to vector<8x1xf32>
    %164 = tpu.reciprocal %163 {approx = true} : vector<8x1xf32> -> vector<8x1xf32>
    %165 = vector.broadcast %164 : vector<8x1xf32> to vector<8x10xf32>
    %166 = arith.mulf %161, %165 : vector<8x10xf32>
    %167 = arith.truncf %166 : vector<8x10xf32> to vector<8x10xbf16>
    %168 = arith.truncf %153 : vector<10x8xf32> to vector<10x8xbf16>
    %cst_113 = arith.constant dense<0.000000e+00> : vector<8x8xf32>
    %169 = tpu.matmul %167, %168, %cst_113 {dimension_numbers = #tpu.dot_dimension_numbers<[1], [0], [0], [1], [0, 0, 1, 1], [], []>} : vector<8x10xbf16>, vector<10x8xbf16>, vector<8x8xf32> -> vector<8x8xf32>
    %170 = arith.truncf %169 : vector<8x8xf32> to vector<8x8xbf16>
    %c3_114 = arith.constant 3 : index
    %c0_115 = arith.constant 0 : index
    %c0_116 = arith.constant 0 : index
    %171 = vector.load %arg9[%c3_114, %c0_115, %c0_116] : memref<4x8x32xbf16, #tpu.memory_space<vmem>>, vector<1x8x32xbf16>
    %172 = vector.shape_cast %171 : vector<1x8x32xbf16> to vector<8x32xbf16>
    %cst_117 = arith.constant dense<0.000000e+00> : vector<8x32xf32>
    %173 = tpu.matmul %170, %172, %cst_117 {dimension_numbers = #tpu.dot_dimension_numbers<[1], [0], [0], [1], [0, 0, 1, 1], [], []>} : vector<8x8xbf16>, vector<8x32xbf16>, vector<8x32xf32> -> vector<8x32xf32>
    %174 = arith.addf %132, %173 : vector<8x32xf32>
    %c0_118 = arith.constant 0 : index
    %c0_119 = arith.constant 0 : index
    %175 = vector.load %arg10[%c0_118, %c0_119] : memref<1x32xf32, #tpu.memory_space<vmem>>, vector<1x32xf32>
    %176 = vector.broadcast %175 : vector<1x32xf32> to vector<8x32xf32>
    %177 = arith.addf %174, %176 : vector<8x32xf32>
    %178 = arith.addf %1, %177 : vector<8x32xf32>
    %cst_120 = arith.constant dense<0.000000e+00> : vector<8xf32>
    %179 = vector.multi_reduction <add>, %178, %cst_120 [1] : vector<8x32xf32> to vector<8xf32>
    %180 = vector.shape_cast %179 : vector<8xf32> to vector<8x1xf32>
    %cst_121 = arith.constant 3.200000e+01 : f32
    %181 = vector.broadcast %cst_121 : f32 to vector<8x1xf32>
    %182 = arith.divf %180, %181 : vector<8x1xf32>
    %183 = vector.broadcast %182 : vector<8x1xf32> to vector<8x32xf32>
    %184 = arith.subf %178, %183 : vector<8x32xf32>
    %185 = arith.mulf %184, %184 : vector<8x32xf32>
    %cst_122 = arith.constant dense<0.000000e+00> : vector<8xf32>
    %186 = vector.multi_reduction <add>, %185, %cst_122 [1] : vector<8x32xf32> to vector<8xf32>
    %187 = vector.shape_cast %186 : vector<8xf32> to vector<8x1xf32>
    %cst_123 = arith.constant 3.200000e+01 : f32
    %188 = vector.broadcast %cst_123 : f32 to vector<8x1xf32>
    %189 = arith.divf %187, %188 : vector<8x1xf32>
    %190 = vector.broadcast %182 : vector<8x1xf32> to vector<8x32xf32>
    %191 = arith.subf %178, %190 : vector<8x32xf32>
    %cst_124 = arith.constant 9.99999974E-6 : f32
    %192 = vector.broadcast %cst_124 : f32 to vector<8x1xf32>
    %193 = arith.addf %189, %192 : vector<8x1xf32>
    %194 = math.rsqrt %193 : vector<8x1xf32>
    %195 = vector.broadcast %194 : vector<8x1xf32> to vector<8x32xf32>
    %196 = arith.mulf %191, %195 : vector<8x32xf32>
    %c0_125 = arith.constant 0 : index
    %c0_126 = arith.constant 0 : index
    %197 = vector.load %arg11[%c0_125, %c0_126] : memref<1x32xf32, #tpu.memory_space<vmem>>, vector<1x32xf32>
    %198 = vector.broadcast %197 : vector<1x32xf32> to vector<8x32xf32>
    %199 = arith.mulf %196, %198 : vector<8x32xf32>
    %c0_127 = arith.constant 0 : index
    %c0_128 = arith.constant 0 : index
    %200 = vector.load %arg12[%c0_127, %c0_128] : memref<1x32xf32, #tpu.memory_space<vmem>>, vector<1x32xf32>
    %201 = vector.broadcast %200 : vector<1x32xf32> to vector<8x32xf32>
    %202 = arith.addf %199, %201 : vector<8x32xf32>
    %c0_129 = arith.constant 0 : index
    %c0_130 = arith.constant 0 : index
    %c0_131 = arith.constant 0 : index
    %203 = vector.load %arg13[%c0_129, %c0_130, %c0_131] : memref<1x8x32xf32, #tpu.memory_space<vmem>>, vector<1x8x32xf32>
    %204 = vector.shape_cast %203 : vector<1x8x32xf32> to vector<8x32xf32>
    %205 = vector.shape_cast %202 : vector<8x32xf32> to vector<1x8x32xf32>
    tpu.vector_store %arg13[%c0_129, %c0_130, %c0_131], %205 {strides = array<i32>} : memref<1x8x32xf32, #tpu.memory_space<vmem>>, vector<1x8x32xf32>,
    return
  }
  func.func @transform_0(%arg0: i32) -> (i32, i32, i32) {
    %c0_i32 = arith.constant 0 : i32
    %c0_i32_0 = arith.constant 0 : i32
    %c0_i32_1 = arith.constant 0 : i32
    return %arg0, %c0_i32, %c0_i32_0 : i32, i32, i32
  }
  func.func @transform_1(%arg0: i32) -> (i32, i32, i32) {
    %c0_i32 = arith.constant 0 : i32
    %c0_i32_0 = arith.constant 0 : i32
    %c0_i32_1 = arith.constant 0 : i32
    return %arg0, %c0_i32, %c0_i32_0 : i32, i32, i32
  }
  func.func @transform_2(%arg0: i32) -> (i32, i32, i32) {
    %c0_i32 = arith.constant 0 : i32
    %c0_i32_0 = arith.constant 0 : i32
    %c0_i32_1 = arith.constant 0 : i32
    %c0_i32_2 = arith.constant 0 : i32
    return %c0_i32, %c0_i32_0, %c0_i32_1 : i32, i32, i32
  }
  func.func @transform_3(%arg0: i32) -> (i32, i32, i32) {
    %c0_i32 = arith.constant 0 : i32
    %c0_i32_0 = arith.constant 0 : i32
    %c0_i32_1 = arith.constant 0 : i32
    %c0_i32_2 = arith.constant 0 : i32
    return %c0_i32, %c0_i32_0, %c0_i32_1 : i32, i32, i32
  }
  func.func @transform_4(%arg0: i32) -> (i32, i32, i32) {
    %c0_i32 = arith.constant 0 : i32
    %c0_i32_0 = arith.constant 0 : i32
    %c0_i32_1 = arith.constant 0 : i32
    %c0_i32_2 = arith.constant 0 : i32
    return %c0_i32, %c0_i32_0, %c0_i32_1 : i32, i32, i32
  }
  func.func @transform_5(%arg0: i32) -> (i32, i32, i32) {
    %c0_i32 = arith.constant 0 : i32
    %c0_i32_0 = arith.constant 0 : i32
    %c0_i32_1 = arith.constant 0 : i32
    %c0_i32_2 = arith.constant 0 : i32
    return %c0_i32, %c0_i32_0, %c0_i32_1 : i32, i32, i32
  }
  func.func @transform_6(%arg0: i32) -> (i32, i32, i32) {
    %c0_i32 = arith.constant 0 : i32
    %c0_i32_0 = arith.constant 0 : i32
    %c0_i32_1 = arith.constant 0 : i32
    %c0_i32_2 = arith.constant 0 : i32
    return %c0_i32, %c0_i32_0, %c0_i32_1 : i32, i32, i32
  }
  func.func @transform_7(%arg0: i32) -> (i32, i32, i32) {
    %c0_i32 = arith.constant 0 : i32
    %c0_i32_0 = arith.constant 0 : i32
    %c0_i32_1 = arith.constant 0 : i32
    %c0_i32_2 = arith.constant 0 : i32
    return %c0_i32, %c0_i32_0, %c0_i32_1 : i32, i32, i32
  }
  func.func @transform_8(%arg0: i32) -> (i32, i32, i32) {
    %c0_i32 = arith.constant 0 : i32
    %c0_i32_0 = arith.constant 0 : i32
    %c0_i32_1 = arith.constant 0 : i32
    %c0_i32_2 = arith.constant 0 : i32
    return %c0_i32, %c0_i32_0, %c0_i32_1 : i32, i32, i32
  }
  func.func @transform_9(%arg0: i32) -> (i32, i32) {
    %c0_i32 = arith.constant 0 : i32
    %c0_i32_0 = arith.constant 0 : i32
    %c0_i32_1 = arith.constant 0 : i32
    return %c0_i32, %c0_i32_0 : i32, i32
  }
  func.func @transform_10(%arg0: i32) -> (i32, i32) {
    %c0_i32 = arith.constant 0 : i32
    %c0_i32_0 = arith.constant 0 : i32
    %c0_i32_1 = arith.constant 0 : i32
    return %c0_i32, %c0_i32_0 : i32, i32
  }
  func.func @transform_11(%arg0: i32) -> (i32, i32) {
    %c0_i32 = arith.constant 0 : i32
    %c0_i32_0 = arith.constant 0 : i32
    %c0_i32_1 = arith.constant 0 : i32
    return %c0_i32, %c0_i32_0 : i32, i32
  }
  func.func @transform_12(%arg0: i32) -> (i32, i32, i32) {
    %c0_i32 = arith.constant 0 : i32
    %c0_i32_0 = arith.constant 0 : i32
    %c0_i32_1 = arith.constant 0 : i32
    return %arg0, %c0_i32, %c0_i32_0 : i32, i32, i32
  }
}

module attributes {stable_mosaic.version = 11 : i64} {
  func.func @_ffn_sublayer_kernel(%arg0: i32, %arg1: memref<1x8x32xf32, #tpu.memory_space<vmem>>, %arg2: memref<32x64xbf16, #tpu.memory_space<vmem>>, %arg3: memref<1x64xf32, #tpu.memory_space<vmem>>, %arg4: memref<64x32xbf16, #tpu.memory_space<vmem>>, %arg5: memref<1x32xf32, #tpu.memory_space<vmem>>, %arg6: memref<1x32xf32, #tpu.memory_space<vmem>>, %arg7: memref<1x32xf32, #tpu.memory_space<vmem>>, %arg8: memref<1x8x32xf32, #tpu.memory_space<vmem>>) attributes {dimension_semantics = [#tpu.dimension_semantics<parallel>], iteration_bounds = array<i64: 2>, scalar_prefetch = 0 : i64, scratch_operands = 0 : i64, tpu.core_type = #tpu.core_type<tc>, window_params = [{transform_indices = @transform_0, window_bounds = array<i64: 1, 8, 32>}, {pipeline_mode = #tpu.pipeline_mode<synchronous>, transform_indices = @transform_1, window_bounds = array<i64: 32, 64>}, {pipeline_mode = #tpu.pipeline_mode<synchronous>, transform_indices = @transform_2, window_bounds = array<i64: 1, 64>}, {pipeline_mode = #tpu.pipeline_mode<synchronous>, transform_indices = @transform_3, window_bounds = array<i64: 64, 32>}, {pipeline_mode = #tpu.pipeline_mode<synchronous>, transform_indices = @transform_4, window_bounds = array<i64: 1, 32>}, {pipeline_mode = #tpu.pipeline_mode<synchronous>, transform_indices = @transform_5, window_bounds = array<i64: 1, 32>}, {pipeline_mode = #tpu.pipeline_mode<synchronous>, transform_indices = @transform_6, window_bounds = array<i64: 1, 32>}, {transform_indices = @transform_7, window_bounds = array<i64: 1, 8, 32>}]} {
    %c0 = arith.constant 0 : index
    %c0_0 = arith.constant 0 : index
    %c0_1 = arith.constant 0 : index
    %0 = vector.load %arg1[%c0, %c0_0, %c0_1] : memref<1x8x32xf32, #tpu.memory_space<vmem>>, vector<1x8x32xf32>
    %1 = vector.shape_cast %0 : vector<1x8x32xf32> to vector<8x32xf32>
    %2 = arith.truncf %1 : vector<8x32xf32> to vector<8x32xbf16>
    %c0_2 = arith.constant 0 : index
    %c0_3 = arith.constant 0 : index
    %3 = vector.load %arg2[%c0_2, %c0_3] : memref<32x64xbf16, #tpu.memory_space<vmem>>, vector<32x64xbf16>
    %cst = arith.constant dense<0.000000e+00> : vector<8x64xf32>
    %4 = tpu.matmul %2, %3, %cst {dimension_numbers = #tpu.dot_dimension_numbers<[1], [0], [0], [1], [0, 0, 1, 1], [], []>} : vector<8x32xbf16>, vector<32x64xbf16>, vector<8x64xf32> -> vector<8x64xf32>
    %c0_4 = arith.constant 0 : index
    %c0_5 = arith.constant 0 : index
    %5 = vector.load %arg3[%c0_4, %c0_5] : memref<1x64xf32, #tpu.memory_space<vmem>>, vector<1x64xf32>
    %6 = vector.broadcast %5 : vector<1x64xf32> to vector<8x64xf32>
    %7 = arith.addf %4, %6 : vector<8x64xf32>
    %cst_6 = arith.constant 0.000000e+00 : f32
    %8 = vector.broadcast %cst_6 : f32 to vector<8x64xf32>
    %9 = arith.maximumf %7, %8 : vector<8x64xf32>
    %10 = arith.truncf %9 : vector<8x64xf32> to vector<8x64xbf16>
    %c0_7 = arith.constant 0 : index
    %c0_8 = arith.constant 0 : index
    %11 = vector.load %arg4[%c0_7, %c0_8] : memref<64x32xbf16, #tpu.memory_space<vmem>>, vector<64x32xbf16>
    %cst_9 = arith.constant dense<0.000000e+00> : vector<8x32xf32>
    %12 = tpu.matmul %10, %11, %cst_9 {dimension_numbers = #tpu.dot_dimension_numbers<[1], [0], [0], [1], [0, 0, 1, 1], [], []>} : vector<8x64xbf16>, vector<64x32xbf16>, vector<8x32xf32> -> vector<8x32xf32>
    %c0_10 = arith.constant 0 : index
    %c0_11 = arith.constant 0 : index
    %13 = vector.load %arg5[%c0_10, %c0_11] : memref<1x32xf32, #tpu.memory_space<vmem>>, vector<1x32xf32>
    %14 = vector.broadcast %13 : vector<1x32xf32> to vector<8x32xf32>
    %15 = arith.addf %12, %14 : vector<8x32xf32>
    %16 = arith.addf %1, %15 : vector<8x32xf32>
    %cst_12 = arith.constant dense<0.000000e+00> : vector<8xf32>
    %17 = vector.multi_reduction <add>, %16, %cst_12 [1] : vector<8x32xf32> to vector<8xf32>
    %18 = vector.shape_cast %17 : vector<8xf32> to vector<8x1xf32>
    %cst_13 = arith.constant 3.200000e+01 : f32
    %19 = vector.broadcast %cst_13 : f32 to vector<8x1xf32>
    %20 = arith.divf %18, %19 : vector<8x1xf32>
    %21 = vector.broadcast %20 : vector<8x1xf32> to vector<8x32xf32>
    %22 = arith.subf %16, %21 : vector<8x32xf32>
    %23 = arith.mulf %22, %22 : vector<8x32xf32>
    %cst_14 = arith.constant dense<0.000000e+00> : vector<8xf32>
    %24 = vector.multi_reduction <add>, %23, %cst_14 [1] : vector<8x32xf32> to vector<8xf32>
    %25 = vector.shape_cast %24 : vector<8xf32> to vector<8x1xf32>
    %cst_15 = arith.constant 3.200000e+01 : f32
    %26 = vector.broadcast %cst_15 : f32 to vector<8x1xf32>
    %27 = arith.divf %25, %26 : vector<8x1xf32>
    %28 = vector.broadcast %20 : vector<8x1xf32> to vector<8x32xf32>
    %29 = arith.subf %16, %28 : vector<8x32xf32>
    %cst_16 = arith.constant 9.99999974E-6 : f32
    %30 = vector.broadcast %cst_16 : f32 to vector<8x1xf32>
    %31 = arith.addf %27, %30 : vector<8x1xf32>
    %32 = math.rsqrt %31 : vector<8x1xf32>
    %33 = vector.broadcast %32 : vector<8x1xf32> to vector<8x32xf32>
    %34 = arith.mulf %29, %33 : vector<8x32xf32>
    %c0_17 = arith.constant 0 : index
    %c0_18 = arith.constant 0 : index
    %35 = vector.load %arg6[%c0_17, %c0_18] : memref<1x32xf32, #tpu.memory_space<vmem>>, vector<1x32xf32>
    %36 = vector.broadcast %35 : vector<1x32xf32> to vector<8x32xf32>
    %37 = arith.mulf %34, %36 : vector<8x32xf32>
    %c0_19 = arith.constant 0 : index
    %c0_20 = arith.constant 0 : index
    %38 = vector.load %arg7[%c0_19, %c0_20] : memref<1x32xf32, #tpu.memory_space<vmem>>, vector<1x32xf32>
    %39 = vector.broadcast %38 : vector<1x32xf32> to vector<8x32xf32>
    %40 = arith.addf %37, %39 : vector<8x32xf32>
    %c0_21 = arith.constant 0 : index
    %c0_22 = arith.constant 0 : index
    %c0_23 = arith.constant 0 : index
    %41 = vector.load %arg8[%c0_21, %c0_22, %c0_23] : memref<1x8x32xf32, #tpu.memory_space<vmem>>, vector<1x8x32xf32>
    %42 = vector.shape_cast %41 : vector<1x8x32xf32> to vector<8x32xf32>
    %43 = vector.shape_cast %40 : vector<8x32xf32> to vector<1x8x32xf32>
    tpu.vector_store %arg8[%c0_21, %c0_22, %c0_23], %43 {strides = array<i32>} : memref<1x8x32xf32, #tpu.memory_space<vmem>>, vector<1x8x32xf32>,
    return
  }
  func.func @transform_0(%arg0: i32) -> (i32, i32, i32) {
    %c0_i32 = arith.constant 0 : i32
    %c0_i32_0 = arith.constant 0 : i32
    %c0_i32_1 = arith.constant 0 : i32
    return %arg0, %c0_i32, %c0_i32_0 : i32, i32, i32
  }
  func.func @transform_1(%arg0: i32) -> (i32, i32) {
    %c0_i32 = arith.constant 0 : i32
    %c0_i32_0 = arith.constant 0 : i32
    %c0_i32_1 = arith.constant 0 : i32
    return %c0_i32, %c0_i32_0 : i32, i32
  }
  func.func @transform_2(%arg0: i32) -> (i32, i32) {
    %c0_i32 = arith.constant 0 : i32
    %c0_i32_0 = arith.constant 0 : i32
    %c0_i32_1 = arith.constant 0 : i32
    return %c0_i32, %c0_i32_0 : i32, i32
  }
  func.func @transform_3(%arg0: i32) -> (i32, i32) {
    %c0_i32 = arith.constant 0 : i32
    %c0_i32_0 = arith.constant 0 : i32
    %c0_i32_1 = arith.constant 0 : i32
    return %c0_i32, %c0_i32_0 : i32, i32
  }
  func.func @transform_4(%arg0: i32) -> (i32, i32) {
    %c0_i32 = arith.constant 0 : i32
    %c0_i32_0 = arith.constant 0 : i32
    %c0_i32_1 = arith.constant 0 : i32
    return %c0_i32, %c0_i32_0 : i32, i32
  }
  func.func @transform_5(%arg0: i32) -> (i32, i32) {
    %c0_i32 = arith.constant 0 : i32
    %c0_i32_0 = arith.constant 0 : i32
    %c0_i32_1 = arith.constant 0 : i32
    return %c0_i32, %c0_i32_0 : i32, i32
  }
  func.func @transform_6(%arg0: i32) -> (i32, i32) {
    %c0_i32 = arith.constant 0 : i32
    %c0_i32_0 = arith.constant 0 : i32
    %c0_i32_1 = arith.constant 0 : i32
    return %c0_i32, %c0_i32_0 : i32, i32
  }
  func.func @transform_7(%arg0: i32) -> (i32, i32, i32) {
    %c0_i32 = arith.constant 0 : i32
    %c0_i32_0 = arith.constant 0 : i32
    %c0_i32_1 = arith.constant 0 : i32
    return %arg0, %c0_i32, %c0_i32_0 : i32, i32, i32
  }
}

module attributes {stable_mosaic.version = 11 : i64} {
  func.func @_ln_kernel(%arg0: i32, %arg1: memref<1x8x32xf32, #tpu.memory_space<vmem>>, %arg2: memref<1x32xf32, #tpu.memory_space<vmem>>, %arg3: memref<1x32xf32, #tpu.memory_space<vmem>>, %arg4: memref<1x8x32xf32, #tpu.memory_space<vmem>>) attributes {dimension_semantics = [#tpu.dimension_semantics<parallel>], iteration_bounds = array<i64: 2>, scalar_prefetch = 0 : i64, scratch_operands = 0 : i64, tpu.core_type = #tpu.core_type<tc>, window_params = [{transform_indices = @transform_0, window_bounds = array<i64: 1, 8, 32>}, {pipeline_mode = #tpu.pipeline_mode<synchronous>, transform_indices = @transform_1, window_bounds = array<i64: 1, 32>}, {pipeline_mode = #tpu.pipeline_mode<synchronous>, transform_indices = @transform_2, window_bounds = array<i64: 1, 32>}, {transform_indices = @transform_3, window_bounds = array<i64: 1, 8, 32>}]} {
    %c0 = arith.constant 0 : index
    %c0_0 = arith.constant 0 : index
    %c0_1 = arith.constant 0 : index
    %0 = vector.load %arg1[%c0, %c0_0, %c0_1] : memref<1x8x32xf32, #tpu.memory_space<vmem>>, vector<1x8x32xf32>
    %1 = vector.shape_cast %0 : vector<1x8x32xf32> to vector<8x32xf32>
    %cst = arith.constant dense<0.000000e+00> : vector<8xf32>
    %2 = vector.multi_reduction <add>, %1, %cst [1] : vector<8x32xf32> to vector<8xf32>
    %3 = vector.shape_cast %2 : vector<8xf32> to vector<8x1xf32>
    %cst_2 = arith.constant 3.200000e+01 : f32
    %4 = vector.broadcast %cst_2 : f32 to vector<8x1xf32>
    %5 = arith.divf %3, %4 : vector<8x1xf32>
    %6 = vector.broadcast %5 : vector<8x1xf32> to vector<8x32xf32>
    %7 = arith.subf %1, %6 : vector<8x32xf32>
    %8 = arith.mulf %7, %7 : vector<8x32xf32>
    %cst_3 = arith.constant dense<0.000000e+00> : vector<8xf32>
    %9 = vector.multi_reduction <add>, %8, %cst_3 [1] : vector<8x32xf32> to vector<8xf32>
    %10 = vector.shape_cast %9 : vector<8xf32> to vector<8x1xf32>
    %cst_4 = arith.constant 3.200000e+01 : f32
    %11 = vector.broadcast %cst_4 : f32 to vector<8x1xf32>
    %12 = arith.divf %10, %11 : vector<8x1xf32>
    %13 = vector.broadcast %5 : vector<8x1xf32> to vector<8x32xf32>
    %14 = arith.subf %1, %13 : vector<8x32xf32>
    %cst_5 = arith.constant 9.99999974E-6 : f32
    %15 = vector.broadcast %cst_5 : f32 to vector<8x1xf32>
    %16 = arith.addf %12, %15 : vector<8x1xf32>
    %17 = math.rsqrt %16 : vector<8x1xf32>
    %18 = vector.broadcast %17 : vector<8x1xf32> to vector<8x32xf32>
    %19 = arith.mulf %14, %18 : vector<8x32xf32>
    %c0_6 = arith.constant 0 : index
    %c0_7 = arith.constant 0 : index
    %20 = vector.load %arg2[%c0_6, %c0_7] : memref<1x32xf32, #tpu.memory_space<vmem>>, vector<1x32xf32>
    %21 = vector.broadcast %20 : vector<1x32xf32> to vector<8x32xf32>
    %22 = arith.mulf %19, %21 : vector<8x32xf32>
    %c0_8 = arith.constant 0 : index
    %c0_9 = arith.constant 0 : index
    %23 = vector.load %arg3[%c0_8, %c0_9] : memref<1x32xf32, #tpu.memory_space<vmem>>, vector<1x32xf32>
    %24 = vector.broadcast %23 : vector<1x32xf32> to vector<8x32xf32>
    %25 = arith.addf %22, %24 : vector<8x32xf32>
    %c0_10 = arith.constant 0 : index
    %c0_11 = arith.constant 0 : index
    %c0_12 = arith.constant 0 : index
    %26 = vector.load %arg4[%c0_10, %c0_11, %c0_12] : memref<1x8x32xf32, #tpu.memory_space<vmem>>, vector<1x8x32xf32>
    %27 = vector.shape_cast %26 : vector<1x8x32xf32> to vector<8x32xf32>
    %28 = vector.shape_cast %25 : vector<8x32xf32> to vector<1x8x32xf32>
    tpu.vector_store %arg4[%c0_10, %c0_11, %c0_12], %28 {strides = array<i32>} : memref<1x8x32xf32, #tpu.memory_space<vmem>>, vector<1x8x32xf32>,
    return
  }
  func.func @transform_0(%arg0: i32) -> (i32, i32, i32) {
    %c0_i32 = arith.constant 0 : i32
    %c0_i32_0 = arith.constant 0 : i32
    %c0_i32_1 = arith.constant 0 : i32
    return %arg0, %c0_i32, %c0_i32_0 : i32, i32, i32
  }
  func.func @transform_1(%arg0: i32) -> (i32, i32) {
    %c0_i32 = arith.constant 0 : i32
    %c0_i32_0 = arith.constant 0 : i32
    %c0_i32_1 = arith.constant 0 : i32
    return %c0_i32, %c0_i32_0 : i32, i32
  }
  func.func @transform_2(%arg0: i32) -> (i32, i32) {
    %c0_i32 = arith.constant 0 : i32
    %c0_i32_0 = arith.constant 0 : i32
    %c0_i32_1 = arith.constant 0 : i32
    return %c0_i32, %c0_i32_0 : i32, i32
  }
  func.func @transform_3(%arg0: i32) -> (i32, i32, i32) {
    %c0_i32 = arith.constant 0 : i32
    %c0_i32_0 = arith.constant 0 : i32
    %c0_i32_1 = arith.constant 0 : i32
    return %arg0, %c0_i32, %c0_i32_0 : i32, i32, i32
  }
}

module attributes {stable_mosaic.version = 11 : i64} {
  func.func @_out_proj_kernel(%arg0: i32, %arg1: memref<1x8x32xf32, #tpu.memory_space<vmem>>, %arg2: memref<32x60xbf16, #tpu.memory_space<vmem>>, %arg3: memref<1x60xf32, #tpu.memory_space<vmem>>, %arg4: memref<1x8x60xf32, #tpu.memory_space<vmem>>) attributes {dimension_semantics = [#tpu.dimension_semantics<parallel>], iteration_bounds = array<i64: 2>, scalar_prefetch = 0 : i64, scratch_operands = 0 : i64, tpu.core_type = #tpu.core_type<tc>, window_params = [{transform_indices = @transform_0, window_bounds = array<i64: 1, 8, 32>}, {pipeline_mode = #tpu.pipeline_mode<synchronous>, transform_indices = @transform_1, window_bounds = array<i64: 32, 60>}, {pipeline_mode = #tpu.pipeline_mode<synchronous>, transform_indices = @transform_2, window_bounds = array<i64: 1, 60>}, {transform_indices = @transform_3, window_bounds = array<i64: 1, 8, 60>}]} {
    %c0 = arith.constant 0 : index
    %c0_0 = arith.constant 0 : index
    %c0_1 = arith.constant 0 : index
    %0 = vector.load %arg1[%c0, %c0_0, %c0_1] : memref<1x8x32xf32, #tpu.memory_space<vmem>>, vector<1x8x32xf32>
    %1 = vector.shape_cast %0 : vector<1x8x32xf32> to vector<8x32xf32>
    %2 = arith.truncf %1 : vector<8x32xf32> to vector<8x32xbf16>
    %c0_2 = arith.constant 0 : index
    %c0_3 = arith.constant 0 : index
    %3 = vector.load %arg2[%c0_2, %c0_3] : memref<32x60xbf16, #tpu.memory_space<vmem>>, vector<32x60xbf16>
    %cst = arith.constant dense<0.000000e+00> : vector<8x60xf32>
    %4 = tpu.matmul %2, %3, %cst {dimension_numbers = #tpu.dot_dimension_numbers<[1], [0], [0], [1], [0, 0, 1, 1], [], []>} : vector<8x32xbf16>, vector<32x60xbf16>, vector<8x60xf32> -> vector<8x60xf32>
    %c0_4 = arith.constant 0 : index
    %c0_5 = arith.constant 0 : index
    %5 = vector.load %arg3[%c0_4, %c0_5] : memref<1x60xf32, #tpu.memory_space<vmem>>, vector<1x60xf32>
    %6 = vector.broadcast %5 : vector<1x60xf32> to vector<8x60xf32>
    %7 = arith.addf %4, %6 : vector<8x60xf32>
    %c0_6 = arith.constant 0 : index
    %c0_7 = arith.constant 0 : index
    %c0_8 = arith.constant 0 : index
    %8 = vector.load %arg4[%c0_6, %c0_7, %c0_8] : memref<1x8x60xf32, #tpu.memory_space<vmem>>, vector<1x8x60xf32>
    %9 = vector.shape_cast %8 : vector<1x8x60xf32> to vector<8x60xf32>
    %10 = vector.shape_cast %7 : vector<8x60xf32> to vector<1x8x60xf32>
    tpu.vector_store %arg4[%c0_6, %c0_7, %c0_8], %10 {strides = array<i32>} : memref<1x8x60xf32, #tpu.memory_space<vmem>>, vector<1x8x60xf32>,
    return
  }
  func.func @transform_0(%arg0: i32) -> (i32, i32, i32) {
    %c0_i32 = arith.constant 0 : i32
    %c0_i32_0 = arith.constant 0 : i32
    %c0_i32_1 = arith.constant 0 : i32
    return %arg0, %c0_i32, %c0_i32_0 : i32, i32, i32
  }
  func.func @transform_1(%arg0: i32) -> (i32, i32) {
    %c0_i32 = arith.constant 0 : i32
    %c0_i32_0 = arith.constant 0 : i32
    %c0_i32_1 = arith.constant 0 : i32
    return %c0_i32, %c0_i32_0 : i32, i32
  }
  func.func @transform_2(%arg0: i32) -> (i32, i32) {
    %c0_i32 = arith.constant 0 : i32
    %c0_i32_0 = arith.constant 0 : i32
    %c0_i32_1 = arith.constant 0 : i32
    return %c0_i32, %c0_i32_0 : i32, i32
  }
  func.func @transform_3(%arg0: i32) -> (i32, i32, i32) {
    %c0_i32 = arith.constant 0 : i32
    %c0_i32_0 = arith.constant 0 : i32
    %c0_i32_1 = arith.constant 0 : i32
    return %arg0, %c0_i32, %c0_i32_0 : i32, i32, i32
  }
}

</mosaic_0001>

<bundles_post_ra>
// kernel: model_forward.17
= control target key start
LH: loop header
LB: loop body
LE: loop exit
PB: predicated region body
PF: predicated region fallthrough
CT: control target
= control target key end

     0   :  { %s332_s12 = smov 0   ;;  %s368_s0 = inlined_call_operand.vmem [shape: f32[2,10,32], index: 0, kind: input, shape index: {}]   ;;  %s369_s1 = inlined_call_operand.vmem [shape: f32[1,32], index: 1, kind: input, shape index: {}]   ;;  %s370_s2 = inlined_call_operand.vmem [shape: f32[1,32], index: 2, kind: input, shape index: {}]   ;;  %s371_s3 = inlined_call_operand.vmem [shape: f32[2,10,32], index: 3, kind: output, shape index: {}]  }
   0x1 LB: > { %s277_s13 = sadd.s32 4294967295, %s310_s12   ;;  %p281_p0 = scmp.ge.s32.totalorder %s310_s12, 1  ;;  %s310_s12 = sphi %s332_s12, %s13_s12  }
   0x2   : > { %p137_p1 = scmp.lt.s32.totalorder %s310_s12, 3 }
   0x4   : > { %p138_p2 = pnand %p281_p0, %p137_p1 }
   0x5   : > { %p161_p3 = scmp.lt.s32.totalorder (!%p138_p2), %s277_s13, 1  ;;  %vm173_vm0 = vcmask (!%p138_p2), 261120   ;;  %vm177_vm1 = vcmask (!%p138_p2), 254976   ;;  %v286_v21 = vld [vmem:[%s369_s1] ss:$0 sm:$0xff] (!%p138_p2) }
   0x6   : > { %141 = sbr.rel (%p138_p2) target bundleno = 335 (0x14f), region = 32  ;;  %v287_v23 = vld [vmem:[%s370_s2] ss:$0 sm:$0xff] (!%p138_p2) }
   0xd   : > { %s373_s13 = smov (!%p161_p3, %s277_s13), 1 }
   0xe   : > { %s290_s14 = sshll.u32 %s373_s13, 4 }
   0xf   : > { %s165_s17 = scalar_lea.vmem %s368_s0, %s290_s14  ;;  %s170_s24 = scalar_lea.vmem %s371_s3, %s290_s14 }
  0x10   : > { %v171_v0 = vld [vmem:[%s165_s17] sm:$0xff]  ;;  %v172_v1 = vld [vmem:[%s165_s17 + $0x8] sm:$0x3] }
  0x11   : > { %v174_v2 = vsel %vm173_vm0, %v171_v0, 0.0  ;;  %v178_v3 = vsel %vm177_vm1, %v172_v1, 0.0 }
  0x12   : > { %175 = vadd.xlane.f32.xlu0 %v174_v2 }
  0x16   : > { %179 = vadd.xlane.f32.xlu0 %v178_v3 }
  0x9f   : > { %v176_v4 = vpop.xlane.xlu0 %175 }
  0xa0   : > { %v182_v5 = vmul.f32 0.03125, %v176_v4 }
  0xa2   : > { %v184_v6 = vsub.f32 %v171_v0, %v182_v5 }
  0xa3   : > { %v180_v7 = vpop.xlane.xlu0 %179 }
  0xa4   : > { %v183_v8 = vmul.f32 0.03125, %v180_v7  ;;  %v186_v9 = vmul.f32 %v184_v6, %v184_v6 }
  0xa6   : > { %v185_v10 = vsub.f32 %v172_v1, %v183_v8  ;;  %v188_v11 = vsel %vm173_vm0, %v186_v9, 0.0 }
  0xa7   : > { %189 = vadd.xlane.f32.xlu1 %v188_v11 }
  0xa8   : > { %v187_v12 = vmul.f32 %v185_v10, %v185_v10 }
  0xaa   : > { %v191_v13 = vsel %vm177_vm1, %v187_v12, 0.0 }
  0xab   : > { %192 = vadd.xlane.f32.xlu1 %v191_v13 }
 0x134   : > { %v190_v14 = vpop.xlane.xlu1 %189 }
 0x135   : > { %v194_v15 = vmul.f32 0.03125, %v190_v14 }
 0x137   : > { %v196_v16 = vadd.f32 1e-05, %v194_v15 }
 0x138   : > { %v193_v17 = vpop.xlane.xlu1 %192 }
 0x139   : > { %300 = vrsqrt.f32 %v196_v16  ;;  %v195_v18 = vmul.f32 0.03125, %v193_v17 }
 0x13b   : > { %v197_v19 = vadd.f32 1e-05, %v195_v18 }
 0x13d   : > { %302 = vrsqrt.f32 %v197_v19 }
 0x143   : > { %v301_v20 = vpop.eup %300 }
 0x144   : > { %v200_v22 = vmul.f32 %v301_v20, %v184_v6 }
 0x146   : > { %v209_v24 = vmul.f32 %v286_v21, %v200_v22 }
 0x147   : > { %v303_v25 = vpop.eup %302 }
 0x148   : > { %v218_v26 = vadd.f32 %v287_v23, %v209_v24  ;;  %v201_v27 = vmul.f32 %v303_v25, %v185_v10 }
 0x14a   : > { %220 = vst.msk [vmem:[%s170_s24] sm:$0xff] %vm173_vm0, %v218_v26  ;;  %v210_v28 = vmul.f32 %v286_v21, %v201_v27 }
 0x14c   : > { %v219_v29 = vadd.f32 %v287_v23, %v210_v28 }
 0x14e   : > { %221 = vst.msk [vmem:[%s170_s24 + $0x8] sm:$0x3] %vm177_vm1, %v219_v29 }
 0x14f PF: > { %s13_s12 = sadd.s32 1, %s310_s12  }
 0x150   : > { %p10_p4 = scmp.ge.s32.totalorder %s13_s12, 4  }
 0x152   :  { %12 = sbr.rel (!%p10_p4) target bundleno = 1 (0x1), region = 62 }

// kernel: model_forward.14
= control target key start
LH: loop header
LB: loop body
LE: loop exit
PB: predicated region body
PF: predicated region fallthrough
CT: control target
= control target key end

     0   :  { %s666_s24 = smov 0   ;;  %s727_s0 = inlined_call_operand.vmem [shape: f32[2,10,32], index: 0, kind: input, shape index: {}]   ;;  %s728_s1 = inlined_call_operand.vmem [shape: bf16[32,64], index: 1, kind: input, shape index: {}]   ;;  %s729_s2 = inlined_call_operand.vmem [shape: f32[1,64], index: 2, kind: input, shape index: {}]   ;;  %s730_s3 = inlined_call_operand.vmem [shape: bf16[64,32], index: 3, kind: input, shape index: {}]   ;;  %s731_s4 = inlined_call_operand.vmem [shape: f32[1,32], index: 4, kind: input, shape index: {}]   ;;  %s732_s5 = inlined_call_operand.vmem [shape: f32[1,32], index: 5, kind: input, shape index: {}]   ;;  %s733_s6 = inlined_call_operand.vmem [shape: f32[1,32], index: 6, kind: input, shape index: {}]   ;;  %s734_s7 = inlined_call_operand.vmem [shape: f32[2,10,32], index: 7, kind: output, shape index: {}]  }
   0x1 LB: > { %s543_s25 = sadd.s32 4294967295, %s622_s24   ;;  %p547_p0 = scmp.ge.s32.totalorder %s622_s24, 1  ;;  %s622_s24 = sphi %s666_s24, %s17_s24  }
   0x2   : > { %p237_p1 = scmp.lt.s32.totalorder %s622_s24, 3 }
   0x4   : > { %p238_p2 = pnand %p547_p0, %p237_p1 }
   0x5   : > { %v606_v0 = vld [vmem:[%s728_s1] sm:$0xff] (!%p238_p2)   ;;  %v624_v1 = vmov (!%p238_p2), 0.0   ;;  %v607_v2 = vld [vmem:[%s728_s1 + $0x8] sm:$0xff] (!%p238_p2)   ;;  %vm625_vm0 = vmmov (!%p238_p2), 0   ;;  %p269_p3 = scmp.lt.s32.totalorder (!%p238_p2), %s543_s25, 1  ;;  %vm306_vm1 = vcmask (!%p238_p2), 261120  }
   0x6   : > { %241 = sbr.rel (%p238_p2) target bundleno = 773 (0x305), region = 48  ;;  %576 = vmatprep.subr.bf16.mxu0 (!%p238_p2), %v624_v1  ;;  %584 = vmatprep.subr.bf16.mxu1 (!%p238_p2), %v624_v1  ;;  %v608_v3 = vld [vmem:[%s730_s3] sm:$0xff] (!%p238_p2)   ;;  %v609_v4 = vld [vmem:[%s730_s3 + $0x8] sm:$0xff] (!%p238_p2)   ;;  %v610_v8 = vld [vmem:[%s730_s3 + $0x10] sm:$0xff] (!%p238_p2)   ;;  %vm393_vm2 = vcmask (!%p238_p2), 523264   ;;  %vm443_vm3 = vcmask (!%p238_p2), 254976  }
   0x7   : > { %577 = vmatpush3.bf16.msra.mxu0 (!%p238_p2), %v606_v0  ;;  %580 = vmatprep.mubr.msk.bf16.mxu0 (!%p238_p2), %vm625_vm0, %v624_v1  ;;  %v611_v9 = vld [vmem:[%s730_s3 + $0x18] sm:$0xff] (!%p238_p2)   ;;  %v552_v10 = vld [vmem:[%s729_s2] ss:$0 sm:$0xff] (!%p238_p2) }
   0x8   : > { %578 = vmatprep.subr.bf16.mxu0 (!%p238_p2), %v624_v1  ;;  %592 = vmatprep.mubr.msk.bf16.mxu1 (!%p238_p2), %vm625_vm0, %v624_v1  ;;  %v556_v20 = vld [vmem:[%s731_s4] ss:$0 sm:$0xff] (!%p238_p2) }
   0x9   : > { %585 = vmatpush3.bf16.msra.mxu1 (!%p238_p2), %v608_v3  ;;  %v562_v48 = vld [vmem:[%s732_s5] ss:$0 sm:$0xff] (!%p238_p2) }
   0xa   : > { %586 = vmatprep.subr.bf16.mxu1 (!%p238_p2), %v624_v1  ;;  %v563_v50 = vld [vmem:[%s733_s6] ss:$0 sm:$0xff] (!%p238_p2) }
   0xb   : > { %579 = vmatpush3.bf16.msra.mxu0 (!%p238_p2), %v607_v2 }
   0xd   : > { %s736_s25 = smov (!%p269_p3, %s543_s25), 1  ;;  %587 = vmatpush3.bf16.msra.mxu1 %v609_v4 }
   0xe   : > { %s566_s11 = sshll.u32 %s736_s25, 4  ;;  %588 = vmatprep.subr.bf16.mxu1 %v624_v1 }
   0xf   : > { %s273_s14 = scalar_lea.vmem %s727_s0, %s566_s11  ;;  %s278_s8 = scalar_lea.vmem %s734_s7, %s566_s11 }
  0x10   : > { %v280_v5 = vld [vmem:[%s273_s14] sm:$0xff]  ;;  %v281_v6 = vld [vmem:[%s273_s14 + $0x8] sm:$0x3] }
  0x11   : > { %v282_v7 = vpack.c.bf16 %v281_v6, %v280_v5  ;;  %589 = vmatpush3.bf16.msra.mxu1 %v610_v8 }
  0x12   : > { %590 = vmatprep.subr.bf16.mxu1 %v624_v1 }
  0x13   : > { %581 = vmatmul.mubr.msk.bf16.vlgmr.msra.gmra.mrb[0].mxu0 %vm306_vm1, %v282_v7 }
  0x15   : > { %591 = vmatpush3.bf16.msra.mxu1 %v611_v9 }
  0xe6   : > { %v344_v11 = vpop.f32.mrb[0].mxu0 }
  0xe7   : > { %v345_v12 = vadd.f32 %v552_v10, %v344_v11  ;;  %v582_v13 = vpop.f32.mrb[1].mxu0 }
  0xe8   : > { %v347_v14 = vpop.f32.mrb[2].mxu0 }
  0xe9   : > { %v348_v15 = vadd.f32 %v552_v10, %v347_v14  ;;  %v583_v16 = vpop.f32.mrb[3].mxu0  ;;  %v351_v17 = vmax.f32 %v345_v12, 0.0 }
  0xeb   : > { %v352_v18 = vmax.f32 %v348_v15, 0.0 }
  0xed   : > { %v353_v19 = vpack.c.bf16 %v352_v18, %v351_v17 }
  0xef   : > { %593 = vmatmul.mubr.msk.bf16.vlgmr.msra.gmra.mrb[0].mxu1 %vm393_vm2, %v353_v19 }
 0x1c2   : > { %v431_v21 = vpop.f32.mrb[0].mxu1 }
 0x1c3   : > { %v432_v22 = vadd.f32 %v556_v20, %v431_v21  ;;  %v594_v23 = vpop.f32.mrb[1].mxu1 }
 0x1c4   : > { %v434_v24 = vpop.f32.mrb[2].mxu1 }
 0x1c5   : > { %v435_v25 = vadd.f32 %v556_v20, %v434_v24  ;;  %v595_v26 = vpop.f32.mrb[3].mxu1  ;;  %v438_v27 = vadd.f32 %v432_v22, %v280_v5 }
 0x1c7   : > { %v440_v28 = vsel %vm306_vm1, %v438_v27, 0.0  ;;  %v439_v29 = vadd.f32 %v435_v25, %v281_v6 }
 0x1c8   : > { %441 = vadd.xlane.f32.xlu0 %v440_v28 }
 0x1c9   : > { %v444_v30 = vsel %vm443_vm3, %v439_v29, 0.0 }
 0x1cc   : > { %445 = vadd.xlane.f32.xlu0 %v444_v30 }
 0x255   : > { %v442_v31 = vpop.xlane.xlu0 %441 }
 0x256   : > { %v448_v32 = vmul.f32 0.03125, %v442_v31 }
 0x258   : > { %v450_v33 = vsub.f32 %v438_v27, %v448_v32 }
 0x259   : > { %v446_v34 = vpop.xlane.xlu0 %445 }
 0x25a   : > { %v449_v35 = vmul.f32 0.03125, %v446_v34  ;;  %v452_v36 = vmul.f32 %v450_v33, %v450_v33 }
 0x25c   : > { %v451_v37 = vsub.f32 %v439_v29, %v449_v35  ;;  %v454_v38 = vsel %vm306_vm1, %v452_v36, 0.0 }
 0x25d   : > { %455 = vadd.xlane.f32.xlu1 %v454_v38 }
 0x25e   : > { %v453_v39 = vmul.f32 %v451_v37, %v451_v37 }
 0x260   : > { %v457_v40 = vsel %vm443_vm3, %v453_v39, 0.0 }
 0x261   : > { %458 = vadd.xlane.f32.xlu1 %v457_v40 }
 0x2ea   : > { %v456_v41 = vpop.xlane.xlu1 %455 }
 0x2eb   : > { %v460_v42 = vmul.f32 0.03125, %v456_v41 }
 0x2ed   : > { %v462_v43 = vadd.f32 1e-05, %v460_v42 }
 0x2ee   : > { %v459_v44 = vpop.xlane.xlu1 %458 }
 0x2ef   : > { %612 = vrsqrt.f32 %v462_v43  ;;  %v461_v45 = vmul.f32 0.03125, %v459_v44 }
 0x2f1   : > { %v463_v46 = vadd.f32 1e-05, %v461_v45 }
 0x2f3   : > { %614 = vrsqrt.f32 %v463_v46 }
 0x2f9   : > { %v613_v47 = vpop.eup %612 }
 0x2fa   : > { %v466_v49 = vmul.f32 %v613_v47, %v450_v33 }
 0x2fc   : > { %v475_v51 = vmul.f32 %v562_v48, %v466_v49 }
 0x2fd   : > { %v615_v52 = vpop.eup %614 }
 0x2fe   : > { %v484_v53 = vadd.f32 %v563_v50, %v475_v51  ;;  %v467_v54 = vmul.f32 %v615_v52, %v451_v37 }
 0x300   : > { %486 = vst.msk [vmem:[%s278_s8] sm:$0xff] %vm306_vm1, %v484_v53  ;;  %v476_v55 = vmul.f32 %v562_v48, %v467_v54 }
 0x302   : > { %v485_v56 = vadd.f32 %v563_v50, %v476_v55 }
 0x304   : > { %487 = vst.msk [vmem:[%s278_s8 + $0x8] sm:$0x3] %vm443_vm3, %v485_v56 }
 0x305 PF: > { %s17_s24 = sadd.s32 1, %s622_s24  }
 0x306   : > { %p14_p4 = scmp.ge.s32.totalorder %s17_s24, 4  }
 0x308   :  { %16 = sbr.rel (!%p14_p4) target bundleno = 1 (0x1), region = 78 }

// kernel: model_forward.13
= control target key start
LH: loop header
LB: loop body
LE: loop exit
PB: predicated region body
PF: predicated region fallthrough
CT: control target
= control target key end

     0   :  { %s2538_s21 = smov 0   ;;  %s2890_s0 = inlined_call_operand.vmem [shape: f32[2,10,32], index: 0, kind: input, shape index: {}]   ;;  %s2891_s1 = inlined_call_operand.vmem [shape: bf16[4,32,8], index: 1, kind: input, shape index: {}]   ;;  %s2892_s2 = inlined_call_operand.vmem [shape: f32[4,1,8], index: 2, kind: input, shape index: {}]   ;;  %s2893_s3 = inlined_call_operand.vmem [shape: bf16[4,32,8], index: 3, kind: input, shape index: {}]   ;;  %s2894_s4 = inlined_call_operand.vmem [shape: f32[4,1,8], index: 4, kind: input, shape index: {}]   ;;  %s2895_s5 = inlined_call_operand.vmem [shape: bf16[4,32,8], index: 5, kind: input, shape index: {}]   ;;  %s2896_s6 = inlined_call_operand.vmem [shape: f32[4,1,8], index: 6, kind: input, shape index: {}]   ;;  %s2897_s7 = inlined_call_operand.vmem [shape: bf16[4,8,32], index: 7, kind: input, shape index: {}]   ;;  %s2898_s8 = inlined_call_operand.vmem [shape: f32[1,32], index: 8, kind: input, shape index: {}]   ;;  %s2899_s9 = inlined_call_operand.vmem [shape: f32[2,1,10], index: 9, kind: input, shape index: {}]   ;;  %s2900_s10 = inlined_call_operand.vmem [shape: f32[1,32], index: 10, kind: input, shape index: {}]   ;;  %s2901_s11 = inlined_call_operand.vmem [shape: f32[1,32], index: 11, kind: input, shape index: {}]   ;;  %s2902_s12 = inlined_call_operand.vmem [shape: f32[2,10,32], index: 12, kind: output, shape index: {}]  }
   0x1 LB: > { %s2040_s22 = sadd.s32 4294967295, %s2469_s21   ;;  %p2044_p0 = scmp.ge.s32.totalorder %s2469_s21, 1  ;;  %s2469_s21 = sphi %s2538_s21, %s22_s21  }
   0x2   : > { %p370_p1 = scmp.lt.s32.totalorder %s2469_s21, 3 }
   0x4   : > { %p371_p2 = pnand %p2044_p0, %p370_p1 }
   0x5   : > { %v2403_v0 = vld [vmem:[%s2893_s3] sm:$0xff] (!%p371_p2)   ;;  %v2471_v1 = vmov (!%p371_p2), 0.0   ;;  %v2404_v2 = vld [vmem:[%s2893_s3 + $0x8] sm:$0xff] (!%p371_p2)   ;;  %vm2472_vm0 = vmmov (!%p371_p2), 0   ;;  %p415_p3 = scmp.lt.s32.totalorder (!%p371_p2), %s2040_s22, 1  ;;  %vm462_vm1 = vcmask (!%p371_p2), 261120  }
   0x6   : > { %374 = sbr.rel (%p371_p2) target bundleno = 4251 (0x109b), region = 68  ;;  %2233 = vmatprep.subr.bf16.mxu1 (!%p371_p2), %v2471_v1  ;;  %2225 = vmatprep.subr.bf16.mxu0 (!%p371_p2), %v2471_v1  ;;  %v2405_v3 = vld [vmem:[%s2891_s1] sm:$0xff] (!%p371_p2)   ;;  %v2406_v4 = vld [vmem:[%s2891_s1 + $0x8] sm:$0xff] (!%p371_p2)   ;;  %vm637_vm2 = vcmask (!%p371_p2), 64512   ;;  %vm685_vm3 = vcmask (!%p371_p2), 80896   ;;  %vm689_vm4 = vcmask (!%p371_p2), 74752  }
   0x7   : > { %2234 = vmatpush3.bf16.msra.mxu1 (!%p371_p2), %v2403_v0  ;;  %2237 = vmatprep.mubr.msk.bf16.mxu1 (!%p371_p2), %vm2472_vm0, %v2471_v1  ;;  %v2050_v8 = vld [vmem:[%s2892_s2] ss:$0 sm:$0xff] (!%p371_p2)  ;;  %v2408_v26 = vld [vmem:[%s2895_s5 + $0x8] sm:$0xff] (!%p371_p2)   ;;  %vm714_vm5 = vcmask (!%p371_p2), 1044480   ;;  %v2411_v55 = vld [vmem:[%s2891_s1 + $0x10] sm:$0xff] (!%p371_p2)   ;;  %vm1085_vm6 = vcmask (!%p371_p2), 1043456  }
   0x8   : > { %2235 = vmatprep.subr.bf16.mxu1 (!%p371_p2), %v2471_v1  ;;  %2229 = vmatprep.mubr.msk.bf16.mxu0 (!%p371_p2), %vm2472_vm0, %v2471_v1  ;;  %v2054_v9 = vld [vmem:[%s2894_s4] ss:$0 sm:$0xff] (!%p371_p2)  ;;  %v2412_v56 = vld [vmem:[%s2891_s1 + $0x18] sm:$0xff] (!%p371_p2)   ;;  %v2409_v63 = vld [vmem:[%s2893_s3 + $0x10] sm:$0xff] (!%p371_p2)   ;;  %vm1931_vm7 = vcmask (!%p371_p2), 254976  }
   0x9   : > { %2226 = vmatpush3.bf16.msra.mxu0 (!%p371_p2), %v2405_v3  ;;  %v2407_v25 = vld [vmem:[%s2895_s5] sm:$0xff] (!%p371_p2)  }
   0xa   : > { %2227 = vmatprep.subr.bf16.mxu0 (!%p371_p2), %v2471_v1  ;;  %v2058_v49 = vld [vmem:[%s2896_s6] ss:$0 sm:$0xff] (!%p371_p2)  ;;  %v2069_v3 = vld [vmem:[%s2892_s2 + $0x1] ss:$0 sm:$0xff] (!%p371_p2) }
   0xb   : > { %2236 = vmatpush3.bf16.msra.mxu1 (!%p371_p2), %v2404_v2  ;;  %v2410_v2 = vld [vmem:[%s2893_s3 + $0x18] sm:$0xff] (!%p371_p2)  }
   0xc   : > { %2249 = vmatprep.subr.bf16.mxu1 (!%p371_p2), %v2471_v1 }
   0xd   : > { %s2904_s22 = smov (!%p415_p3, %s2040_s22), 1  ;;  %2228 = vmatpush3.bf16.msra.mxu0 %v2406_v4 }
   0xe   : > { %s2163_s13 = sshll.u32 %s2904_s22, 4  ;;  %2241 = vmatprep.subr.bf16.mxu0 %v2471_v1  ;;  %s422_s29 = scalar_lea.vmem %s2899_s9, %s2904_s22 }
   0xf   : > { %s419_s16 = scalar_lea.vmem %s2890_s0, %s2163_s13  ;;  %v2619_v27 = vld [vmem:[%s422_s29] ss:$0 sm:$0xff]  ;;  %s427_s27 = scalar_lea.vmem %s2902_s12, %s2163_s13 }
  0x10   : > { %v2575_v5 = vld [vmem:[%s419_s16] sm:$0xff]  ;;  %v2577_v6 = vld [vmem:[%s419_s16 + $0x8] sm:$0x3] }
  0x11   : > { %v2581_v7 = vpack.c.bf16 %v2577_v6, %v2575_v5 }
  0x13   : > { %2238 = vmatmul.mubr.msk.bf16.vlgmr.msra.gmra.mrb[0].mxu1 %vm462_vm1, %v2581_v7  ;;  %2230 = vmatmul.mubr.msk.bf16.vlgmr.msra.gmra.mrb[0].mxu0 %vm462_vm1, %v2581_v7 }
  0x14   : > { %2251 = vmatprep.mubr.msk.bf16.mxu1 %vm2472_vm0, %v2471_v1  ;;  %2245 = vmatprep.mubr.msk.bf16.mxu0 %vm2472_vm0, %v2471_v1 }
  0x15   : > { %2242 = vmatpush3.bf16.msra.mxu0 %v2407_v25 }
  0x16   : > { %2243 = vmatprep.subr.bf16.mxu0 %v2471_v1 }
  0x19   : > { %2244 = vmatpush3.bf16.msra.mxu0 %v2408_v26 }
  0x1a   : > { %2255 = vmatprep.subr.bf16.mxu0 %v2471_v1 }
  0x1c   : > { %2246 = vmatmul.mubr.msk.bf16.vlgmr.msra.gmra.mrb[4].mxu0 %vm462_vm1, %v2581_v7 }
  0x1d   : > { %2257 = vmatprep.mubr.msk.bf16.mxu0 %vm2472_vm0, %v2471_v1 }
  0xe6   : > { %v564_v10 = vpop.f32.mrb[0].mxu1  ;;  %v500_v11 = vpop.f32.mrb[0].mxu0 }
  0xe7   : > { %v2239_v12 = vpop.f32.mrb[1].mxu1  ;;  %v501_v13 = vadd.f32 %v2050_v8, %v500_v11  ;;  %v2231_v14 = vpop.f32.mrb[1].mxu0  ;;  %v565_v17 = vadd.f32 %v2054_v9, %v564_v10 }
  0xe8   : > { %v567_v15 = vpop.f32.mrb[2].mxu1  ;;  %v503_v16 = vpop.f32.mrb[2].mxu0 }
  0xe9   : > { %v568_v18 = vadd.f32 %v2054_v9, %v567_v15  ;;  %v2240_v19 = vpop.f32.mrb[3].mxu1  ;;  %v504_v20 = vadd.f32 %v2050_v8, %v503_v16  ;;  %v2232_v21 = vpop.f32.mrb[3].mxu0 }
  0xea   : > { %v2078_v19 = vld [vmem:[%s2894_s4 + $0x1] ss:$0 sm:$0xff] }
  0xeb   : > { %v636_v22 = vpack.c.bf16 %v568_v18, %v565_v17  ;;  %v635_v23 = vpack.c.bf16 %v504_v20, %v501_v13 }
  0xed   : > { %v642_v24 = vsel %vm637_vm2, %v636_v22, 0 }
  0xee   : > { %2250 = vmatpush3.bf16.xpose.msra.mxu1 %v642_v24 }
  0xef   : > { %2261 = vmatprep.subr.bf16.mxu1 %v2471_v1  ;;  %v628_v46 = vpop.f32.mrb[4].mxu0 }
  0xf0   : > { %v2247_v47 = vpop.f32.mrb[5].mxu0  ;;  %v629_v51 = vadd.f32 %v2058_v49, %v628_v46 }
  0xf1   : > { %v631_v48 = vpop.f32.mrb[6].mxu0 }
  0xf2   : > { %v2248_v50 = vpop.f32.mrb[7].mxu0  ;;  %v632_v52 = vadd.f32 %v2058_v49, %v631_v48 }
  0xf4   : > { %v710_v53 = vpack.c.bf16 %v632_v52, %v629_v51  ;;  %v2087_v51 = vld [vmem:[%s2896_s6 + $0x1] ss:$0 sm:$0xff] }
  0xf5   : > { %2252 = vmatmul.mubr.msk.bf16.vlgmr.msra.gmra.mrb[4].mxu1 %vm637_vm2, %v635_v23 }
  0xf6   : > { %2265 = vmatprep.mubr.msk.bf16.mxu1 %vm2472_vm0, %v2471_v1  ;;  %v716_v54 = vsel %vm714_vm5, %v710_v53, 0  ;;  %2262 = vmatpush3.bf16.msra.mxu1 %v2411_v55 }
  0xf7   : > { %2256 = vmatpush3.bf16.msra.mxu0 %v716_v54  ;;  %2263 = vmatprep.subr.bf16.mxu1 %v2471_v1 }
  0xf8   : > { %2269 = vmatprep.subr.bf16.mxu0 %v2471_v1 }
  0xfa   : > { %2264 = vmatpush3.bf16.msra.mxu1 %v2412_v56 }
  0xfb   : > { %2277 = vmatprep.subr.bf16.mxu1 %v2471_v1 }
  0xfd   : > { %2266 = vmatmul.mubr.msk.bf16.vlgmr.msra.gmra.mrb[8].mxu1 %vm462_vm1, %v2581_v7 }
  0xfe   : > { %2281 = vmatprep.mubr.msk.bf16.mxu1 %vm2472_vm0, %v2471_v1 }
 0x1c8   : > { %v678_v28 = vpop.f32.mrb[4].mxu1 }
 0x1c9   : > { %v679_v29 = vadd.f32 %v2619_v27, %v678_v28  ;;  %v2253_v30 = vpop.f32.mrb[5].mxu1 }
 0x1ca   : > { %v681_v31 = vpop.f32.mrb[6].mxu1  ;;  %v2414_v30 = vld [vmem:[%s2895_s5 + $0x18] sm:$0xff]  }
 0x1cb   : > { %v682_v32 = vadd.f32 %v2619_v27, %v681_v31  ;;  %v2254_v33 = vpop.f32.mrb[7].mxu1  ;;  %v686_v34 = vsel %vm685_vm3, %v679_v29, -inf }
 0x1cc   : > { %687 = vmax.xlane.f32.xlu0 %v686_v34 }
 0x1cd   : > { %v690_v35 = vsel %vm689_vm4, %v682_v32, -inf }
 0x1d0   : > { %691 = vmax.xlane.f32.xlu0 %v690_v35  ;;  %v820_v4 = vpop.f32.mrb[8].mxu1 }
 0x1d1   : > { %v821_v8 = vadd.f32 %v2069_v3, %v820_v4  ;;  %v2267_v9 = vpop.f32.mrb[9].mxu1 }
 0x1d2   : > { %v823_v10 = vpop.f32.mrb[10].mxu1  ;;  %v2415_v9 = vld [vmem:[%s2893_s3 + $0x20] sm:$0xff]  }
 0x1d3   : > { %v824_v11 = vadd.f32 %v2069_v3, %v823_v10  ;;  %v2268_v12 = vpop.f32.mrb[11].mxu1  ;;  %v2416_v10 = vld [vmem:[%s2893_s3 + $0x28] sm:$0xff]  }
 0x1d5   : > { %v959_v13 = vpack.c.bf16 %v824_v11, %v821_v8 }
 0x259   : > { %v688_v36 = vpop.xlane.xlu0 %687 }
 0x25a   : > { %v693_v37 = vsub.f32 %v679_v29, %v688_v36  ;;  %v2413_v29 = vld [vmem:[%s2895_s5 + $0x10] sm:$0xff]  }
 0x25b   : > { %2278 = vmatpush3.bf16.msra.mxu1 %v2413_v29 }
 0x25c   : > { %v695_v38 = vmul.f32 1.442695, %v693_v37  ;;  %2279 = vmatprep.subr.bf16.mxu1 %v2471_v1 }
 0x25d   : > { %v692_v39 = vpop.xlane.xlu0 %691 }
 0x25e   : > { %2427 = vpow2.f32 %v695_v38  ;;  %v694_v40 = vsub.f32 %v682_v32, %v692_v39 }
 0x25f   : > { %2280 = vmatpush3.bf16.msra.mxu1 %v2414_v30 }
 0x260   : > { %v697_v41 = vmul.f32 1.442695, %v694_v40  ;;  %2291 = vmatprep.subr.bf16.mxu1 %v2471_v1 }
 0x262   : > { %2429 = vpow2.f32 %v697_v41  ;;  %2282 = vmatmul.mubr.msk.bf16.vlgmr.msra.gmra.mrb[12].mxu1 %vm462_vm1, %v2581_v7 }
 0x263   : > { %2293 = vmatprep.mubr.msk.bf16.mxu1 %vm2472_vm0, %v2471_v1 }
 0x268   : > { %v2428_v42 = vpop.eup %2427 }
 0x269   : > { %v699_v43 = vsel %vm685_vm3, %v2428_v42, 0.0 }
 0x26a   : > { %700 = vadd.xlane.f32.xlu1 %v699_v43 }
 0x26c   : > { %v2430_v44 = vpop.eup %2429 }
 0x26d   : > { %v702_v45 = vsel %vm689_vm4, %v2430_v44, 0.0 }
 0x26e   : > { %703 = vadd.xlane.f32.xlu1 %v702_v45 }
 0x2f7   : > { %v701_v57 = vpop.xlane.xlu1 %700 }
 0x2f8   : > { %2431 = vrcp.f32 %v701_v57 }
 0x2fb   : > { %v704_v58 = vpop.xlane.xlu1 %703 }
 0x2fc   : > { %2433 = vrcp.f32 %v704_v58  ;;  %v2093_v58 = vld [vmem:[%s2897_s7 + $0x4] sm:$0xf] }
 0x302   : > { %v2432_v59 = vpop.eup %2431 }
 0x303   : > { %v707_v61 = vmul.f32 %v2432_v59, %v2428_v42  ;;  %v1087_v59 = vsel %vm1085_vm6, %v2093_v58, 0 }
 0x306   : > { %v2434_v60 = vpop.eup %2433 }
 0x307   : > { %v708_v62 = vmul.f32 %v2434_v60, %v2430_v44 }
 0x309   : > { %v709_v0 = vpack.c.bf16 %v708_v62, %v707_v61 }
 0x30b   : > { %2258 = vmatmul.mubr.msk.bf16.vlgmr.msra.gmra.mrb[8].mxu0 %vm685_vm3, %v709_v0  ;;  %v760_v0 = vld [vmem:[%s2897_s7] sm:$0xf] }
 0x30c   : > { %2270 = vmatpush3.bf16.msra.mxu0 %v2409_v63  ;;  %2273 = vmatprep.mubr.msk.bf16.mxu0 %vm2472_vm0, %v2471_v1  ;;  %v1134_v8 = vsel %vm1085_vm6, %v760_v0, 0 }
 0x30d   : > { %2271 = vmatprep.subr.bf16.mxu0 %v2471_v1 }
 0x310   : > { %2272 = vmatpush3.bf16.msra.mxu0 %v2410_v2 }
 0x311   : > { %2285 = vmatprep.subr.bf16.mxu0 %v2471_v1 }
 0x313   : > { %2274 = vmatmul.mubr.msk.bf16.vlgmr.msra.gmra.mrb[12].mxu0 %vm462_vm1, %v2581_v7 }
 0x314   : > { %2287 = vmatprep.mubr.msk.bf16.mxu0 %vm2472_vm0, %v2471_v1 }
 0x335   : > { %v952_v39 = vpop.f32.mrb[12].mxu1 }
 0x336   : > { %v2283_v40 = vpop.f32.mrb[13].mxu1  ;;  %v953_v52 = vadd.f32 %v2087_v51, %v952_v39 }
 0x337   : > { %v955_v53 = vpop.f32.mrb[14].mxu1 }
 0x338   : > { %v2284_v54 = vpop.f32.mrb[15].mxu1  ;;  %v956_v55 = vadd.f32 %v2087_v51, %v955_v53 }
 0x33a   : > { %v1031_v56 = vpack.c.bf16 %v956_v55, %v953_v52 }
 0x33c   : > { %v1036_v57 = vsel %vm714_vm5, %v1031_v56, 0 }
 0x33d   : > { %2292 = vmatpush3.bf16.msra.mxu1 %v1036_v57 }
 0x33e   : > { %2303 = vmatprep.subr.bf16.mxu1 %v2471_v1 }
 0x3de   : > { %v2662_v14 = vpop.f32.mrb[8].mxu0 }
 0x3df   : > { %v2259_v15 = vpop.f32.mrb[9].mxu0 }
 0x3e0   : > { %v2664_v16 = vpop.f32.mrb[10].mxu0 }
 0x3e1   : > { %v759_v17 = vpack.c.bf16 %v2664_v16, %v2662_v14  ;;  %v2260_v18 = vpop.f32.mrb[11].mxu0  ;;  %v2417_v14 = vld [vmem:[%s2891_s1 + $0x20] sm:$0xff]  }
 0x3e6   : > { %v886_v20 = vpop.f32.mrb[12].mxu0 }
 0x3e7   : > { %v2275_v21 = vpop.f32.mrb[13].mxu0  ;;  %v887_v23 = vadd.f32 %v2078_v19, %v886_v20 }
 0x3e8   : > { %v889_v22 = vpop.f32.mrb[14].mxu0 }
 0x3e9   : > { %v890_v24 = vadd.f32 %v2078_v19, %v889_v22  ;;  %v2276_v25 = vpop.f32.mrb[15].mxu0  ;;  %v2110_v22 = vld [vmem:[%s2894_s4 + $0x2] ss:$0 sm:$0xff] }
 0x3eb   : > { %v960_v26 = vpack.c.bf16 %v890_v24, %v887_v23 }
 0x3ed   : > { %v965_v28 = vsel %vm637_vm2, %v960_v26, 0 }
 0x3ee   : > { %2286 = vmatpush3.bf16.xpose.msra.mxu0 %v965_v28 }
 0x3ef   : > { %2297 = vmatprep.subr.bf16.mxu0 %v2471_v1 }
 0x3f5   : > { %2288 = vmatmul.mubr.msk.bf16.vlgmr.msra.gmra.mrb[16].mxu0 %vm637_vm2, %v959_v13 }
 0x3f6   : > { %2299 = vmatprep.mubr.msk.bf16.mxu0 %vm2472_vm0, %v2471_v1  ;;  %2298 = vmatpush3.bf16.msra.mxu0 %v1087_v59 }
 0x3f7   : > { %2309 = vmatprep.subr.bf16.mxu0 %v2471_v1 }
 0x4c8   : > { %v1001_v31 = vpop.f32.mrb[16].mxu0 }
 0x4c9   : > { %v1002_v32 = vadd.f32 %v2619_v27, %v1001_v31  ;;  %v2289_v33 = vpop.f32.mrb[17].mxu0 }
 0x4ca   : > { %v1004_v34 = vpop.f32.mrb[18].mxu0 }
 0x4cb   : > { %v1005_v35 = vadd.f32 %v2619_v27, %v1004_v34  ;;  %v2290_v36 = vpop.f32.mrb[19].mxu0  ;;  %v1008_v37 = vsel %vm685_vm3, %v1002_v32, -inf }
 0x4cc   : > { %1009 = vmax.xlane.f32.xlu0 %v1008_v37 }
 0x4cd   : > { %v1011_v38 = vsel %vm689_vm4, %v1005_v35, -inf }
 0x4ce   : > { %1012 = vmax.xlane.f32.xlu1 %v1011_v38  ;;  %v2101_v38 = vld [vmem:[%s2892_s2 + $0x2] ss:$0 sm:$0xff] }
 0x559   : > { %v1010_v41 = vpop.xlane.xlu0 %1009 }
 0x55a   : > { %v1014_v42 = vsub.f32 %v1002_v32, %v1010_v41 }
 0x55b   : > { %v1013_v43 = vpop.xlane.xlu1 %1012 }
 0x55c   : > { %v1016_v44 = vmul.f32 1.442695, %v1014_v42  ;;  %v1015_v45 = vsub.f32 %v1005_v35, %v1013_v43 }
 0x55e   : > { %2435 = vpow2.f32 %v1016_v44  ;;  %v1018_v46 = vmul.f32 1.442695, %v1015_v45 }
 0x560   : > { %2437 = vpow2.f32 %v1018_v46  ;;  %v2419_v46 = vld [vmem:[%s2895_s5 + $0x20] sm:$0xff]  }
 0x568   : > { %v2436_v47 = vpop.eup %2435 }
 0x569   : > { %v1020_v48 = vsel %vm685_vm3, %v2436_v47, 0.0 }
 0x56a   : > { %v2438_v49 = vpop.eup %2437  ;;  %1021 = vadd.xlane.f32.xlu0 %v1020_v48 }
 0x56b   : > { %v1023_v50 = vsel %vm689_vm4, %v2438_v49, 0.0 }
 0x56c   : > { %1024 = vadd.xlane.f32.xlu1 %v1023_v50 }
 0x5f7   : > { %v1022_v60 = vpop.xlane.xlu0 %1021 }
 0x5f8   : > { %2439 = vrcp.f32 %v1022_v60 }
 0x5f9   : > { %v1025_v61 = vpop.xlane.xlu1 %1024 }
 0x5fa   : > { %2441 = vrcp.f32 %v1025_v61 }
 0x602   : > { %v2440_v62 = vpop.eup %2439 }
 0x603   : > { %v1028_v2 = vmul.f32 %v2440_v62, %v2436_v47  ;;  %v2420_v47 = vld [vmem:[%s2895_s5 + $0x28] sm:$0xff]  }
 0x604   : > { %v2442_v63 = vpop.eup %2441 }
 0x605   : > { %v1029_v3 = vmul.f32 %v2442_v63, %v2438_v49 }
 0x607   : > { %v1030_v4 = vpack.c.bf16 %v1029_v3, %v1028_v2 }
 0x609   : > { %2294 = vmatmul.mubr.msk.bf16.vlgmr.msra.gmra.mrb[16].mxu1 %vm685_vm3, %v1030_v4 }
 0x60a   : > { %2304 = vmatpush3.bf16.msra.mxu1 %v1134_v8  ;;  %2305 = vmatprep.mubr.msk.bf16.mxu1 %vm2472_vm0, %v2471_v1 }
 0x60b   : > { %2317 = vmatprep.subr.bf16.mxu1 %v2471_v1 }
 0x611   : > { %2306 = vmatmul.mubr.msk.bf16.vlgmr.msra.gmra.mrb[20].mxu1 %vm637_vm2, %v759_v17  ;;  %v2418_v17 = vld [vmem:[%s2891_s1 + $0x28] sm:$0xff]  }
 0x612   : > { %2318 = vmatpush3.bf16.msra.mxu1 %v2415_v9  ;;  %2321 = vmatprep.mubr.msk.bf16.mxu1 %vm2472_vm0, %v2471_v1  ;;  %v2119_v9 = vld [vmem:[%s2896_s6 + $0x2] ss:$0 sm:$0xff] }
 0x613   : > { %2319 = vmatprep.subr.bf16.mxu1 %v2471_v1 }
 0x616   : > { %2320 = vmatpush3.bf16.msra.mxu1 %v2416_v10 }
 0x617   : > { %2333 = vmatprep.subr.bf16.mxu1 %v2471_v1 }
 0x619   : > { %2322 = vmatmul.mubr.msk.bf16.vlgmr.msra.gmra.mrb[24].mxu1 %vm462_vm1, %v2581_v7 }
 0x61a   : > { %2335 = vmatprep.mubr.msk.bf16.mxu1 %vm2472_vm0, %v2471_v1 }
 0x6dc   : > { %v1072_v11 = vpop.f32.mrb[16].mxu1 }
 0x6dd   : > { %v2295_v12 = vpop.f32.mrb[17].mxu1 }
 0x6de   : > { %v1075_v13 = vpop.f32.mrb[18].mxu1 }
 0x6df   : > { %v1079_v15 = vpack.c.bf16 %v1075_v13, %v1072_v11  ;;  %v2296_v16 = vpop.f32.mrb[19].mxu1 }
 0x6e1   : > { %2300 = vmatmul.mubr.msk.bf16.vlgmr.msra.gmra.mrb[20].mxu0 %vm637_vm2, %v1079_v15  ;;  %v2125_v15 = vld [vmem:[%s2897_s7 + $0x8] sm:$0xf] }
 0x6e2   : > { %2310 = vmatpush3.bf16.msra.mxu0 %v2417_v14  ;;  %2313 = vmatprep.mubr.msk.bf16.mxu0 %vm2472_vm0, %v2471_v1  ;;  %v1502_v16 = vsel %vm1085_vm6, %v2125_v15, 0 }
 0x6e3   : > { %2311 = vmatprep.subr.bf16.mxu0 %v2471_v1 }
 0x6e4   : > { %v1170_v18 = vpop.f32.mrb[20].mxu1 }
 0x6e5   : > { %v2307_v19 = vpop.f32.mrb[21].mxu1 }
 0x6e6   : > { %v1173_v20 = vpop.f32.mrb[22].mxu1  ;;  %2312 = vmatpush3.bf16.msra.mxu0 %v2418_v17 }
 0x6e7   : > { %v2308_v21 = vpop.f32.mrb[23].mxu1  ;;  %2325 = vmatprep.subr.bf16.mxu0 %v2471_v1 }
 0x6e9   : > { %2314 = vmatmul.mubr.msk.bf16.vlgmr.msra.gmra.mrb[24].mxu0 %vm462_vm1, %v2581_v7 }
 0x6ea   : > { %2329 = vmatprep.mubr.msk.bf16.mxu0 %vm2472_vm0, %v2471_v1  ;;  %2326 = vmatpush3.bf16.msra.mxu0 %v2419_v46 }
 0x6eb   : > { %2327 = vmatprep.subr.bf16.mxu0 %v2471_v1 }
 0x6ec   : > { %v1302_v23 = vpop.f32.mrb[24].mxu1 }
 0x6ed   : > { %v1303_v24 = vadd.f32 %v2110_v22, %v1302_v23  ;;  %v2323_v25 = vpop.f32.mrb[25].mxu1 }
 0x6ee   : > { %v1305_v26 = vpop.f32.mrb[26].mxu1  ;;  %2328 = vmatpush3.bf16.msra.mxu0 %v2420_v47  ;;  %v2424_v25 = vld [vmem:[%s2891_s1 + $0x38] sm:$0xff]  }
 0x6ef   : > { %v1306_v28 = vadd.f32 %v2110_v22, %v1305_v26  ;;  %v2324_v29 = vpop.f32.mrb[27].mxu1  ;;  %2339 = vmatprep.subr.bf16.mxu0 %v2471_v1 }
 0x6f1   : > { %v1376_v30 = vpack.c.bf16 %v1306_v28, %v1303_v24  ;;  %2330 = vmatmul.mubr.msk.bf16.vlgmr.msra.gmra.mrb[28].mxu0 %vm462_vm1, %v2581_v7  ;;  %v2423_v24 = vld [vmem:[%s2891_s1 + $0x30] sm:$0xff]  }
 0x6f2   : > { %2341 = vmatprep.mubr.msk.bf16.mxu0 %vm2472_vm0, %v2471_v1 }
 0x6f3   : > { %v1381_v31 = vsel %vm637_vm2, %v1376_v30, 0  ;;  %v2421_v30 = vld [vmem:[%s2893_s3 + $0x30] sm:$0xff]  }
 0x6f4   : > { %2334 = vmatpush3.bf16.xpose.msra.mxu1 %v1381_v31 }
 0x6f5   : > { %2345 = vmatprep.subr.bf16.mxu1 %v2471_v1 }
 0x7b4   : > { %v1123_v32 = vpop.f32.mrb[20].mxu0 }
 0x7b5   : > { %v2750_v33 = vadd.f32 %v1170_v18, %v1123_v32  ;;  %v2301_v34 = vpop.f32.mrb[21].mxu0 }
 0x7b6   : > { %v1126_v35 = vpop.f32.mrb[22].mxu0  ;;  %v2422_v34 = vld [vmem:[%s2893_s3 + $0x38] sm:$0xff]  }
 0x7b7   : > { %v2752_v36 = vadd.f32 %v1173_v20, %v1126_v35  ;;  %v2302_v37 = vpop.f32.mrb[23].mxu0  ;;  %v2132_v35 = vld [vmem:[%s2892_s2 + $0x3] ss:$0 sm:$0xff] }
 0x7bc   : > { %v1236_v39 = vpop.f32.mrb[24].mxu0 }
 0x7bd   : > { %v2315_v40 = vpop.f32.mrb[25].mxu0  ;;  %v1237_v42 = vadd.f32 %v2101_v38, %v1236_v39 }
 0x7be   : > { %v1239_v41 = vpop.f32.mrb[26].mxu0 }
 0x7bf   : > { %v1240_v43 = vadd.f32 %v2101_v38, %v1239_v41  ;;  %v2316_v44 = vpop.f32.mrb[27].mxu0 }
 0x7c1   : > { %v1375_v45 = vpack.c.bf16 %v1240_v43, %v1237_v42 }
 0x7c3   : > { %2336 = vmatmul.mubr.msk.bf16.vlgmr.msra.gmra.mrb[28].mxu1 %vm637_vm2, %v1375_v45 }
 0x7c4   : > { %2347 = vmatprep.mubr.msk.bf16.mxu1 %vm2472_vm0, %v2471_v1  ;;  %v1368_v3 = vpop.f32.mrb[28].mxu0  ;;  %2346 = vmatpush3.bf16.msra.mxu1 %v1502_v16 }
 0x7c5   : > { %v2331_v4 = vpop.f32.mrb[29].mxu0  ;;  %v1369_v11 = vadd.f32 %v2119_v9, %v1368_v3  ;;  %2359 = vmatprep.subr.bf16.mxu1 %v2471_v1 }
 0x7c6   : > { %v1371_v8 = vpop.f32.mrb[30].mxu0 }
 0x7c7   : > { %v2332_v10 = vpop.f32.mrb[31].mxu0  ;;  %v1372_v12 = vadd.f32 %v2119_v9, %v1371_v8 }
 0x7c9   : > { %v1447_v13 = vpack.c.bf16 %v1372_v12, %v1369_v11 }
 0x7cb   : > { %v1452_v14 = vsel %vm714_vm5, %v1447_v13, 0 }
 0x7cc   : > { %2340 = vmatpush3.bf16.msra.mxu0 %v1452_v14 }
 0x7cd   : > { %2351 = vmatprep.subr.bf16.mxu0 %v2471_v1 }
 0x896   : > { %v1417_v48 = vpop.f32.mrb[28].mxu1 }
 0x897   : > { %v1418_v49 = vadd.f32 %v2619_v27, %v1417_v48  ;;  %v2337_v50 = vpop.f32.mrb[29].mxu1 }
 0x898   : > { %v1420_v51 = vpop.f32.mrb[30].mxu1  ;;  %v2141_v50 = vld [vmem:[%s2894_s4 + $0x3] ss:$0 sm:$0xff] }
 0x899   : > { %v1421_v52 = vadd.f32 %v2619_v27, %v1420_v51  ;;  %v2338_v53 = vpop.f32.mrb[31].mxu1  ;;  %v1424_v54 = vsel %vm685_vm3, %v1418_v49, -inf }
 0x89a   : > { %1425 = vmax.xlane.f32.xlu0 %v1424_v54 }
 0x89b   : > { %v1427_v55 = vsel %vm689_vm4, %v1421_v52, -inf }
 0x89c   : > { %1428 = vmax.xlane.f32.xlu1 %v1427_v55 }
 0x927   : > { %v1426_v56 = vpop.xlane.xlu0 %1425 }
 0x928   : > { %v1430_v57 = vsub.f32 %v1418_v49, %v1426_v56 }
 0x929   : > { %v1429_v58 = vpop.xlane.xlu1 %1428 }
 0x92a   : > { %v1432_v59 = vmul.f32 1.442695, %v1430_v57  ;;  %v1431_v60 = vsub.f32 %v1421_v52, %v1429_v58  ;;  %v2426_v58 = vld [vmem:[%s2895_s5 + $0x38] sm:$0xff]  }
 0x92c   : > { %2443 = vpow2.f32 %v1432_v59  ;;  %v1434_v61 = vmul.f32 1.442695, %v1431_v60 }
 0x92e   : > { %2445 = vpow2.f32 %v1434_v61 }
 0x936   : > { %v2444_v62 = vpop.eup %2443 }
 0x937   : > { %v1436_v63 = vsel %vm685_vm3, %v2444_v62, 0.0 }
 0x938   : > { %v2446_v0 = vpop.eup %2445  ;;  %1437 = vadd.xlane.f32.xlu0 %v1436_v63 }
 0x939   : > { %v1439_v2 = vsel %vm689_vm4, %v2446_v0, 0.0 }
 0x93a   : > { %1440 = vadd.xlane.f32.xlu1 %v1439_v2 }
 0x9c5   : > { %v1438_v17 = vpop.xlane.xlu0 %1437 }
 0x9c6   : > { %2447 = vrcp.f32 %v1438_v17  ;;  %v2150_v17 = vld [vmem:[%s2896_s6 + $0x3] ss:$0 sm:$0xff] }
 0x9c7   : > { %v1441_v18 = vpop.xlane.xlu1 %1440 }
 0x9c8   : > { %2449 = vrcp.f32 %v1441_v18 }
 0x9d0   : > { %v2448_v19 = vpop.eup %2447 }
 0x9d1   : > { %v1444_v21 = vmul.f32 %v2448_v19, %v2444_v62 }
 0x9d2   : > { %v2450_v20 = vpop.eup %2449 }
 0x9d3   : > { %v1445_v22 = vmul.f32 %v2450_v20, %v2446_v0 }
 0x9d5   : > { %v1446_v23 = vpack.c.bf16 %v1445_v22, %v1444_v21 }
 0x9d7   : > { %2342 = vmatmul.mubr.msk.bf16.vlgmr.msra.gmra.mrb[32].mxu0 %vm685_vm3, %v1446_v23  ;;  %v2156_v23 = vld [vmem:[%s2897_s7 + $0xc] sm:$0xf] }
 0x9d8   : > { %2355 = vmatprep.mubr.msk.bf16.mxu0 %vm2472_vm0, %v2471_v1  ;;  %2352 = vmatpush3.bf16.msra.mxu0 %v2423_v24  ;;  %v1872_v24 = vsel %vm1085_vm6, %v2156_v23, 0 }
 0x9d9   : > { %2353 = vmatprep.subr.bf16.mxu0 %v2471_v1 }
 0x9dc   : > { %2354 = vmatpush3.bf16.msra.mxu0 %v2424_v25 }
 0x9dd   : > { %2367 = vmatprep.subr.bf16.mxu0 %v2471_v1 }
 0x9df   : > { %2356 = vmatmul.mubr.msk.bf16.vlgmr.msra.gmra.mrb[36].mxu0 %vm462_vm1, %v2581_v7 }
 0x9e0   : > { %2371 = vmatprep.mubr.msk.bf16.mxu0 %vm2472_vm0, %v2471_v1 }
 0xaaa   : > { %v1488_v26 = vpop.f32.mrb[32].mxu0 }
 0xaab   : > { %v2343_v28 = vpop.f32.mrb[33].mxu0 }
 0xaac   : > { %v1491_v29 = vpop.f32.mrb[34].mxu0 }
 0xaad   : > { %v1495_v31 = vpack.c.bf16 %v1491_v29, %v1488_v26  ;;  %v2344_v32 = vpop.f32.mrb[35].mxu0 }
 0xaaf   : > { %2348 = vmatmul.mubr.msk.bf16.vlgmr.msra.gmra.mrb[32].mxu1 %vm637_vm2, %v1495_v31 }
 0xab0   : > { %2360 = vmatpush3.bf16.msra.mxu1 %v2421_v30  ;;  %2363 = vmatprep.mubr.msk.bf16.mxu1 %vm2472_vm0, %v2471_v1 }
 0xab1   : > { %2361 = vmatprep.subr.bf16.mxu1 %v2471_v1 }
 0xab2   : > { %v1606_v37 = vpop.f32.mrb[36].mxu0 }
 0xab3   : > { %v1607_v38 = vadd.f32 %v2132_v35, %v1606_v37  ;;  %v2357_v39 = vpop.f32.mrb[37].mxu0 }
 0xab4   : > { %2362 = vmatpush3.bf16.msra.mxu1 %v2422_v34  ;;  %v1609_v40 = vpop.f32.mrb[38].mxu0 }
 0xab5   : > { %2375 = vmatprep.subr.bf16.mxu1 %v2471_v1  ;;  %v1610_v41 = vadd.f32 %v2132_v35, %v1609_v40  ;;  %v2358_v42 = vpop.f32.mrb[39].mxu0 }
 0xab7   : > { %2364 = vmatmul.mubr.msk.bf16.vlgmr.msra.gmra.mrb[36].mxu1 %vm462_vm1, %v2581_v7  ;;  %v1745_v43 = vpack.c.bf16 %v1610_v41, %v1607_v38  ;;  %v2158_v41 = vld [vmem:[%s2898_s8] ss:$0 sm:$0xff] }
 0xab8   : > { %2377 = vmatprep.mubr.msk.bf16.mxu1 %vm2472_vm0, %v2471_v1 }
 0xb82   : > { %v1538_v44 = vpop.f32.mrb[32].mxu1 }
 0xb83   : > { %v2822_v45 = vadd.f32 %v1538_v44, %v2750_v33  ;;  %v2349_v46 = vpop.f32.mrb[33].mxu1 }
 0xb84   : > { %v1541_v47 = vpop.f32.mrb[34].mxu1 }
 0xb85   : > { %v2825_v48 = vadd.f32 %v1541_v47, %v2752_v36  ;;  %v2350_v49 = vpop.f32.mrb[35].mxu1  ;;  %v2425_v36 = vld [vmem:[%s2895_s5 + $0x30] sm:$0xff]  }
 0xb86   : > { %2368 = vmatpush3.bf16.msra.mxu0 %v2425_v36 }
 0xb87   : > { %2369 = vmatprep.subr.bf16.mxu0 %v2471_v1 }
 0xb8a   : > { %v1672_v51 = vpop.f32.mrb[36].mxu1  ;;  %2370 = vmatpush3.bf16.msra.mxu0 %v2426_v58 }
 0xb8b   : > { %v2365_v52 = vpop.f32.mrb[37].mxu1  ;;  %v1673_v54 = vadd.f32 %v2141_v50, %v1672_v51  ;;  %2381 = vmatprep.subr.bf16.mxu0 %v2471_v1 }
 0xb8c   : > { %v1675_v53 = vpop.f32.mrb[38].mxu1 }
 0xb8d   : > { %v1676_v55 = vadd.f32 %v2141_v50, %v1675_v53  ;;  %v2366_v56 = vpop.f32.mrb[39].mxu1  ;;  %2372 = vmatmul.mubr.msk.bf16.vlgmr.msra.gmra.mrb[40].mxu0 %vm462_vm1, %v2581_v7 }
 0xb8e   : > { %2383 = vmatprep.mubr.msk.bf16.mxu0 %vm2472_vm0, %v2471_v1 }
 0xb8f   : > { %v1746_v57 = vpack.c.bf16 %v1676_v55, %v1673_v54 }
 0xb91   : > { %v1751_v33 = vsel %vm637_vm2, %v1746_v57, 0 }
 0xb92   : > { %2376 = vmatpush3.bf16.xpose.msra.mxu1 %v1751_v33 }
 0xb93   : > { %2387 = vmatprep.subr.bf16.mxu1 %v2471_v1 }
 0xb99   : > { %2378 = vmatmul.mubr.msk.bf16.vlgmr.msra.gmra.mrb[40].mxu1 %vm637_vm2, %v1745_v43 }
 0xb9a   : > { %2389 = vmatprep.mubr.msk.bf16.mxu1 %vm2472_vm0, %v2471_v1  ;;  %2388 = vmatpush3.bf16.msra.mxu1 %v1872_v24 }
 0xc60   : > { %v1738_v14 = vpop.f32.mrb[40].mxu0 }
 0xc61   : > { %v2373_v15 = vpop.f32.mrb[41].mxu0  ;;  %v1739_v19 = vadd.f32 %v2150_v17, %v1738_v14 }
 0xc62   : > { %v1741_v16 = vpop.f32.mrb[42].mxu0 }
 0xc63   : > { %v2374_v18 = vpop.f32.mrb[43].mxu0  ;;  %v1742_v20 = vadd.f32 %v2150_v17, %v1741_v16 }
 0xc65   : > { %v1817_v21 = vpack.c.bf16 %v1742_v20, %v1739_v19 }
 0xc67   : > { %v1822_v22 = vsel %vm714_vm5, %v1817_v21, 0 }
 0xc68   : > { %2382 = vmatpush3.bf16.msra.mxu0 %v1822_v22 }
 0xc6c   : > { %v1787_v59 = vpop.f32.mrb[40].mxu1 }
 0xc6d   : > { %v1788_v60 = vadd.f32 %v2619_v27, %v1787_v59  ;;  %v2379_v61 = vpop.f32.mrb[41].mxu1 }
 0xc6e   : > { %v1790_v62 = vpop.f32.mrb[42].mxu1 }
 0xc6f   : > { %v1791_v63 = vadd.f32 %v2619_v27, %v1790_v62  ;;  %v2380_v0 = vpop.f32.mrb[43].mxu1  ;;  %v1794_v2 = vsel %vm685_vm3, %v1788_v60, -inf }
 0xc70   : > { %1795 = vmax.xlane.f32.xlu0 %v1794_v2 }
 0xc71   : > { %v1797_v3 = vsel %vm689_vm4, %v1791_v63, -inf }
 0xc72   : > { %1798 = vmax.xlane.f32.xlu1 %v1797_v3  ;;  %v2159_v3 = vld [vmem:[%s2900_s10] ss:$0 sm:$0xff] }
 0xcfd   : > { %v1796_v4 = vpop.xlane.xlu0 %1795 }
 0xcfe   : > { %v1800_v8 = vsub.f32 %v1788_v60, %v1796_v4 }
 0xcff   : > { %v1799_v7 = vpop.xlane.xlu1 %1798 }
 0xd00   : > { %v1802_v9 = vmul.f32 1.442695, %v1800_v8  ;;  %v1801_v10 = vsub.f32 %v1791_v63, %v1799_v7  ;;  %v2160_v7 = vld [vmem:[%s2901_s11] ss:$0 sm:$0xff] }
 0xd02   : > { %2451 = vpow2.f32 %v1802_v9  ;;  %v1804_v1 = vmul.f32 1.442695, %v1801_v10 }
 0xd04   : > { %2453 = vpow2.f32 %v1804_v1 }
 0xd0c   : > { %v2452_v11 = vpop.eup %2451 }
 0xd0d   : > { %v1806_v12 = vsel %vm685_vm3, %v2452_v11, 0.0 }
 0xd0e   : > { %v2454_v13 = vpop.eup %2453  ;;  %1807 = vadd.xlane.f32.xlu0 %v1806_v12 }
 0xd0f   : > { %v1809_v27 = vsel %vm689_vm4, %v2454_v13, 0.0 }
 0xd10   : > { %1810 = vadd.xlane.f32.xlu1 %v1809_v27 }
 0xd9b   : > { %v1808_v25 = vpop.xlane.xlu0 %1807 }
 0xd9c   : > { %2455 = vrcp.f32 %v1808_v25 }
 0xd9d   : > { %v1811_v26 = vpop.xlane.xlu1 %1810 }
 0xd9e   : > { %2457 = vrcp.f32 %v1811_v26 }
 0xda6   : > { %v2456_v28 = vpop.eup %2455 }
 0xda7   : > { %v1814_v30 = vmul.f32 %v2456_v28, %v2452_v11 }
 0xda8   : > { %v2458_v29 = vpop.eup %2457 }
 0xda9   : > { %v1815_v31 = vmul.f32 %v2458_v29, %v2454_v13 }
 0xdab   : > { %v1816_v32 = vpack.c.bf16 %v1815_v31, %v1814_v30 }
 0xdad   : > { %2384 = vmatmul.mubr.msk.bf16.vlgmr.msra.gmra.mrb[44].mxu0 %vm685_vm3, %v1816_v32 }
 0xe80   : > { %v1858_v34 = vpop.f32.mrb[44].mxu0 }
 0xe81   : > { %v2385_v35 = vpop.f32.mrb[45].mxu0 }
 0xe82   : > { %v1861_v37 = vpop.f32.mrb[46].mxu0 }
 0xe83   : > { %v1865_v38 = vpack.c.bf16 %v1861_v37, %v1858_v34  ;;  %v2386_v39 = vpop.f32.mrb[47].mxu0 }
 0xe85   : > { %2390 = vmatmul.mubr.msk.bf16.vlgmr.msra.gmra.mrb[44].mxu1 %vm637_vm2, %v1865_v38 }
 0xf58   : > { %v1908_v40 = vpop.f32.mrb[44].mxu1 }
 0xf59   : > { %v1915_v42 = vadd.f32 %v1908_v40, %v2822_v45  ;;  %v2391_v43 = vpop.f32.mrb[45].mxu1 }
 0xf5a   : > { %v1911_v44 = vpop.f32.mrb[46].mxu1 }
 0xf5b   : > { %v1924_v46 = vadd.f32 %v2158_v41, %v1915_v42  ;;  %v1916_v47 = vadd.f32 %v1911_v44, %v2825_v48  ;;  %v2392_v49 = vpop.f32.mrb[47].mxu1 }
 0xf5d   : > { %v1925_v50 = vadd.f32 %v2158_v41, %v1916_v47  ;;  %v1926_v51 = vadd.f32 %v1924_v46, %v2575_v5 }
 0xf5f   : > { %v1928_v52 = vsel %vm462_vm1, %v1926_v51, 0.0  ;;  %v1927_v53 = vadd.f32 %v1925_v50, %v2577_v6 }
 0xf60   : > { %1929 = vadd.xlane.f32.xlu0 %v1928_v52 }
 0xf61   : > { %v1932_v54 = vsel %vm1931_vm7, %v1927_v53, 0.0 }
 0xf62   : > { %1933 = vadd.xlane.f32.xlu1 %v1932_v54 }
 0xfed   : > { %v1930_v55 = vpop.xlane.xlu0 %1929 }
 0xfee   : > { %v1936_v45 = vmul.f32 0.03125, %v1930_v55 }
 0xfef   : > { %v1934_v56 = vpop.xlane.xlu1 %1933 }
 0xff0   : > { %v1938_v57 = vsub.f32 %v1926_v51, %v1936_v45  ;;  %v1937_v33 = vmul.f32 0.03125, %v1934_v56 }
 0xff2   : > { %v1939_v36 = vsub.f32 %v1927_v53, %v1937_v33  ;;  %v1940_v48 = vmul.f32 %v1938_v57, %v1938_v57 }
 0xff4   : > { %v1942_v58 = vsel %vm462_vm1, %v1940_v48, 0.0  ;;  %v1941_v59 = vmul.f32 %v1939_v36, %v1939_v36 }
 0xff5   : > { %1943 = vadd.xlane.f32.xlu0 %v1942_v58 }
 0xff6   : > { %v1945_v5 = vsel %vm1931_vm7, %v1941_v59, 0.0 }
 0xff7   : > { %1946 = vadd.xlane.f32.xlu1 %v1945_v5 }
0x1082   : > { %v1944_v6 = vpop.xlane.xlu0 %1943 }
0x1083   : > { %v1948_v60 = vmul.f32 0.03125, %v1944_v6 }
0x1084   : > { %v1947_v61 = vpop.xlane.xlu1 %1946 }
0x1085   : > { %v1950_v62 = vadd.f32 1e-05, %v1948_v60  ;;  %v1949_v63 = vmul.f32 0.03125, %v1947_v61 }
0x1087   : > { %2459 = vrsqrt.f32 %v1950_v62  ;;  %v1951_v0 = vadd.f32 1e-05, %v1949_v63 }
0x1089   : > { %2461 = vrsqrt.f32 %v1951_v0 }
0x1091   : > { %v2460_v2 = vpop.eup %2459 }
0x1092   : > { %v1954_v4 = vmul.f32 %v2460_v2, %v1938_v57 }
0x1093   : > { %v2462_v8 = vpop.eup %2461 }
0x1094   : > { %v1963_v9 = vmul.f32 %v2159_v3, %v1954_v4  ;;  %v1955_v10 = vmul.f32 %v2462_v8, %v1939_v36 }
0x1096   : > { %v1972_v1 = vadd.f32 %v2160_v7, %v1963_v9  ;;  %v1964_v11 = vmul.f32 %v2159_v3, %v1955_v10 }
0x1098   : > { %1974 = vst.msk [vmem:[%s427_s27] sm:$0xff] %vm462_vm1, %v1972_v1  ;;  %v1973_v12 = vadd.f32 %v2160_v7, %v1964_v11 }
0x109a   : > { %1975 = vst.msk [vmem:[%s427_s27 + $0x8] sm:$0x3] %vm1931_vm7, %v1973_v12 }
0x109b PF: > { %s22_s21 = sadd.s32 1, %s2469_s21  }
0x109c   : > { %p19_p4 = scmp.ge.s32.totalorder %s22_s21, 4  }
0x109e   :  { %21 = sbr.rel (!%p19_p4) target bundleno = 1 (0x1), region = 122 }

// kernel: model_forward.20
= control target key start
LH: loop header
LB: loop body
LE: loop exit
PB: predicated region body
PF: predicated region fallthrough
CT: control target
= control target key end

     0   :  { %s631_s24 = smov 0   ;;  %s689_s0 = inlined_call_operand.vmem [shape: f32[2,8,32], index: 0, kind: input, shape index: {}]   ;;  %s690_s1 = inlined_call_operand.vmem [shape: bf16[32,64], index: 1, kind: input, shape index: {}]   ;;  %s691_s2 = inlined_call_operand.vmem [shape: f32[1,64], index: 2, kind: input, shape index: {}]   ;;  %s692_s3 = inlined_call_operand.vmem [shape: bf16[64,32], index: 3, kind: input, shape index: {}]   ;;  %s693_s4 = inlined_call_operand.vmem [shape: f32[1,32], index: 4, kind: input, shape index: {}]   ;;  %s694_s5 = inlined_call_operand.vmem [shape: f32[1,32], index: 5, kind: input, shape index: {}]   ;;  %s695_s6 = inlined_call_operand.vmem [shape: f32[1,32], index: 6, kind: input, shape index: {}]   ;;  %s696_s7 = inlined_call_operand.vmem [shape: f32[2,8,32], index: 7, kind: output, shape index: {}]  }
   0x1 LB: > { %s514_s25 = sadd.s32 4294967295, %s587_s24   ;;  %p518_p0 = scmp.ge.s32.totalorder %s587_s24, 1  ;;  %s587_s24 = sphi %s631_s24, %s17_s24  }
   0x2   : > { %p236_p1 = scmp.lt.s32.totalorder %s587_s24, 3 }
   0x4   : > { %p237_p2 = pnand %p518_p0, %p236_p1 }
   0x5   : > { %v573_v0 = vld [vmem:[%s690_s1] sm:$0xff] (!%p237_p2)   ;;  %v589_v1 = vmov (!%p237_p2), 0.0   ;;  %v574_v2 = vld [vmem:[%s690_s1 + $0x8] sm:$0xff] (!%p237_p2)   ;;  %vm590_vm0 = vmmov (!%p237_p2), 0   ;;  %p266_p3 = scmp.lt.s32.totalorder (!%p237_p2), %s514_s25, 1  ;;  %vm300_vm1 = vcmask (!%p237_p2), 261120  }
   0x6   : > { %240 = sbr.rel (%p237_p2) target bundleno = 767 (0x2ff), region = 48  ;;  %543 = vmatprep.subr.bf16.mxu0 (!%p237_p2), %v589_v1  ;;  %551 = vmatprep.subr.bf16.mxu1 (!%p237_p2), %v589_v1  ;;  %v575_v3 = vld [vmem:[%s692_s3] sm:$0xff] (!%p237_p2)   ;;  %v576_v4 = vld [vmem:[%s692_s3 + $0x8] sm:$0xff] (!%p237_p2)   ;;  %v577_v7 = vld [vmem:[%s692_s3 + $0x10] sm:$0xff] (!%p237_p2)   ;;  %vm385_vm2 = vcmask (!%p237_p2), 523264  }
   0x7   : > { %544 = vmatpush3.bf16.msra.mxu0 (!%p237_p2), %v573_v0  ;;  %547 = vmatprep.mubr.msk.bf16.mxu0 (!%p237_p2), %vm590_vm0, %v589_v1  ;;  %v578_v8 = vld [vmem:[%s692_s3 + $0x18] sm:$0xff] (!%p237_p2)   ;;  %v521_v9 = vld [vmem:[%s691_s2] ss:$0 sm:$0xff] (!%p237_p2) }
   0x8   : > { %545 = vmatprep.subr.bf16.mxu0 (!%p237_p2), %v589_v1  ;;  %559 = vmatprep.mubr.msk.bf16.mxu1 (!%p237_p2), %vm590_vm0, %v589_v1  ;;  %v525_v17 = vld [vmem:[%s693_s4] ss:$0 sm:$0xff] (!%p237_p2) }
   0x9   : > { %552 = vmatpush3.bf16.msra.mxu1 (!%p237_p2), %v575_v3  ;;  %v531_v34 = vld [vmem:[%s694_s5] ss:$0 sm:$0xff] (!%p237_p2) }
   0xa   : > { %553 = vmatprep.subr.bf16.mxu1 (!%p237_p2), %v589_v1  ;;  %v532_v36 = vld [vmem:[%s695_s6] ss:$0 sm:$0xff] (!%p237_p2) }
   0xb   : > { %546 = vmatpush3.bf16.msra.mxu0 (!%p237_p2), %v574_v2 }
   0xd   : > { %s698_s25 = smov (!%p266_p3, %s514_s25), 1  ;;  %554 = vmatpush3.bf16.msra.mxu1 %v576_v4 }
   0xe   : > { %s519_s11 = sshll.u32 %s698_s25, 3  ;;  %555 = vmatprep.subr.bf16.mxu1 %v589_v1 }
   0xf   : > { %s269_s14 = scalar_lea.vmem %s689_s0, %s519_s11  ;;  %s273_s8 = scalar_lea.vmem %s696_s7, %s519_s11 }
  0x10   : > { %v275_v5 = vld [vmem:[%s269_s14] sm:$0xff] }
  0x11   : > { %v276_v6 = vpack.c.bf16 %v275_v5, %v275_v5  ;;  %556 = vmatpush3.bf16.msra.mxu1 %v577_v7 }
  0x12   : > { %557 = vmatprep.subr.bf16.mxu1 %v589_v1 }
  0x13   : > { %548 = vmatmul.mubr.msk.bf16.vlgmr.msra.gmra.mrb[0].mxu0 %vm300_vm1, %v276_v6 }
  0x15   : > { %558 = vmatpush3.bf16.msra.mxu1 %v578_v8 }
  0xe6   : > { %v338_v10 = vpop.f32.mrb[0].mxu0 }
  0xe7   : > { %v339_v11 = vadd.f32 %v521_v9, %v338_v10  ;;  %v549_v12 = vpop.f32.mrb[1].mxu0 }
  0xe8   : > { %v341_v13 = vpop.f32.mrb[2].mxu0 }
  0xe9   : > { %v344_v14 = vmax.f32 %v339_v11, 0.0  ;;  %v550_v15 = vpop.f32.mrb[3].mxu0 }
  0xeb   : > { %v345_v16 = vpack.c.bf16 %v344_v14, %v344_v14 }
  0xed   : > { %560 = vmatmul.mubr.msk.bf16.vlgmr.msra.gmra.mrb[0].mxu1 %vm385_vm2, %v345_v16 }
 0x1c0   : > { %v423_v18 = vpop.f32.mrb[0].mxu1 }
 0x1c1   : > { %v424_v19 = vadd.f32 %v525_v17, %v423_v18  ;;  %v561_v20 = vpop.f32.mrb[1].mxu1 }
 0x1c2   : > { %v426_v21 = vpop.f32.mrb[2].mxu1 }
 0x1c3   : > { %v562_v22 = vpop.f32.mrb[3].mxu1  ;;  %v429_v23 = vadd.f32 %v424_v19, %v275_v5 }
 0x1c5   : > { %v430_v24 = vsel %vm300_vm1, %v429_v23, 0.0 }
 0x1c6   : > { %431 = vadd.xlane.f32.xlu0 %v430_v24 }
 0x253   : > { %v432_v25 = vpop.xlane.xlu0 %431 }
 0x254   : > { %v434_v26 = vmul.f32 0.03125, %v432_v25 }
 0x256   : > { %v435_v27 = vsub.f32 %v429_v23, %v434_v26 }
 0x258   : > { %v436_v28 = vmul.f32 %v435_v27, %v435_v27 }
 0x25a   : > { %v437_v29 = vsel %vm300_vm1, %v436_v28, 0.0 }
 0x25b   : > { %438 = vadd.xlane.f32.xlu0 %v437_v29 }
 0x2e8   : > { %v439_v30 = vpop.xlane.xlu0 %438 }
 0x2e9   : > { %v440_v31 = vmul.f32 0.03125, %v439_v30 }
 0x2eb   : > { %v441_v32 = vadd.f32 1e-05, %v440_v31 }
 0x2ed   : > { %579 = vrsqrt.f32 %v441_v32 }
 0x2f7   : > { %v580_v33 = vpop.eup %579 }
 0x2f8   : > { %v443_v35 = vmul.f32 %v580_v33, %v435_v27 }
 0x2fa   : > { %v451_v37 = vmul.f32 %v531_v34, %v443_v35 }
 0x2fc   : > { %v459_v38 = vadd.f32 %v532_v36, %v451_v37 }
 0x2fe   : > { %460 = vst.msk [vmem:[%s273_s8] sm:$0xff] %vm300_vm1, %v459_v38 }
 0x2ff PF: > { %s17_s24 = sadd.s32 1, %s587_s24  }
 0x300   : > { %p14_p4 = scmp.ge.s32.totalorder %s17_s24, 4  }
 0x302   :  { %16 = sbr.rel (!%p14_p4) target bundleno = 1 (0x1), region = 78 }

// kernel: model_forward.18
= control target key start
LH: loop header
LB: loop body
LE: loop exit
PB: predicated region body
PF: predicated region fallthrough
CT: control target
= control target key end

     0   :  { %s2359_s17 = smov 0   ;;  %s2679_s0 = inlined_call_operand.vmem [shape: f32[2,8,32], index: 0, kind: input, shape index: {}]   ;;  %s2680_s1 = inlined_call_operand.vmem [shape: bf16[4,32,8], index: 1, kind: input, shape index: {}]   ;;  %s2681_s2 = inlined_call_operand.vmem [shape: f32[4,1,8], index: 2, kind: input, shape index: {}]   ;;  %s2682_s3 = inlined_call_operand.vmem [shape: bf16[4,32,8], index: 3, kind: input, shape index: {}]   ;;  %s2683_s4 = inlined_call_operand.vmem [shape: f32[4,1,8], index: 4, kind: input, shape index: {}]   ;;  %s2684_s5 = inlined_call_operand.vmem [shape: bf16[4,32,8], index: 5, kind: input, shape index: {}]   ;;  %s2685_s6 = inlined_call_operand.vmem [shape: f32[4,1,8], index: 6, kind: input, shape index: {}]   ;;  %s2686_s7 = inlined_call_operand.vmem [shape: bf16[4,8,32], index: 7, kind: input, shape index: {}]   ;;  %s2687_s8 = inlined_call_operand.vmem [shape: f32[1,32], index: 8, kind: input, shape index: {}]   ;;  %s2688_s9 = inlined_call_operand.vmem [shape: f32[1,32], index: 9, kind: input, shape index: {}]   ;;  %s2689_s10 = inlined_call_operand.vmem [shape: f32[1,32], index: 10, kind: input, shape index: {}]   ;;  %s2690_s11 = inlined_call_operand.vmem [shape: f32[2,8,32], index: 11, kind: output, shape index: {}]  }
   0x1 LB: > { %s1889_s18 = sadd.s32 4294967295, %s2295_s17   ;;  %p1893_p0 = scmp.ge.s32.totalorder %s2295_s17, 1  ;;  %s2295_s17 = sphi %s2359_s17, %s21_s17  }
   0x2   : > { %p336_p1 = scmp.lt.s32.totalorder %s2295_s17, 3 }
   0x4   : > { %p337_p2 = pnand %p1893_p0, %p336_p1 }
   0x5   : > { %v2247_v0 = vld [vmem:[%s2682_s3] sm:$0xff] (!%p337_p2)   ;;  %v2297_v1 = vmov (!%p337_p2), 0.0   ;;  %v2248_v2 = vld [vmem:[%s2682_s3 + $0x8] sm:$0xff] (!%p337_p2)   ;;  %vm2298_vm0 = vmmov (!%p337_p2), 0   ;;  %p374_p3 = scmp.lt.s32.totalorder (!%p337_p2), %s1889_s18, 1  ;;  %vm414_vm1 = vcmask (!%p337_p2), 261120   ;;  %v385_v24 = vlaneseq (!%p337_p2) }
   0x6   : > { %340 = sbr.rel (%p337_p2) target bundleno = 4225 (0x1081), region = 64  ;;  %2077 = vmatprep.subr.bf16.mxu1 (!%p337_p2), %v2297_v1  ;;  %2069 = vmatprep.subr.bf16.mxu0 (!%p337_p2), %v2297_v1  ;;  %v2249_v3 = vld [vmem:[%s2680_s1] sm:$0xff] (!%p337_p2)   ;;  %v2250_v4 = vld [vmem:[%s2680_s1 + $0x8] sm:$0xff] (!%p337_p2)   ;;  %vm586_vm2 = vcmask (!%p337_p2), 64512   ;;  %vm649_vm4 = vcmask (!%p337_p2), 1043456   ;;  %v2255_v47 = vld [vmem:[%s2680_s1 + $0x10] sm:$0xff] (!%p337_p2)  }
   0x7   : > { %2078 = vmatpush3.bf16.msra.mxu1 (!%p337_p2), %v2247_v0  ;;  %2081 = vmatprep.mubr.msk.bf16.mxu1 (!%p337_p2), %vm2298_vm0, %v2297_v1  ;;  %v1900_v7 = vld [vmem:[%s2683_s4] ss:$0 sm:$0xff] (!%p337_p2)  ;;  %v2252_v23 = vld [vmem:[%s2684_s5 + $0x8] sm:$0xff] (!%p337_p2)   ;;  %v386_v25 = vshrl.u32 (!%p337_p2), %v385_v24, 7  ;;  %v388_v26 = vand.u32 (!%p337_p2), 127, %v385_v24  ;;  %v2256_v48 = vld [vmem:[%s2680_s1 + $0x18] sm:$0xff] (!%p337_p2)  }
   0x8   : > { %2079 = vmatprep.subr.bf16.mxu1 (!%p337_p2), %v2297_v1  ;;  %2073 = vmatprep.mubr.msk.bf16.mxu0 (!%p337_p2), %vm2298_vm0, %v2297_v1  ;;  %v1896_v14 = vld [vmem:[%s2681_s2] ss:$0 sm:$0xff] (!%p337_p2)  ;;  %v2253_v52 = vld [vmem:[%s2682_s3 + $0x10] sm:$0xff] (!%p337_p2)   ;;  %v2254_v54 = vld [vmem:[%s2682_s3 + $0x18] sm:$0xff] (!%p337_p2)  }
   0x9   : > { %2070 = vmatpush3.bf16.msra.mxu0 (!%p337_p2), %v2249_v3  ;;  %v2251_v22 = vld [vmem:[%s2684_s5] sm:$0xff] (!%p337_p2)   ;;  %vm389_vm3 = vcmp.gt.s32.totalorder (!%p337_p2), %v388_v26, %v386_v25 }
   0xa   : > { %2071 = vmatprep.subr.bf16.mxu0 (!%p337_p2), %v2297_v1  ;;  %v2435_v27 = vsel (!%p337_p2), %vm389_vm3, -1e+30, %v2297_v1  ;;  %v1904_v42 = vld [vmem:[%s2685_s6] ss:$0 sm:$0xff] (!%p337_p2)  ;;  %v1924_v63 = vld [vmem:[%s2683_s4 + $0x1] ss:$0 sm:$0xff] (!%p337_p2) }
   0xb   : > { %2080 = vmatpush3.bf16.msra.mxu1 (!%p337_p2), %v2248_v2 }
   0xc   : > { %2093 = vmatprep.subr.bf16.mxu1 (!%p337_p2), %v2297_v1 }
   0xd   : > { %s2692_s18 = smov (!%p374_p3, %s1889_s18), 1  ;;  %2072 = vmatpush3.bf16.msra.mxu0 %v2250_v4 }
   0xe   : > { %s1894_s27 = sshll.u32 %s2692_s18, 3  ;;  %2085 = vmatprep.subr.bf16.mxu0 %v2297_v1 }
   0xf   : > { %s377_s30 = scalar_lea.vmem %s2679_s0, %s1894_s27  ;;  %s381_s12 = scalar_lea.vmem %s2690_s11, %s1894_s27 }
  0x10   : > { %v2396_v5 = vld [vmem:[%s377_s30] sm:$0xff] }
  0x11   : > { %v2400_v6 = vpack.c.bf16 %v2396_v5, %v2396_v5 }
  0x13   : > { %2082 = vmatmul.mubr.msk.bf16.vlgmr.msra.gmra.mrb[0].mxu1 %vm414_vm1, %v2400_v6  ;;  %2074 = vmatmul.mubr.msk.bf16.vlgmr.msra.gmra.mrb[0].mxu0 %vm414_vm1, %v2400_v6 }
  0x14   : > { %2095 = vmatprep.mubr.msk.bf16.mxu1 %vm2298_vm0, %v2297_v1  ;;  %2089 = vmatprep.mubr.msk.bf16.mxu0 %vm2298_vm0, %v2297_v1 }
  0x15   : > { %2086 = vmatpush3.bf16.msra.mxu0 %v2251_v22 }
  0x16   : > { %2087 = vmatprep.subr.bf16.mxu0 %v2297_v1 }
  0x19   : > { %2088 = vmatpush3.bf16.msra.mxu0 %v2252_v23 }
  0x1a   : > { %2099 = vmatprep.subr.bf16.mxu0 %v2297_v1 }
  0x1c   : > { %2090 = vmatmul.mubr.msk.bf16.vlgmr.msra.gmra.mrb[4].mxu0 %vm414_vm1, %v2400_v6 }
  0x1d   : > { %2101 = vmatprep.mubr.msk.bf16.mxu0 %vm2298_vm0, %v2297_v1 }
  0xe6   : > { %v515_v8 = vpop.f32.mrb[0].mxu1  ;;  %v452_v9 = vpop.f32.mrb[0].mxu0 }
  0xe7   : > { %v516_v10 = vadd.f32 %v1900_v7, %v515_v8  ;;  %v2083_v11 = vpop.f32.mrb[1].mxu1  ;;  %v2075_v12 = vpop.f32.mrb[1].mxu0  ;;  %v453_v20 = vadd.f32 %v1896_v14, %v452_v9  ;;  %v1915_v7 = vld [vmem:[%s2681_s2 + $0x1] ss:$0 sm:$0xff]  ;;  %v2258_v14 = vld [vmem:[%s2684_s5 + $0x18] sm:$0xff]  }
  0xe8   : > { %v518_v13 = vpop.f32.mrb[2].mxu1  ;;  %v455_v15 = vpop.f32.mrb[2].mxu0 }
  0xe9   : > { %v585_v16 = vpack.c.bf16 %v516_v10, %v516_v10  ;;  %v2084_v17 = vpop.f32.mrb[3].mxu1  ;;  %v2076_v18 = vpop.f32.mrb[3].mxu0  ;;  %v584_v21 = vpack.c.bf16 %v453_v20, %v453_v20  ;;  %v2257_v13 = vld [vmem:[%s2684_s5 + $0x10] sm:$0xff]  }
  0xeb   : > { %v591_v19 = vsel %vm586_vm2, %v585_v16, 0 }
  0xec   : > { %2094 = vmatpush3.bf16.xpose.msra.mxu1 %v591_v19 }
  0xed   : > { %2105 = vmatprep.subr.bf16.mxu1 %v2297_v1 }
  0xef   : > { %v578_v39 = vpop.f32.mrb[4].mxu0 }
  0xf0   : > { %v2091_v40 = vpop.f32.mrb[5].mxu0  ;;  %v579_v44 = vadd.f32 %v1904_v42, %v578_v39  ;;  %v694_v39 = vld [vmem:[%s2686_s7] sm:$0xf] }
  0xf1   : > { %v581_v41 = vpop.f32.mrb[6].mxu0  ;;  %v1050_v42 = vsel %vm649_vm4, %v694_v39, 0 }
  0xf2   : > { %v2092_v43 = vpop.f32.mrb[7].mxu0  ;;  %v645_v45 = vpack.c.bf16 %v579_v44, %v579_v44 }
  0xf3   : > { %2096 = vmatmul.mubr.msk.bf16.vlgmr.msra.gmra.mrb[4].mxu1 %vm586_vm2, %v584_v21  ;;  %v1933_v21 = vld [vmem:[%s2685_s6 + $0x1] ss:$0 sm:$0xff] }
  0xf4   : > { %2109 = vmatprep.mubr.msk.bf16.mxu1 %vm2298_vm0, %v2297_v1  ;;  %v651_v46 = vsel %vm649_vm4, %v645_v45, 0  ;;  %2106 = vmatpush3.bf16.msra.mxu1 %v2255_v47  ;;  %v2259_v43 = vld [vmem:[%s2682_s3 + $0x20] sm:$0xff]   ;;  %v2260_v45 = vld [vmem:[%s2682_s3 + $0x28] sm:$0xff]  }
  0xf5   : > { %2100 = vmatpush3.bf16.msra.mxu0 %v651_v46  ;;  %2107 = vmatprep.subr.bf16.mxu1 %v2297_v1  ;;  %v2261_v47 = vld [vmem:[%s2680_s1 + $0x20] sm:$0xff]  }
  0xf6   : > { %2113 = vmatprep.subr.bf16.mxu0 %v2297_v1 }
  0xf8   : > { %2108 = vmatpush3.bf16.msra.mxu1 %v2256_v48 }
  0xf9   : > { %2121 = vmatprep.subr.bf16.mxu1 %v2297_v1 }
  0xfb   : > { %2110 = vmatmul.mubr.msk.bf16.vlgmr.msra.gmra.mrb[8].mxu1 %vm414_vm1, %v2400_v6 }
  0xfc   : > { %2125 = vmatprep.mubr.msk.bf16.mxu1 %vm2298_vm0, %v2297_v1  ;;  %2122 = vmatpush3.bf16.msra.mxu1 %v2257_v13 }
  0xfd   : > { %2123 = vmatprep.subr.bf16.mxu1 %v2297_v1 }
 0x100   : > { %2124 = vmatpush3.bf16.msra.mxu1 %v2258_v14 }
 0x101   : > { %2135 = vmatprep.subr.bf16.mxu1 %v2297_v1 }
 0x103   : > { %2126 = vmatmul.mubr.msk.bf16.vlgmr.msra.gmra.mrb[12].mxu1 %vm414_vm1, %v2400_v6 }
 0x104   : > { %2137 = vmatprep.mubr.msk.bf16.mxu1 %vm2298_vm0, %v2297_v1 }
 0x1c6   : > { %v627_v28 = vpop.f32.mrb[4].mxu1 }
 0x1c7   : > { %v628_v29 = vadd.f32 %v627_v28, %v2435_v27  ;;  %v2097_v30 = vpop.f32.mrb[5].mxu1 }
 0x1c8   : > { %v630_v31 = vpop.f32.mrb[6].mxu1 }
 0x1c9   : > { %v2098_v32 = vpop.f32.mrb[7].mxu1  ;;  %v633_v33 = vsel %vm586_vm2, %v628_v29, -inf }
 0x1ca   : > { %634 = vmax.xlane.f32.xlu0 %v633_v33 }
 0x1ce   : > { %v754_v55 = vpop.f32.mrb[8].mxu1 }
 0x1cf   : > { %v2111_v56 = vpop.f32.mrb[9].mxu1  ;;  %v755_v11 = vadd.f32 %v1915_v7, %v754_v55 }
 0x1d0   : > { %v757_v57 = vpop.f32.mrb[10].mxu1 }
 0x1d1   : > { %v2112_v58 = vpop.f32.mrb[11].mxu1  ;;  %v890_v12 = vpack.c.bf16 %v755_v11, %v755_v11  ;;  %v1956_v57 = vld [vmem:[%s2683_s4 + $0x2] ss:$0 sm:$0xff] }
 0x1d6   : > { %v884_v22 = vpop.f32.mrb[12].mxu1 }
 0x1d7   : > { %v885_v23 = vadd.f32 %v1933_v21, %v884_v22  ;;  %v2127_v24 = vpop.f32.mrb[13].mxu1 }
 0x1d8   : > { %v887_v25 = vpop.f32.mrb[14].mxu1 }
 0x1d9   : > { %v950_v26 = vpack.c.bf16 %v885_v23, %v885_v23  ;;  %v2128_v28 = vpop.f32.mrb[15].mxu1 }
 0x257   : > { %v635_v34 = vpop.xlane.xlu0 %634 }
 0x258   : > { %v636_v35 = vsub.f32 %v628_v29, %v635_v34  ;;  %v955_v29 = vsel %vm649_vm4, %v950_v26, 0 }
 0x259   : > { %2136 = vmatpush3.bf16.msra.mxu1 %v955_v29 }
 0x25a   : > { %v637_v36 = vmul.f32 1.442695, %v636_v35  ;;  %2147 = vmatprep.subr.bf16.mxu1 %v2297_v1  ;;  %v1939_v35 = vld [vmem:[%s2686_s7 + $0x4] sm:$0xf] }
 0x25c   : > { %2271 = vpow2.f32 %v637_v36  ;;  %v1004_v36 = vsel %vm649_vm4, %v1939_v35, 0 }
 0x266   : > { %v2272_v37 = vpop.eup %2271 }
 0x267   : > { %v639_v38 = vsel %vm586_vm2, %v2272_v37, 0.0 }
 0x268   : > { %640 = vadd.xlane.f32.xlu0 %v639_v38 }
 0x2f5   : > { %v641_v49 = vpop.xlane.xlu0 %640 }
 0x2f6   : > { %2273 = vrcp.f32 %v641_v49 }
 0x300   : > { %v2274_v50 = vpop.eup %2273 }
 0x301   : > { %v643_v51 = vmul.f32 %v2274_v50, %v2272_v37 }
 0x303   : > { %v644_v53 = vpack.c.bf16 %v643_v51, %v643_v51 }
 0x305   : > { %2102 = vmatmul.mubr.msk.bf16.vlgmr.msra.gmra.mrb[8].mxu0 %vm586_vm2, %v644_v53 }
 0x306   : > { %2114 = vmatpush3.bf16.msra.mxu0 %v2253_v52  ;;  %2117 = vmatprep.mubr.msk.bf16.mxu0 %vm2298_vm0, %v2297_v1  ;;  %v2262_v52 = vld [vmem:[%s2680_s1 + $0x28] sm:$0xff]  }
 0x307   : > { %2115 = vmatprep.subr.bf16.mxu0 %v2297_v1 }
 0x30a   : > { %2116 = vmatpush3.bf16.msra.mxu0 %v2254_v54 }
 0x30b   : > { %2129 = vmatprep.subr.bf16.mxu0 %v2297_v1 }
 0x30d   : > { %2118 = vmatmul.mubr.msk.bf16.vlgmr.msra.gmra.mrb[12].mxu0 %vm414_vm1, %v2400_v6 }
 0x30e   : > { %2131 = vmatprep.mubr.msk.bf16.mxu0 %vm2298_vm0, %v2297_v1 }
 0x3d8   : > { %v2472_v59 = vpop.f32.mrb[8].mxu0 }
 0x3d9   : > { %v2103_v60 = vpop.f32.mrb[9].mxu0  ;;  %v693_v44 = vpack.c.bf16 %v2472_v59, %v2472_v59 }
 0x3da   : > { %v690_v61 = vpop.f32.mrb[10].mxu0 }
 0x3db   : > { %v2104_v62 = vpop.f32.mrb[11].mxu0 }
 0x3e0   : > { %v819_v0 = vpop.f32.mrb[12].mxu0 }
 0x3e1   : > { %v820_v2 = vadd.f32 %v1924_v63, %v819_v0  ;;  %v2119_v3 = vpop.f32.mrb[13].mxu0 }
 0x3e2   : > { %v822_v4 = vpop.f32.mrb[14].mxu0 }
 0x3e3   : > { %v891_v8 = vpack.c.bf16 %v820_v2, %v820_v2  ;;  %v2120_v9 = vpop.f32.mrb[15].mxu0 }
 0x3e4   : > { %v1947_v9 = vld [vmem:[%s2681_s2 + $0x2] ss:$0 sm:$0xff] }
 0x3e5   : > { %v896_v10 = vsel %vm586_vm2, %v891_v8, 0 }
 0x3e6   : > { %2130 = vmatpush3.bf16.xpose.msra.mxu0 %v896_v10 }
 0x3e7   : > { %2141 = vmatprep.subr.bf16.mxu0 %v2297_v1 }
 0x3ed   : > { %2132 = vmatmul.mubr.msk.bf16.vlgmr.msra.gmra.mrb[16].mxu0 %vm586_vm2, %v890_v12 }
 0x3ee   : > { %2143 = vmatprep.mubr.msk.bf16.mxu0 %vm2298_vm0, %v2297_v1  ;;  %2142 = vmatpush3.bf16.msra.mxu0 %v1004_v36 }
 0x3ef   : > { %2153 = vmatprep.subr.bf16.mxu0 %v2297_v1 }
 0x4c0   : > { %v932_v15 = vpop.f32.mrb[16].mxu0 }
 0x4c1   : > { %v933_v16 = vadd.f32 %v932_v15, %v2435_v27  ;;  %v2133_v17 = vpop.f32.mrb[17].mxu0 }
 0x4c2   : > { %v935_v18 = vpop.f32.mrb[18].mxu0  ;;  %v2264_v17 = vld [vmem:[%s2684_s5 + $0x28] sm:$0xff]  }
 0x4c3   : > { %v2134_v19 = vpop.f32.mrb[19].mxu0  ;;  %v938_v20 = vsel %vm586_vm2, %v933_v16, -inf }
 0x4c4   : > { %939 = vmax.xlane.f32.xlu1 %v938_v20 }
 0x551   : > { %v940_v30 = vpop.xlane.xlu1 %939 }
 0x552   : > { %v941_v31 = vsub.f32 %v933_v16, %v940_v30  ;;  %v2263_v16 = vld [vmem:[%s2684_s5 + $0x20] sm:$0xff]  }
 0x554   : > { %v942_v32 = vmul.f32 1.442695, %v941_v31 }
 0x556   : > { %2275 = vpow2.f32 %v942_v32 }
 0x560   : > { %v2276_v33 = vpop.eup %2275 }
 0x561   : > { %v944_v34 = vsel %vm586_vm2, %v2276_v33, 0.0 }
 0x562   : > { %945 = vadd.xlane.f32.xlu1 %v944_v34 }
 0x5ef   : > { %v946_v37 = vpop.xlane.xlu1 %945 }
 0x5f0   : > { %2277 = vrcp.f32 %v946_v37 }
 0x5fa   : > { %v2278_v38 = vpop.eup %2277 }
 0x5fb   : > { %v948_v40 = vmul.f32 %v2278_v38, %v2276_v33  ;;  %v1965_v33 = vld [vmem:[%s2685_s6 + $0x2] ss:$0 sm:$0xff]  ;;  %v1971_v38 = vld [vmem:[%s2686_s7 + $0x8] sm:$0xf] }
 0x5fc   : > { %v1401_v39 = vsel %vm649_vm4, %v1971_v38, 0 }
 0x5fd   : > { %v949_v41 = vpack.c.bf16 %v948_v40, %v948_v40 }
 0x5ff   : > { %2138 = vmatmul.mubr.msk.bf16.vlgmr.msra.gmra.mrb[16].mxu1 %vm586_vm2, %v949_v41 }
 0x600   : > { %2148 = vmatpush3.bf16.msra.mxu1 %v1050_v42  ;;  %2149 = vmatprep.mubr.msk.bf16.mxu1 %vm2298_vm0, %v2297_v1 }
 0x601   : > { %2161 = vmatprep.subr.bf16.mxu1 %v2297_v1 }
 0x607   : > { %2150 = vmatmul.mubr.msk.bf16.vlgmr.msra.gmra.mrb[20].mxu1 %vm586_vm2, %v693_v44  ;;  %v2267_v44 = vld [vmem:[%s2680_s1 + $0x30] sm:$0xff]  }
 0x608   : > { %2162 = vmatpush3.bf16.msra.mxu1 %v2259_v43  ;;  %2165 = vmatprep.mubr.msk.bf16.mxu1 %vm2298_vm0, %v2297_v1 }
 0x609   : > { %2163 = vmatprep.subr.bf16.mxu1 %v2297_v1 }
 0x60c   : > { %2164 = vmatpush3.bf16.msra.mxu1 %v2260_v45  ;;  %v2268_v45 = vld [vmem:[%s2680_s1 + $0x38] sm:$0xff]  }
 0x60d   : > { %2177 = vmatprep.subr.bf16.mxu1 %v2297_v1 }
 0x60f   : > { %2166 = vmatmul.mubr.msk.bf16.vlgmr.msra.gmra.mrb[24].mxu1 %vm414_vm1, %v2400_v6 }
 0x610   : > { %2179 = vmatprep.mubr.msk.bf16.mxu1 %vm2298_vm0, %v2297_v1 }
 0x6d2   : > { %v991_v46 = vpop.f32.mrb[16].mxu1 }
 0x6d3   : > { %v997_v48 = vpack.c.bf16 %v991_v46, %v991_v46  ;;  %v2139_v49 = vpop.f32.mrb[17].mxu1 }
 0x6d4   : > { %v994_v50 = vpop.f32.mrb[18].mxu1 }
 0x6d5   : > { %v2140_v51 = vpop.f32.mrb[19].mxu1  ;;  %2144 = vmatmul.mubr.msk.bf16.vlgmr.msra.gmra.mrb[20].mxu0 %vm586_vm2, %v997_v48 }
 0x6d6   : > { %2154 = vmatpush3.bf16.msra.mxu0 %v2261_v47  ;;  %2157 = vmatprep.mubr.msk.bf16.mxu0 %vm2298_vm0, %v2297_v1  ;;  %v2265_v47 = vld [vmem:[%s2682_s3 + $0x30] sm:$0xff]  }
 0x6d7   : > { %2155 = vmatprep.subr.bf16.mxu0 %v2297_v1 }
 0x6da   : > { %v1086_v53 = vpop.f32.mrb[20].mxu1  ;;  %2156 = vmatpush3.bf16.msra.mxu0 %v2262_v52  ;;  %v2266_v52 = vld [vmem:[%s2682_s3 + $0x38] sm:$0xff]  }
 0x6db   : > { %v2151_v54 = vpop.f32.mrb[21].mxu1  ;;  %2169 = vmatprep.subr.bf16.mxu0 %v2297_v1 }
 0x6dc   : > { %v1089_v55 = vpop.f32.mrb[22].mxu1 }
 0x6dd   : > { %v2152_v56 = vpop.f32.mrb[23].mxu1  ;;  %2158 = vmatmul.mubr.msk.bf16.vlgmr.msra.gmra.mrb[24].mxu0 %vm414_vm1, %v2400_v6 }
 0x6de   : > { %2173 = vmatprep.mubr.msk.bf16.mxu0 %vm2298_vm0, %v2297_v1  ;;  %2170 = vmatpush3.bf16.msra.mxu0 %v2263_v16 }
 0x6df   : > { %2171 = vmatprep.subr.bf16.mxu0 %v2297_v1 }
 0x6e2   : > { %v1216_v58 = vpop.f32.mrb[24].mxu1  ;;  %2172 = vmatpush3.bf16.msra.mxu0 %v2264_v17 }
 0x6e3   : > { %v1217_v59 = vadd.f32 %v1956_v57, %v1216_v58  ;;  %v2167_v60 = vpop.f32.mrb[25].mxu1  ;;  %2183 = vmatprep.subr.bf16.mxu0 %v2297_v1 }
 0x6e4   : > { %v1219_v61 = vpop.f32.mrb[26].mxu1 }
 0x6e5   : > { %v1288_v62 = vpack.c.bf16 %v1217_v59, %v1217_v59  ;;  %v2168_v63 = vpop.f32.mrb[27].mxu1  ;;  %2174 = vmatmul.mubr.msk.bf16.vlgmr.msra.gmra.mrb[28].mxu0 %vm414_vm1, %v2400_v6 }
 0x6e6   : > { %2185 = vmatprep.mubr.msk.bf16.mxu0 %vm2298_vm0, %v2297_v1 }
 0x6e7   : > { %v1293_v0 = vsel %vm586_vm2, %v1288_v62, 0  ;;  %v1987_v62 = vld [vmem:[%s2683_s4 + $0x3] ss:$0 sm:$0xff] }
 0x6e8   : > { %2178 = vmatpush3.bf16.xpose.msra.mxu1 %v1293_v0 }
 0x6e9   : > { %2189 = vmatprep.subr.bf16.mxu1 %v2297_v1 }
 0x7a8   : > { %v1040_v2 = vpop.f32.mrb[20].mxu0 }
 0x7a9   : > { %v2555_v3 = vadd.f32 %v1086_v53, %v1040_v2  ;;  %v2145_v4 = vpop.f32.mrb[21].mxu0 }
 0x7aa   : > { %v1043_v7 = vpop.f32.mrb[22].mxu0 }
 0x7ab   : > { %v2146_v8 = vpop.f32.mrb[23].mxu0  ;;  %v1978_v7 = vld [vmem:[%s2681_s2 + $0x3] ss:$0 sm:$0xff] }
 0x7b0   : > { %v1151_v10 = vpop.f32.mrb[24].mxu0 }
 0x7b1   : > { %v1152_v11 = vadd.f32 %v1947_v9, %v1151_v10  ;;  %v2159_v12 = vpop.f32.mrb[25].mxu0 }
 0x7b2   : > { %v1154_v13 = vpop.f32.mrb[26].mxu0  ;;  %v2269_v12 = vld [vmem:[%s2684_s5 + $0x30] sm:$0xff]  }
 0x7b3   : > { %v1287_v14 = vpack.c.bf16 %v1152_v11, %v1152_v11  ;;  %v2160_v15 = vpop.f32.mrb[27].mxu0  ;;  %v2270_v13 = vld [vmem:[%s2684_s5 + $0x38] sm:$0xff]  }
 0x7b5   : > { %2180 = vmatmul.mubr.msk.bf16.vlgmr.msra.gmra.mrb[28].mxu1 %vm586_vm2, %v1287_v14 }
 0x7b6   : > { %2191 = vmatprep.mubr.msk.bf16.mxu1 %vm2298_vm0, %v2297_v1  ;;  %2190 = vmatpush3.bf16.msra.mxu1 %v1401_v39 }
 0x7b7   : > { %2203 = vmatprep.subr.bf16.mxu1 %v2297_v1 }
 0x7b8   : > { %v1281_v30 = vpop.f32.mrb[28].mxu0 }
 0x7b9   : > { %v2175_v31 = vpop.f32.mrb[29].mxu0  ;;  %v1282_v35 = vadd.f32 %v1965_v33, %v1281_v30 }
 0x7ba   : > { %v1284_v32 = vpop.f32.mrb[30].mxu0  ;;  %v2002_v31 = vld [vmem:[%s2686_s7 + $0xc] sm:$0xf] }
 0x7bb   : > { %v2176_v34 = vpop.f32.mrb[31].mxu0  ;;  %v1347_v36 = vpack.c.bf16 %v1282_v35, %v1282_v35  ;;  %v1753_v32 = vsel %vm649_vm4, %v2002_v31, 0 }
 0x7bd   : > { %v1352_v37 = vsel %vm649_vm4, %v1347_v36, 0 }
 0x7be   : > { %2184 = vmatpush3.bf16.msra.mxu0 %v1352_v37 }
 0x7bf   : > { %2195 = vmatprep.subr.bf16.mxu0 %v2297_v1 }
 0x888   : > { %v1329_v18 = vpop.f32.mrb[28].mxu1 }
 0x889   : > { %v1330_v19 = vadd.f32 %v1329_v18, %v2435_v27  ;;  %v2181_v20 = vpop.f32.mrb[29].mxu1 }
 0x88a   : > { %v1332_v21 = vpop.f32.mrb[30].mxu1 }
 0x88b   : > { %v2182_v22 = vpop.f32.mrb[31].mxu1  ;;  %v1335_v23 = vsel %vm586_vm2, %v1330_v19, -inf }
 0x88c   : > { %1336 = vmax.xlane.f32.xlu0 %v1335_v23 }
 0x919   : > { %v1337_v24 = vpop.xlane.xlu0 %1336 }
 0x91a   : > { %v1338_v25 = vsub.f32 %v1330_v19, %v1337_v24 }
 0x91c   : > { %v1339_v26 = vmul.f32 1.442695, %v1338_v25 }
 0x91e   : > { %2279 = vpow2.f32 %v1339_v26 }
 0x928   : > { %v2280_v28 = vpop.eup %2279 }
 0x929   : > { %v1341_v29 = vsel %vm586_vm2, %v2280_v28, 0.0 }
 0x92a   : > { %1342 = vadd.xlane.f32.xlu1 %v1341_v29 }
 0x9b7   : > { %v1343_v40 = vpop.xlane.xlu1 %1342 }
 0x9b8   : > { %2281 = vrcp.f32 %v1343_v40 }
 0x9c2   : > { %v2282_v41 = vpop.eup %2281 }
 0x9c3   : > { %v1345_v42 = vmul.f32 %v2282_v41, %v2280_v28 }
 0x9c5   : > { %v1346_v43 = vpack.c.bf16 %v1345_v42, %v1345_v42 }
 0x9c7   : > { %2186 = vmatmul.mubr.msk.bf16.vlgmr.msra.gmra.mrb[32].mxu0 %vm586_vm2, %v1346_v43  ;;  %v2004_v43 = vld [vmem:[%s2687_s8] ss:$0 sm:$0xff] }
 0x9c8   : > { %2199 = vmatprep.mubr.msk.bf16.mxu0 %vm2298_vm0, %v2297_v1  ;;  %2196 = vmatpush3.bf16.msra.mxu0 %v2267_v44 }
 0x9c9   : > { %2197 = vmatprep.subr.bf16.mxu0 %v2297_v1 }
 0x9cc   : > { %2198 = vmatpush3.bf16.msra.mxu0 %v2268_v45 }
 0x9cd   : > { %2211 = vmatprep.subr.bf16.mxu0 %v2297_v1 }
 0x9cf   : > { %2200 = vmatmul.mubr.msk.bf16.vlgmr.msra.gmra.mrb[36].mxu0 %vm414_vm1, %v2400_v6 }
 0x9d0   : > { %2215 = vmatprep.mubr.msk.bf16.mxu0 %vm2298_vm0, %v2297_v1  ;;  %2212 = vmatpush3.bf16.msra.mxu0 %v2269_v12 }
 0x9d1   : > { %2213 = vmatprep.subr.bf16.mxu0 %v2297_v1 }
 0x9d4   : > { %2214 = vmatpush3.bf16.msra.mxu0 %v2270_v13 }
 0x9d5   : > { %2225 = vmatprep.subr.bf16.mxu0 %v2297_v1 }
 0x9d7   : > { %2216 = vmatmul.mubr.msk.bf16.vlgmr.msra.gmra.mrb[40].mxu0 %vm414_vm1, %v2400_v6 }
 0x9d8   : > { %2227 = vmatprep.mubr.msk.bf16.mxu0 %vm2298_vm0, %v2297_v1 }
 0xa9a   : > { %v1388_v46 = vpop.f32.mrb[32].mxu0 }
 0xa9b   : > { %v1394_v48 = vpack.c.bf16 %v1388_v46, %v1388_v46  ;;  %v2187_v49 = vpop.f32.mrb[33].mxu0 }
 0xa9c   : > { %v1391_v50 = vpop.f32.mrb[34].mxu0 }
 0xa9d   : > { %v2188_v51 = vpop.f32.mrb[35].mxu0  ;;  %2192 = vmatmul.mubr.msk.bf16.vlgmr.msra.gmra.mrb[32].mxu1 %vm586_vm2, %v1394_v48 }
 0xa9e   : > { %2204 = vmatpush3.bf16.msra.mxu1 %v2265_v47  ;;  %2207 = vmatprep.mubr.msk.bf16.mxu1 %vm2298_vm0, %v2297_v1 }
 0xa9f   : > { %2205 = vmatprep.subr.bf16.mxu1 %v2297_v1 }
 0xaa2   : > { %2206 = vmatpush3.bf16.msra.mxu1 %v2266_v52  ;;  %v1503_v53 = vpop.f32.mrb[36].mxu0 }
 0xaa3   : > { %2219 = vmatprep.subr.bf16.mxu1 %v2297_v1  ;;  %v2201_v54 = vpop.f32.mrb[37].mxu0  ;;  %v1504_v10 = vadd.f32 %v1978_v7, %v1503_v53 }
 0xaa4   : > { %v1506_v55 = vpop.f32.mrb[38].mxu0 }
 0xaa5   : > { %2208 = vmatmul.mubr.msk.bf16.vlgmr.msra.gmra.mrb[36].mxu1 %vm414_vm1, %v2400_v6  ;;  %v2202_v56 = vpop.f32.mrb[39].mxu0  ;;  %v1639_v11 = vpack.c.bf16 %v1504_v10, %v1504_v10 }
 0xaa6   : > { %2221 = vmatprep.mubr.msk.bf16.mxu1 %vm2298_vm0, %v2297_v1 }
 0xaaa   : > { %v1633_v6 = vpop.f32.mrb[40].mxu0 }
 0xaab   : > { %v2217_v25 = vpop.f32.mrb[41].mxu0 }
 0xb70   : > { %v1437_v57 = vpop.f32.mrb[32].mxu1 }
 0xb71   : > { %v2619_v58 = vadd.f32 %v1437_v57, %v2555_v3  ;;  %v2193_v59 = vpop.f32.mrb[33].mxu1 }
 0xb72   : > { %v1440_v60 = vpop.f32.mrb[34].mxu1 }
 0xb73   : > { %v2194_v61 = vpop.f32.mrb[35].mxu1 }
 0xb74   : > { %v2006_v61 = vld [vmem:[%s2689_s10] ss:$0 sm:$0xff] }
 0xb78   : > { %v1568_v63 = vpop.f32.mrb[36].mxu1 }
 0xb79   : > { %v1569_v0 = vadd.f32 %v1987_v62, %v1568_v63  ;;  %v2209_v2 = vpop.f32.mrb[37].mxu1 }
 0xb7a   : > { %v1571_v4 = vpop.f32.mrb[38].mxu1 }
 0xb7b   : > { %v1640_v8 = vpack.c.bf16 %v1569_v0, %v1569_v0  ;;  %v2210_v9 = vpop.f32.mrb[39].mxu1 }
 0xb7d   : > { %v1645_v3 = vsel %vm586_vm2, %v1640_v8, 0 }
 0xb7e   : > { %2220 = vmatpush3.bf16.xpose.msra.mxu1 %v1645_v3 }
 0xb7f   : > { %2231 = vmatprep.subr.bf16.mxu1 %v2297_v1 }
 0xb85   : > { %2222 = vmatmul.mubr.msk.bf16.vlgmr.msra.gmra.mrb[40].mxu1 %vm586_vm2, %v1639_v11 }
 0xb86   : > { %2233 = vmatprep.mubr.msk.bf16.mxu1 %vm2298_vm0, %v2297_v1  ;;  %v1636_v1 = vpop.f32.mrb[42].mxu0  ;;  %2232 = vmatpush3.bf16.msra.mxu1 %v1753_v32 }
 0xb87   : > { %v2218_v26 = vpop.f32.mrb[43].mxu0 }
 0xc58   : > { %v1681_v14 = vpop.f32.mrb[40].mxu1 }
 0xc59   : > { %v1682_v15 = vadd.f32 %v1681_v14, %v2435_v27  ;;  %v2223_v16 = vpop.f32.mrb[41].mxu1  ;;  %v1996_v27 = vld [vmem:[%s2685_s6 + $0x3] ss:$0 sm:$0xff] }
 0xc5a   : > { %v1684_v17 = vpop.f32.mrb[42].mxu1  ;;  %v1634_v28 = vadd.f32 %v1996_v27, %v1633_v6 }
 0xc5b   : > { %v2224_v18 = vpop.f32.mrb[43].mxu1  ;;  %v1687_v19 = vsel %vm586_vm2, %v1682_v15, -inf }
 0xc5c   : > { %1688 = vmax.xlane.f32.xlu0 %v1687_v19  ;;  %v1699_v29 = vpack.c.bf16 %v1634_v28, %v1634_v28 }
 0xc5e   : > { %v1704_v30 = vsel %vm649_vm4, %v1699_v29, 0 }
 0xc5f   : > { %2226 = vmatpush3.bf16.msra.mxu0 %v1704_v30 }
 0xce9   : > { %v1689_v20 = vpop.xlane.xlu0 %1688 }
 0xcea   : > { %v1690_v21 = vsub.f32 %v1682_v15, %v1689_v20 }
 0xcec   : > { %v1691_v22 = vmul.f32 1.442695, %v1690_v21 }
 0xcee   : > { %2283 = vpow2.f32 %v1691_v22 }
 0xcf8   : > { %v2284_v23 = vpop.eup %2283 }
 0xcf9   : > { %v1693_v24 = vsel %vm586_vm2, %v2284_v23, 0.0 }
 0xcfa   : > { %1694 = vadd.xlane.f32.xlu1 %v1693_v24 }
 0xd87   : > { %v1695_v33 = vpop.xlane.xlu1 %1694 }
 0xd88   : > { %2285 = vrcp.f32 %v1695_v33 }
 0xd92   : > { %v2286_v34 = vpop.eup %2285 }
 0xd93   : > { %v1697_v35 = vmul.f32 %v2286_v34, %v2284_v23 }
 0xd95   : > { %v1698_v36 = vpack.c.bf16 %v1697_v35, %v1697_v35 }
 0xd97   : > { %2228 = vmatmul.mubr.msk.bf16.vlgmr.msra.gmra.mrb[44].mxu0 %vm586_vm2, %v1698_v36 }
 0xe6a   : > { %v1740_v37 = vpop.f32.mrb[44].mxu0 }
 0xe6b   : > { %v1746_v38 = vpack.c.bf16 %v1740_v37, %v1740_v37  ;;  %v2229_v39 = vpop.f32.mrb[45].mxu0 }
 0xe6c   : > { %v1743_v40 = vpop.f32.mrb[46].mxu0 }
 0xe6d   : > { %v2230_v41 = vpop.f32.mrb[47].mxu0  ;;  %2234 = vmatmul.mubr.msk.bf16.vlgmr.msra.gmra.mrb[44].mxu1 %vm586_vm2, %v1746_v38 }
 0xf40   : > { %v1789_v42 = vpop.f32.mrb[44].mxu1 }
 0xf41   : > { %v1795_v44 = vadd.f32 %v1789_v42, %v2619_v58  ;;  %v2235_v45 = vpop.f32.mrb[45].mxu1 }
 0xf42   : > { %v1792_v46 = vpop.f32.mrb[46].mxu1 }
 0xf43   : > { %v1803_v47 = vadd.f32 %v2004_v43, %v1795_v44  ;;  %v2236_v48 = vpop.f32.mrb[47].mxu1 }
 0xf45   : > { %v1804_v49 = vadd.f32 %v1803_v47, %v2396_v5  ;;  %v2005_v5 = vld [vmem:[%s2688_s9] ss:$0 sm:$0xff] }
 0xf47   : > { %v1805_v50 = vsel %vm414_vm1, %v1804_v49, 0.0 }
 0xf48   : > { %1806 = vadd.xlane.f32.xlu0 %v1805_v50 }
 0xfd5   : > { %v1807_v51 = vpop.xlane.xlu0 %1806 }
 0xfd6   : > { %v1809_v52 = vmul.f32 0.03125, %v1807_v51 }
 0xfd8   : > { %v1810_v53 = vsub.f32 %v1804_v49, %v1809_v52 }
 0xfda   : > { %v1811_v54 = vmul.f32 %v1810_v53, %v1810_v53 }
 0xfdc   : > { %v1812_v55 = vsel %vm414_vm1, %v1811_v54, 0.0 }
 0xfdd   : > { %1813 = vadd.xlane.f32.xlu1 %v1812_v55 }
0x106a   : > { %v1814_v56 = vpop.xlane.xlu1 %1813 }
0x106b   : > { %v1815_v57 = vmul.f32 0.03125, %v1814_v56 }
0x106d   : > { %v1816_v58 = vadd.f32 1e-05, %v1815_v57 }
0x106f   : > { %2287 = vrsqrt.f32 %v1816_v58 }
0x1079   : > { %v2288_v59 = vpop.eup %2287 }
0x107a   : > { %v1818_v60 = vmul.f32 %v2288_v59, %v1810_v53 }
0x107c   : > { %v1826_v62 = vmul.f32 %v2005_v5, %v1818_v60 }
0x107e   : > { %v1834_v63 = vadd.f32 %v2006_v61, %v1826_v62 }
0x1080   : > { %1835 = vst.msk [vmem:[%s381_s12] sm:$0xff] %vm414_vm1, %v1834_v63 }
0x1081 PF: > { %s21_s17 = sadd.s32 1, %s2295_s17  }
0x1082   : > { %p18_p4 = scmp.ge.s32.totalorder %s21_s17, 4  }
0x1084   :  { %20 = sbr.rel (!%p18_p4) target bundleno = 1 (0x1), region = 115 }

// kernel: model_forward.24
= control target key start
LH: loop header
LB: loop body
LE: loop exit
PB: predicated region body
PF: predicated region fallthrough
CT: control target
= control target key end

     0   :  { %s301_s12 = smov 0   ;;  %s327_s0 = inlined_call_operand.vmem [shape: f32[2,8,32], index: 0, kind: input, shape index: {}]   ;;  %s328_s1 = inlined_call_operand.vmem [shape: f32[1,32], index: 1, kind: input, shape index: {}]   ;;  %s329_s2 = inlined_call_operand.vmem [shape: f32[1,32], index: 2, kind: input, shape index: {}]   ;;  %s330_s3 = inlined_call_operand.vmem [shape: f32[2,8,32], index: 3, kind: output, shape index: {}]  }
   0x1 LB: > { %s252_s13 = sadd.s32 4294967295, %s279_s12   ;;  %p256_p0 = scmp.ge.s32.totalorder %s279_s12, 1  ;;  %s279_s12 = sphi %s301_s12, %s13_s12  }
   0x2   : > { %p136_p1 = scmp.lt.s32.totalorder %s279_s12, 3 }
   0x4   : > { %p137_p2 = pnand %p256_p0, %p136_p1 }
   0x5   : > { %p158_p3 = scmp.lt.s32.totalorder (!%p137_p2), %s252_s13, 1  ;;  %vm167_vm0 = vcmask (!%p137_p2), 261120   ;;  %v259_v11 = vld [vmem:[%s328_s1] ss:$0 sm:$0xff] (!%p137_p2) }
   0x6   : > { %140 = sbr.rel (%p137_p2) target bundleno = 331 (0x14b), region = 32  ;;  %v260_v13 = vld [vmem:[%s329_s2] ss:$0 sm:$0xff] (!%p137_p2) }
   0xd   : > { %s332_s13 = smov (!%p158_p3, %s252_s13), 1 }
   0xe   : > { %s257_s14 = sshll.u32 %s332_s13, 3 }
   0xf   : > { %s161_s17 = scalar_lea.vmem %s327_s0, %s257_s14  ;;  %s165_s24 = scalar_lea.vmem %s330_s3, %s257_s14 }
  0x10   : > { %v166_v0 = vld [vmem:[%s161_s17] sm:$0xff] }
  0x11   : > { %v168_v1 = vsel %vm167_vm0, %v166_v0, 0.0 }
  0x12   : > { %169 = vadd.xlane.f32.xlu0 %v168_v1 }
  0x9f   : > { %v170_v2 = vpop.xlane.xlu0 %169 }
  0xa0   : > { %v172_v3 = vmul.f32 0.03125, %v170_v2 }
  0xa2   : > { %v173_v4 = vsub.f32 %v166_v0, %v172_v3 }
  0xa4   : > { %v174_v5 = vmul.f32 %v173_v4, %v173_v4 }
  0xa6   : > { %v175_v6 = vsel %vm167_vm0, %v174_v5, 0.0 }
  0xa7   : > { %176 = vadd.xlane.f32.xlu0 %v175_v6 }
 0x134   : > { %v177_v7 = vpop.xlane.xlu0 %176 }
 0x135   : > { %v178_v8 = vmul.f32 0.03125, %v177_v7 }
 0x137   : > { %v179_v9 = vadd.f32 1e-05, %v178_v8 }
 0x139   : > { %271 = vrsqrt.f32 %v179_v9 }
 0x143   : > { %v272_v10 = vpop.eup %271 }
 0x144   : > { %v181_v12 = vmul.f32 %v272_v10, %v173_v4 }
 0x146   : > { %v189_v14 = vmul.f32 %v259_v11, %v181_v12 }
 0x148   : > { %v197_v15 = vadd.f32 %v260_v13, %v189_v14 }
 0x14a   : > { %198 = vst.msk [vmem:[%s165_s24] sm:$0xff] %vm167_vm0, %v197_v15 }
 0x14b PF: > { %s13_s12 = sadd.s32 1, %s279_s12  }
 0x14c   : > { %p10_p4 = scmp.ge.s32.totalorder %s13_s12, 4  }
 0x14e   :  { %12 = sbr.rel (!%p10_p4) target bundleno = 1 (0x1), region = 62 }

// kernel: model_forward.19
= control target key start
LH: loop header
LB: loop body
LE: loop exit
PB: predicated region body
PF: predicated region fallthrough
CT: control target
= control target key end

     0   :  { %s2436_s21 = smov 0   ;;  %s2755_s0 = inlined_call_operand.vmem [shape: f32[2,8,32], index: 0, kind: input, shape index: {}]   ;;  %s2756_s1 = inlined_call_operand.vmem [shape: f32[2,10,32], index: 1, kind: input, shape index: {}]   ;;  %s2757_s2 = inlined_call_operand.vmem [shape: bf16[4,32,8], index: 2, kind: input, shape index: {}]   ;;  %s2758_s3 = inlined_call_operand.vmem [shape: f32[4,1,8], index: 3, kind: input, shape index: {}]   ;;  %s2759_s4 = inlined_call_operand.vmem [shape: bf16[4,32,8], index: 4, kind: input, shape index: {}]   ;;  %s2760_s5 = inlined_call_operand.vmem [shape: f32[4,1,8], index: 5, kind: input, shape index: {}]   ;;  %s2761_s6 = inlined_call_operand.vmem [shape: bf16[4,32,8], index: 6, kind: input, shape index: {}]   ;;  %s2762_s7 = inlined_call_operand.vmem [shape: f32[4,1,8], index: 7, kind: input, shape index: {}]   ;;  %s2763_s8 = inlined_call_operand.vmem [shape: bf16[4,8,32], index: 8, kind: input, shape index: {}]   ;;  %s2764_s9 = inlined_call_operand.vmem [shape: f32[1,32], index: 9, kind: input, shape index: {}]   ;;  %s2765_s10 = inlined_call_operand.vmem [shape: f32[1,32], index: 10, kind: input, shape index: {}]   ;;  %s2766_s11 = inlined_call_operand.vmem [shape: f32[1,32], index: 11, kind: input, shape index: {}]   ;;  %s2767_s12 = inlined_call_operand.vmem [shape: f32[2,8,32], index: 12, kind: output, shape index: {}]  }
   0x1 LB: > { %s1958_s22 = sadd.s32 4294967295, %s2367_s21   ;;  %p1962_p0 = scmp.ge.s32.totalorder %s2367_s21, 1  ;;  %s2367_s21 = sphi %s2436_s21, %s22_s21  }
   0x2   : > { %p371_p1 = scmp.lt.s32.totalorder %s2367_s21, 3 }
   0x4   : > { %p372_p2 = pnand %p1962_p0, %p371_p1 }
   0x5   : > { %v2319_v0 = vld [vmem:[%s2759_s4] sm:$0xff] (!%p372_p2)   ;;  %v2369_v1 = vmov (!%p372_p2), 0.0   ;;  %v2320_v2 = vld [vmem:[%s2759_s4 + $0x8] sm:$0xff] (!%p372_p2)   ;;  %vm2370_vm0 = vmmov (!%p372_p2), 0   ;;  %p416_p3 = scmp.lt.s32.totalorder (!%p372_p2), %s1958_s22, 1  ;;  %vm458_vm1 = vcmask (!%p372_p2), 261120  }
   0x6   : > { %375 = sbr.rel (%p372_p2) target bundleno = 4223 (0x107f), region = 68  ;;  %2149 = vmatprep.subr.bf16.mxu1 (!%p372_p2), %v2369_v1  ;;  %2141 = vmatprep.subr.bf16.mxu0 (!%p372_p2), %v2369_v1  ;;  %v2321_v3 = vld [vmem:[%s2757_s2] sm:$0xff] (!%p372_p2)   ;;  %v2322_v4 = vld [vmem:[%s2757_s2 + $0x8] sm:$0xff] (!%p372_p2)   ;;  %vm635_vm2 = vcmask (!%p372_p2), 64512   ;;  %vm682_vm3 = vcmask (!%p372_p2), 80896   ;;  %vm699_vm4 = vcmask (!%p372_p2), 1044480  }
   0x7   : > { %2150 = vmatpush3.bf16.msra.mxu1 (!%p372_p2), %v2319_v0  ;;  %2153 = vmatprep.mubr.msk.bf16.mxu1 (!%p372_p2), %vm2370_vm0, %v2369_v1  ;;  %v1971_v10 = vld [vmem:[%s2760_s5] ss:$0 sm:$0xff] (!%p372_p2)  ;;  %v2324_v27 = vld [vmem:[%s2761_s6 + $0x8] sm:$0xff] (!%p372_p2)   ;;  %v2327_v47 = vld [vmem:[%s2757_s2 + $0x10] sm:$0xff] (!%p372_p2)   ;;  %vm1055_vm5 = vcmask (!%p372_p2), 1043456  }
   0x8   : > { %2151 = vmatprep.subr.bf16.mxu1 (!%p372_p2), %v2369_v1  ;;  %2145 = vmatprep.mubr.msk.bf16.mxu0 (!%p372_p2), %vm2370_vm0, %v2369_v1  ;;  %v1967_v21 = vld [vmem:[%s2758_s3] ss:$0 sm:$0xff] (!%p372_p2)  ;;  %v2328_v48 = vld [vmem:[%s2757_s2 + $0x18] sm:$0xff] (!%p372_p2)   ;;  %v2325_v52 = vld [vmem:[%s2759_s4 + $0x10] sm:$0xff] (!%p372_p2)  }
   0x9   : > { %2142 = vmatpush3.bf16.msra.mxu0 (!%p372_p2), %v2321_v3  ;;  %v2323_v26 = vld [vmem:[%s2761_s6] sm:$0xff] (!%p372_p2)   ;;  %v2326_v54 = vld [vmem:[%s2759_s4 + $0x18] sm:$0xff] (!%p372_p2)  }
   0xa   : > { %2143 = vmatprep.subr.bf16.mxu0 (!%p372_p2), %v2369_v1  ;;  %v1975_v40 = vld [vmem:[%s2762_s7] ss:$0 sm:$0xff] (!%p372_p2)  ;;  %v1995_v63 = vld [vmem:[%s2760_s5 + $0x1] ss:$0 sm:$0xff] (!%p372_p2) }
   0xb   : > { %2152 = vmatpush3.bf16.msra.mxu1 (!%p372_p2), %v2320_v2 }
   0xc   : > { %2165 = vmatprep.subr.bf16.mxu1 (!%p372_p2), %v2369_v1 }
   0xd   : > { %s2769_s22 = smov (!%p416_p3, %s1958_s22), 1  ;;  %2144 = vmatpush3.bf16.msra.mxu0 %v2322_v4 }
   0xe   : > { %s2080_s13 = sshll.u32 %s2769_s22, 4  ;;  %s1963_s14 = sshll.u32 %s2769_s22, 3  ;;  %2157 = vmatprep.subr.bf16.mxu0 %v2369_v1 }
   0xf   : > { %s424_s17 = scalar_lea.vmem %s2756_s1, %s2080_s13  ;;  %s419_s20 = scalar_lea.vmem %s2755_s0, %s1963_s14 }
  0x10   : > { %v432_v5 = vld [vmem:[%s424_s17] sm:$0xff]  ;;  %v433_v6 = vld [vmem:[%s424_s17 + $0x8] sm:$0x3]  ;;  %s428_s28 = scalar_lea.vmem %s2767_s12, %s1963_s14 }
  0x11   : > { %v2477_v7 = vld [vmem:[%s419_s20] sm:$0xff]  ;;  %v2479_v8 = vpack.c.bf16 %v433_v6, %v432_v5 }
  0x12   : > { %v2483_v9 = vpack.c.bf16 %v2477_v7, %v2477_v7 }
  0x13   : > { %2154 = vmatmul.mubr.msk.bf16.vlgmr.msra.gmra.mrb[0].mxu1 %vm458_vm1, %v2479_v8 }
  0x14   : > { %2146 = vmatmul.mubr.msk.bf16.vlgmr.msra.gmra.mrb[0].mxu0 %vm458_vm1, %v2483_v9  ;;  %2167 = vmatprep.mubr.msk.bf16.mxu1 %vm2370_vm0, %v2369_v1 }
  0x15   : > { %2161 = vmatprep.mubr.msk.bf16.mxu0 %vm2370_vm0, %v2369_v1  ;;  %2158 = vmatpush3.bf16.msra.mxu0 %v2323_v26 }
  0x16   : > { %2159 = vmatprep.subr.bf16.mxu0 %v2369_v1 }
  0x19   : > { %2160 = vmatpush3.bf16.msra.mxu0 %v2324_v27 }
  0x1a   : > { %2171 = vmatprep.subr.bf16.mxu0 %v2369_v1 }
  0x1c   : > { %2162 = vmatmul.mubr.msk.bf16.vlgmr.msra.gmra.mrb[4].mxu0 %vm458_vm1, %v2479_v8 }
  0x1d   : > { %2173 = vmatprep.mubr.msk.bf16.mxu0 %vm2370_vm0, %v2369_v1 }
  0xe6   : > { %v562_v11 = vpop.f32.mrb[0].mxu1 }
  0xe7   : > { %v496_v12 = vpop.f32.mrb[0].mxu0  ;;  %v2155_v13 = vpop.f32.mrb[1].mxu1  ;;  %v563_v17 = vadd.f32 %v1971_v10, %v562_v11 }
  0xe8   : > { %v2147_v14 = vpop.f32.mrb[1].mxu0  ;;  %v565_v15 = vpop.f32.mrb[2].mxu1  ;;  %v497_v23 = vadd.f32 %v1967_v21, %v496_v12 }
  0xe9   : > { %v499_v16 = vpop.f32.mrb[2].mxu0  ;;  %v566_v18 = vadd.f32 %v1971_v10, %v565_v15  ;;  %v2156_v19 = vpop.f32.mrb[3].mxu1  ;;  %v1986_v10 = vld [vmem:[%s2758_s3 + $0x1] ss:$0 sm:$0xff]  ;;  %v2329_v15 = vld [vmem:[%s2761_s6 + $0x10] sm:$0xff]  }
  0xea   : > { %v2148_v20 = vpop.f32.mrb[3].mxu0  ;;  %v633_v25 = vpack.c.bf16 %v497_v23, %v497_v23  ;;  %v2330_v16 = vld [vmem:[%s2761_s6 + $0x18] sm:$0xff]  }
  0xeb   : > { %v634_v22 = vpack.c.bf16 %v566_v18, %v563_v17 }
  0xed   : > { %v640_v24 = vsel %vm635_vm2, %v634_v22, 0  ;;  %v2004_v22 = vld [vmem:[%s2762_s7 + $0x1] ss:$0 sm:$0xff] }
  0xee   : > { %2166 = vmatpush3.bf16.xpose.msra.mxu1 %v640_v24 }
  0xef   : > { %2177 = vmatprep.subr.bf16.mxu1 %v2369_v1  ;;  %v626_v33 = vpop.f32.mrb[4].mxu0 }
  0xf0   : > { %v2163_v34 = vpop.f32.mrb[5].mxu0  ;;  %v627_v41 = vadd.f32 %v1975_v40, %v626_v33 }
  0xf1   : > { %v629_v42 = vpop.f32.mrb[6].mxu0 }
  0xf2   : > { %v2164_v43 = vpop.f32.mrb[7].mxu0  ;;  %v630_v44 = vadd.f32 %v1975_v40, %v629_v42  ;;  %v744_v40 = vld [vmem:[%s2763_s8] sm:$0xf] }
  0xf3   : > { %v1103_v43 = vsel %vm1055_vm5, %v744_v40, 0  ;;  %v2042_v40 = vld [vmem:[%s2763_s8 + $0x8] sm:$0xf] }
  0xf4   : > { %v695_v45 = vpack.c.bf16 %v630_v44, %v627_v41  ;;  %v2331_v44 = vld [vmem:[%s2759_s4 + $0x20] sm:$0xff]  }
  0xf5   : > { %2168 = vmatmul.mubr.msk.bf16.vlgmr.msra.gmra.mrb[4].mxu1 %vm635_vm2, %v633_v25 }
  0xf6   : > { %2181 = vmatprep.mubr.msk.bf16.mxu1 %vm2370_vm0, %v2369_v1  ;;  %v701_v46 = vsel %vm699_vm4, %v695_v45, 0  ;;  %2178 = vmatpush3.bf16.msra.mxu1 %v2327_v47 }
  0xf7   : > { %2172 = vmatpush3.bf16.msra.mxu0 %v701_v46  ;;  %2179 = vmatprep.subr.bf16.mxu1 %v2369_v1  ;;  %v2332_v46 = vld [vmem:[%s2759_s4 + $0x28] sm:$0xff]  }
  0xf8   : > { %2185 = vmatprep.subr.bf16.mxu0 %v2369_v1 }
  0xfa   : > { %2180 = vmatpush3.bf16.msra.mxu1 %v2328_v48  ;;  %v2333_v48 = vld [vmem:[%s2757_s2 + $0x20] sm:$0xff]  }
  0xfb   : > { %2193 = vmatprep.subr.bf16.mxu1 %v2369_v1 }
  0xfd   : > { %2182 = vmatmul.mubr.msk.bf16.vlgmr.msra.gmra.mrb[8].mxu1 %vm458_vm1, %v2483_v9 }
  0xfe   : > { %2197 = vmatprep.mubr.msk.bf16.mxu1 %vm2370_vm0, %v2369_v1  ;;  %2194 = vmatpush3.bf16.msra.mxu1 %v2329_v15 }
  0xff   : > { %2195 = vmatprep.subr.bf16.mxu1 %v2369_v1 }
 0x102   : > { %2196 = vmatpush3.bf16.msra.mxu1 %v2330_v16 }
 0x103   : > { %2207 = vmatprep.subr.bf16.mxu1 %v2369_v1 }
 0x105   : > { %2198 = vmatmul.mubr.msk.bf16.vlgmr.msra.gmra.mrb[12].mxu1 %vm458_vm1, %v2479_v8 }
 0x106   : > { %2209 = vmatprep.mubr.msk.bf16.mxu1 %vm2370_vm0, %v2369_v1 }
 0x1c8   : > { %v676_v28 = vpop.f32.mrb[4].mxu1 }
 0x1c9   : > { %v2169_v29 = vpop.f32.mrb[5].mxu1  ;;  %v683_v30 = vsel %vm682_vm3, %v676_v28, -inf }
 0x1ca   : > { %684 = vmax.xlane.f32.xlu0 %v683_v30  ;;  %v679_v31 = vpop.f32.mrb[6].mxu1 }
 0x1cb   : > { %v2170_v32 = vpop.f32.mrb[7].mxu1 }
 0x1d0   : > { %v804_v55 = vpop.f32.mrb[8].mxu1 }
 0x1d1   : > { %v2183_v56 = vpop.f32.mrb[9].mxu1  ;;  %v805_v12 = vadd.f32 %v1986_v10, %v804_v55 }
 0x1d2   : > { %v807_v57 = vpop.f32.mrb[10].mxu1 }
 0x1d3   : > { %v2184_v58 = vpop.f32.mrb[11].mxu1  ;;  %v942_v14 = vpack.c.bf16 %v805_v12, %v805_v12  ;;  %v2018_v12 = vld [vmem:[%s2758_s3 + $0x2] ss:$0 sm:$0xff] }
 0x1d4   : > { %v2027_v58 = vld [vmem:[%s2760_s5 + $0x2] ss:$0 sm:$0xff] }
 0x1d8   : > { %v935_v23 = vpop.f32.mrb[12].mxu1 }
 0x1d9   : > { %v936_v24 = vadd.f32 %v2004_v22, %v935_v23  ;;  %v2199_v25 = vpop.f32.mrb[13].mxu1 }
 0x1da   : > { %v938_v26 = vpop.f32.mrb[14].mxu1 }
 0x1db   : > { %v939_v27 = vadd.f32 %v2004_v22, %v938_v26 }
 0x1dd   : > { %v1002_v29 = vpack.c.bf16 %v939_v27, %v936_v24 }
 0x257   : > { %v685_v35 = vpop.xlane.xlu0 %684 }
 0x258   : > { %v686_v36 = vsub.f32 %v676_v28, %v685_v35  ;;  %v2200_v28 = vpop.f32.mrb[15].mxu1  ;;  %v1007_v35 = vsel %vm699_vm4, %v1002_v29, 0 }
 0x259   : > { %2208 = vmatpush3.bf16.msra.mxu1 %v1007_v35 }
 0x25a   : > { %v687_v37 = vmul.f32 1.442695, %v686_v36  ;;  %2219 = vmatprep.subr.bf16.mxu1 %v2369_v1  ;;  %v2010_v36 = vld [vmem:[%s2763_s8 + $0x4] sm:$0xf] }
 0x25c   : > { %2343 = vpow2.f32 %v687_v37  ;;  %v1057_v37 = vsel %vm1055_vm5, %v2010_v36, 0 }
 0x266   : > { %v2344_v38 = vpop.eup %2343 }
 0x267   : > { %v689_v39 = vsel %vm682_vm3, %v2344_v38, 0.0 }
 0x268   : > { %690 = vadd.xlane.f32.xlu0 %v689_v39 }
 0x2f5   : > { %v691_v49 = vpop.xlane.xlu0 %690 }
 0x2f6   : > { %2345 = vrcp.f32 %v691_v49 }
 0x300   : > { %v2346_v50 = vpop.eup %2345 }
 0x301   : > { %v693_v51 = vmul.f32 %v2346_v50, %v2344_v38 }
 0x303   : > { %v694_v53 = vpack.c.bf16 %v693_v51, %v693_v51 }
 0x305   : > { %2174 = vmatmul.mubr.msk.bf16.vlgmr.msra.gmra.mrb[8].mxu0 %vm682_vm3, %v694_v53  ;;  %v2334_v53 = vld [vmem:[%s2757_s2 + $0x28] sm:$0xff]  }
 0x306   : > { %2186 = vmatpush3.bf16.msra.mxu0 %v2325_v52  ;;  %2189 = vmatprep.mubr.msk.bf16.mxu0 %vm2370_vm0, %v2369_v1 }
 0x307   : > { %2187 = vmatprep.subr.bf16.mxu0 %v2369_v1 }
 0x30a   : > { %2188 = vmatpush3.bf16.msra.mxu0 %v2326_v54 }
 0x30b   : > { %2201 = vmatprep.subr.bf16.mxu0 %v2369_v1 }
 0x30d   : > { %2190 = vmatmul.mubr.msk.bf16.vlgmr.msra.gmra.mrb[12].mxu0 %vm458_vm1, %v2479_v8 }
 0x30e   : > { %2203 = vmatprep.mubr.msk.bf16.mxu0 %vm2370_vm0, %v2369_v1 }
 0x3d8   : > { %v2551_v59 = vpop.f32.mrb[8].mxu0 }
 0x3d9   : > { %v2175_v60 = vpop.f32.mrb[9].mxu0  ;;  %v743_v45 = vpack.c.bf16 %v2551_v59, %v2551_v59 }
 0x3da   : > { %v740_v61 = vpop.f32.mrb[10].mxu0 }
 0x3db   : > { %v2176_v62 = vpop.f32.mrb[11].mxu0 }
 0x3e0   : > { %v869_v0 = vpop.f32.mrb[12].mxu0 }
 0x3e1   : > { %v2191_v2 = vpop.f32.mrb[13].mxu0  ;;  %v870_v4 = vadd.f32 %v1995_v63, %v869_v0 }
 0x3e2   : > { %v872_v3 = vpop.f32.mrb[14].mxu0 }
 0x3e3   : > { %v873_v5 = vadd.f32 %v1995_v63, %v872_v3  ;;  %v2192_v6 = vpop.f32.mrb[15].mxu0 }
 0x3e5   : > { %v943_v11 = vpack.c.bf16 %v873_v5, %v870_v4 }
 0x3e7   : > { %v948_v13 = vsel %vm635_vm2, %v943_v11, 0 }
 0x3e8   : > { %2202 = vmatpush3.bf16.xpose.msra.mxu0 %v948_v13 }
 0x3e9   : > { %2213 = vmatprep.subr.bf16.mxu0 %v2369_v1 }
 0x3ef   : > { %2204 = vmatmul.mubr.msk.bf16.vlgmr.msra.gmra.mrb[16].mxu0 %vm635_vm2, %v942_v14 }
 0x3f0   : > { %2215 = vmatprep.mubr.msk.bf16.mxu0 %vm2370_vm0, %v2369_v1  ;;  %2214 = vmatpush3.bf16.msra.mxu0 %v1057_v37 }
 0x3f1   : > { %2225 = vmatprep.subr.bf16.mxu0 %v2369_v1 }
 0x4c2   : > { %v984_v17 = vpop.f32.mrb[16].mxu0 }
 0x4c3   : > { %v2205_v18 = vpop.f32.mrb[17].mxu0  ;;  %v990_v19 = vsel %vm682_vm3, %v984_v17, -inf }
 0x4c4   : > { %991 = vmax.xlane.f32.xlu1 %v990_v19  ;;  %v987_v20 = vpop.f32.mrb[18].mxu0  ;;  %v2335_v19 = vld [vmem:[%s2761_s6 + $0x20] sm:$0xff]  }
 0x4c5   : > { %v2206_v21 = vpop.f32.mrb[19].mxu0  ;;  %v2336_v20 = vld [vmem:[%s2761_s6 + $0x28] sm:$0xff]  }
 0x551   : > { %v992_v30 = vpop.xlane.xlu1 %991 }
 0x552   : > { %v993_v31 = vsub.f32 %v984_v17, %v992_v30 }
 0x554   : > { %v994_v32 = vmul.f32 1.442695, %v993_v31 }
 0x556   : > { %2347 = vpow2.f32 %v994_v32 }
 0x560   : > { %v2348_v33 = vpop.eup %2347 }
 0x561   : > { %v996_v34 = vsel %vm682_vm3, %v2348_v33, 0.0 }
 0x562   : > { %997 = vadd.xlane.f32.xlu1 %v996_v34 }
 0x5ef   : > { %v998_v38 = vpop.xlane.xlu1 %997 }
 0x5f0   : > { %2349 = vrcp.f32 %v998_v38 }
 0x5fa   : > { %v2350_v39 = vpop.eup %2349 }
 0x5fb   : > { %v1000_v41 = vmul.f32 %v2350_v39, %v2348_v33  ;;  %v2036_v33 = vld [vmem:[%s2762_s7 + $0x2] ss:$0 sm:$0xff] }
 0x5fd   : > { %v1001_v42 = vpack.c.bf16 %v1000_v41, %v1000_v41  ;;  %v1456_v41 = vsel %vm1055_vm5, %v2042_v40, 0 }
 0x5ff   : > { %2210 = vmatmul.mubr.msk.bf16.vlgmr.msra.gmra.mrb[16].mxu1 %vm682_vm3, %v1001_v42 }
 0x600   : > { %2220 = vmatpush3.bf16.msra.mxu1 %v1103_v43  ;;  %2221 = vmatprep.mubr.msk.bf16.mxu1 %vm2370_vm0, %v2369_v1 }
 0x601   : > { %2233 = vmatprep.subr.bf16.mxu1 %v2369_v1 }
 0x607   : > { %2222 = vmatmul.mubr.msk.bf16.vlgmr.msra.gmra.mrb[20].mxu1 %vm635_vm2, %v743_v45 }
 0x608   : > { %2234 = vmatpush3.bf16.msra.mxu1 %v2331_v44  ;;  %2237 = vmatprep.mubr.msk.bf16.mxu1 %vm2370_vm0, %v2369_v1 }
 0x609   : > { %2235 = vmatprep.subr.bf16.mxu1 %v2369_v1 }
 0x60c   : > { %2236 = vmatpush3.bf16.msra.mxu1 %v2332_v46  ;;  %v2339_v46 = vld [vmem:[%s2757_s2 + $0x30] sm:$0xff]  }
 0x60d   : > { %2249 = vmatprep.subr.bf16.mxu1 %v2369_v1 }
 0x60f   : > { %2238 = vmatmul.mubr.msk.bf16.vlgmr.msra.gmra.mrb[24].mxu1 %vm458_vm1, %v2479_v8 }
 0x610   : > { %2251 = vmatprep.mubr.msk.bf16.mxu1 %vm2370_vm0, %v2369_v1 }
 0x6d2   : > { %v1043_v47 = vpop.f32.mrb[16].mxu1 }
 0x6d3   : > { %v1049_v49 = vpack.c.bf16 %v1043_v47, %v1043_v47  ;;  %v2211_v50 = vpop.f32.mrb[17].mxu1  ;;  %v2340_v47 = vld [vmem:[%s2757_s2 + $0x38] sm:$0xff]  }
 0x6d4   : > { %v1046_v51 = vpop.f32.mrb[18].mxu1 }
 0x6d5   : > { %v2212_v52 = vpop.f32.mrb[19].mxu1  ;;  %2216 = vmatmul.mubr.msk.bf16.vlgmr.msra.gmra.mrb[20].mxu0 %vm635_vm2, %v1049_v49  ;;  %v2337_v49 = vld [vmem:[%s2759_s4 + $0x30] sm:$0xff]  }
 0x6d6   : > { %2226 = vmatpush3.bf16.msra.mxu0 %v2333_v48  ;;  %2229 = vmatprep.mubr.msk.bf16.mxu0 %vm2370_vm0, %v2369_v1 }
 0x6d7   : > { %2227 = vmatprep.subr.bf16.mxu0 %v2369_v1 }
 0x6da   : > { %v1139_v54 = vpop.f32.mrb[20].mxu1  ;;  %2228 = vmatpush3.bf16.msra.mxu0 %v2334_v53 }
 0x6db   : > { %v2223_v55 = vpop.f32.mrb[21].mxu1  ;;  %2241 = vmatprep.subr.bf16.mxu0 %v2369_v1 }
 0x6dc   : > { %v1142_v56 = vpop.f32.mrb[22].mxu1 }
 0x6dd   : > { %v2224_v57 = vpop.f32.mrb[23].mxu1  ;;  %2230 = vmatmul.mubr.msk.bf16.vlgmr.msra.gmra.mrb[24].mxu0 %vm458_vm1, %v2483_v9 }
 0x6de   : > { %2245 = vmatprep.mubr.msk.bf16.mxu0 %vm2370_vm0, %v2369_v1  ;;  %2242 = vmatpush3.bf16.msra.mxu0 %v2335_v19 }
 0x6df   : > { %2243 = vmatprep.subr.bf16.mxu0 %v2369_v1 }
 0x6e2   : > { %v1269_v59 = vpop.f32.mrb[24].mxu1  ;;  %2244 = vmatpush3.bf16.msra.mxu0 %v2336_v20 }
 0x6e3   : > { %v1270_v60 = vadd.f32 %v2027_v58, %v1269_v59  ;;  %v2239_v61 = vpop.f32.mrb[25].mxu1  ;;  %2255 = vmatprep.subr.bf16.mxu0 %v2369_v1 }
 0x6e4   : > { %v1272_v62 = vpop.f32.mrb[26].mxu1 }
 0x6e5   : > { %v1273_v63 = vadd.f32 %v2027_v58, %v1272_v62  ;;  %v2240_v0 = vpop.f32.mrb[27].mxu1  ;;  %2246 = vmatmul.mubr.msk.bf16.vlgmr.msra.gmra.mrb[28].mxu0 %vm458_vm1, %v2479_v8 }
 0x6e6   : > { %2257 = vmatprep.mubr.msk.bf16.mxu0 %vm2370_vm0, %v2369_v1 }
 0x6e7   : > { %v1343_v2 = vpack.c.bf16 %v1273_v63, %v1270_v60  ;;  %v2058_v63 = vld [vmem:[%s2760_s5 + $0x3] ss:$0 sm:$0xff] }
 0x6e9   : > { %v1348_v3 = vsel %vm635_vm2, %v1343_v2, 0 }
 0x6ea   : > { %2250 = vmatpush3.bf16.xpose.msra.mxu1 %v1348_v3 }
 0x6eb   : > { %2261 = vmatprep.subr.bf16.mxu1 %v2369_v1 }
 0x7a8   : > { %v1093_v4 = vpop.f32.mrb[20].mxu0 }
 0x7a9   : > { %v2633_v5 = vadd.f32 %v1139_v54, %v1093_v4  ;;  %v2217_v6 = vpop.f32.mrb[21].mxu0  ;;  %v2338_v54 = vld [vmem:[%s2759_s4 + $0x38] sm:$0xff]  }
 0x7aa   : > { %v1096_v10 = vpop.f32.mrb[22].mxu0 }
 0x7ab   : > { %v2218_v11 = vpop.f32.mrb[23].mxu0 }
 0x7ac   : > { %v2049_v11 = vld [vmem:[%s2758_s3 + $0x3] ss:$0 sm:$0xff] }
 0x7b0   : > { %v1204_v13 = vpop.f32.mrb[24].mxu0 }
 0x7b1   : > { %v1205_v14 = vadd.f32 %v2018_v12, %v1204_v13  ;;  %v2231_v15 = vpop.f32.mrb[25].mxu0 }
 0x7b2   : > { %v1207_v16 = vpop.f32.mrb[26].mxu0  ;;  %v2341_v15 = vld [vmem:[%s2761_s6 + $0x30] sm:$0xff]  }
 0x7b3   : > { %v1342_v17 = vpack.c.bf16 %v1205_v14, %v1205_v14  ;;  %v2232_v18 = vpop.f32.mrb[27].mxu0  ;;  %v2342_v16 = vld [vmem:[%s2761_s6 + $0x38] sm:$0xff]  }
 0x7b5   : > { %2252 = vmatmul.mubr.msk.bf16.vlgmr.msra.gmra.mrb[28].mxu1 %vm635_vm2, %v1342_v17 }
 0x7b6   : > { %2263 = vmatprep.mubr.msk.bf16.mxu1 %vm2370_vm0, %v2369_v1  ;;  %2262 = vmatpush3.bf16.msra.mxu1 %v1456_v41 }
 0x7b7   : > { %2275 = vmatprep.subr.bf16.mxu1 %v2369_v1 }
 0x7b8   : > { %v1335_v26 = vpop.f32.mrb[28].mxu0 }
 0x7b9   : > { %v2247_v27 = vpop.f32.mrb[29].mxu0  ;;  %v1336_v34 = vadd.f32 %v2036_v33, %v1335_v26 }
 0x7ba   : > { %v1338_v35 = vpop.f32.mrb[30].mxu0 }
 0x7bb   : > { %v2248_v36 = vpop.f32.mrb[31].mxu0  ;;  %v1339_v37 = vadd.f32 %v2036_v33, %v1338_v35 }
 0x7bd   : > { %v1402_v38 = vpack.c.bf16 %v1339_v37, %v1336_v34  ;;  %v2073_v34 = vld [vmem:[%s2763_s8 + $0xc] sm:$0xf] }
 0x7be   : > { %v1810_v35 = vsel %vm1055_vm5, %v2073_v34, 0 }
 0x7bf   : > { %v1407_v39 = vsel %vm699_vm4, %v1402_v38, 0 }
 0x7c0   : > { %2256 = vmatpush3.bf16.msra.mxu0 %v1407_v39 }
 0x7c1   : > { %2267 = vmatprep.subr.bf16.mxu0 %v2369_v1 }
 0x888   : > { %v1384_v21 = vpop.f32.mrb[28].mxu1 }
 0x889   : > { %v2253_v22 = vpop.f32.mrb[29].mxu1  ;;  %v1390_v23 = vsel %vm682_vm3, %v1384_v21, -inf }
 0x88a   : > { %1391 = vmax.xlane.f32.xlu0 %v1390_v23  ;;  %v1387_v24 = vpop.f32.mrb[30].mxu1 }
 0x88b   : > { %v2254_v25 = vpop.f32.mrb[31].mxu1 }
 0x917   : > { %v1392_v28 = vpop.xlane.xlu0 %1391 }
 0x918   : > { %v1393_v29 = vsub.f32 %v1384_v21, %v1392_v28 }
 0x91a   : > { %v1394_v30 = vmul.f32 1.442695, %v1393_v29 }
 0x91c   : > { %2351 = vpow2.f32 %v1394_v30 }
 0x926   : > { %v2352_v31 = vpop.eup %2351 }
 0x927   : > { %v1396_v32 = vsel %vm682_vm3, %v2352_v31, 0.0 }
 0x928   : > { %1397 = vadd.xlane.f32.xlu1 %v1396_v32 }
 0x9b5   : > { %v1398_v42 = vpop.xlane.xlu1 %1397 }
 0x9b6   : > { %2353 = vrcp.f32 %v1398_v42 }
 0x9c0   : > { %v2354_v43 = vpop.eup %2353 }
 0x9c1   : > { %v1400_v44 = vmul.f32 %v2354_v43, %v2352_v31 }
 0x9c3   : > { %v1401_v45 = vpack.c.bf16 %v1400_v44, %v1400_v44 }
 0x9c5   : > { %2258 = vmatmul.mubr.msk.bf16.vlgmr.msra.gmra.mrb[32].mxu0 %vm682_vm3, %v1401_v45 }
 0x9c6   : > { %2271 = vmatprep.mubr.msk.bf16.mxu0 %vm2370_vm0, %v2369_v1  ;;  %2268 = vmatpush3.bf16.msra.mxu0 %v2339_v46  ;;  %v2075_v46 = vld [vmem:[%s2764_s9] ss:$0 sm:$0xff] }
 0x9c7   : > { %2269 = vmatprep.subr.bf16.mxu0 %v2369_v1 }
 0x9ca   : > { %2270 = vmatpush3.bf16.msra.mxu0 %v2340_v47 }
 0x9cb   : > { %2283 = vmatprep.subr.bf16.mxu0 %v2369_v1 }
 0x9cd   : > { %2272 = vmatmul.mubr.msk.bf16.vlgmr.msra.gmra.mrb[36].mxu0 %vm458_vm1, %v2483_v9 }
 0x9ce   : > { %2287 = vmatprep.mubr.msk.bf16.mxu0 %vm2370_vm0, %v2369_v1  ;;  %2284 = vmatpush3.bf16.msra.mxu0 %v2341_v15 }
 0x9cf   : > { %2285 = vmatprep.subr.bf16.mxu0 %v2369_v1 }
 0x9d2   : > { %2286 = vmatpush3.bf16.msra.mxu0 %v2342_v16 }
 0x9d3   : > { %2297 = vmatprep.subr.bf16.mxu0 %v2369_v1 }
 0x9d5   : > { %2288 = vmatmul.mubr.msk.bf16.vlgmr.msra.gmra.mrb[40].mxu0 %vm458_vm1, %v2479_v8 }
 0x9d6   : > { %2299 = vmatprep.mubr.msk.bf16.mxu0 %vm2370_vm0, %v2369_v1 }
 0xa98   : > { %v1443_v48 = vpop.f32.mrb[32].mxu0 }
 0xa99   : > { %v1449_v50 = vpack.c.bf16 %v1443_v48, %v1443_v48  ;;  %v2259_v51 = vpop.f32.mrb[33].mxu0 }
 0xa9a   : > { %v1446_v52 = vpop.f32.mrb[34].mxu0 }
 0xa9b   : > { %v2260_v53 = vpop.f32.mrb[35].mxu0  ;;  %2264 = vmatmul.mubr.msk.bf16.vlgmr.msra.gmra.mrb[32].mxu1 %vm635_vm2, %v1449_v50 }
 0xa9c   : > { %2276 = vmatpush3.bf16.msra.mxu1 %v2337_v49  ;;  %2279 = vmatprep.mubr.msk.bf16.mxu1 %vm2370_vm0, %v2369_v1 }
 0xa9d   : > { %2277 = vmatprep.subr.bf16.mxu1 %v2369_v1 }
 0xaa0   : > { %2278 = vmatpush3.bf16.msra.mxu1 %v2338_v54  ;;  %v1558_v9 = vpop.f32.mrb[36].mxu0 }
 0xaa1   : > { %2291 = vmatprep.subr.bf16.mxu1 %v2369_v1  ;;  %v2273_v55 = vpop.f32.mrb[37].mxu0 }
 0xaa2   : > { %v1561_v56 = vpop.f32.mrb[38].mxu0 }
 0xaa3   : > { %2280 = vmatmul.mubr.msk.bf16.vlgmr.msra.gmra.mrb[36].mxu1 %vm458_vm1, %v2479_v8  ;;  %v2274_v57 = vpop.f32.mrb[39].mxu0 }
 0xaa4   : > { %2293 = vmatprep.mubr.msk.bf16.mxu1 %vm2370_vm0, %v2369_v1 }
 0xaa8   : > { %v1689_v22 = vpop.f32.mrb[40].mxu0 }
 0xaa9   : > { %v2289_v23 = vpop.f32.mrb[41].mxu0 }
 0xaaa   : > { %v1692_v29 = vpop.f32.mrb[42].mxu0 }
 0xaab   : > { %v2290_v30 = vpop.f32.mrb[43].mxu0 }
 0xb6e   : > { %v1492_v58 = vpop.f32.mrb[32].mxu1 }
 0xb6f   : > { %v2696_v59 = vadd.f32 %v1492_v58, %v2633_v5  ;;  %v2265_v60 = vpop.f32.mrb[33].mxu1  ;;  %v1559_v5 = vadd.f32 %v2049_v11, %v1558_v9 }
 0xb70   : > { %v1495_v61 = vpop.f32.mrb[34].mxu1 }
 0xb71   : > { %v2266_v62 = vpop.f32.mrb[35].mxu1  ;;  %v1696_v14 = vpack.c.bf16 %v1559_v5, %v1559_v5 }
 0xb76   : > { %v1623_v0 = vpop.f32.mrb[36].mxu1 }
 0xb77   : > { %v2281_v2 = vpop.f32.mrb[37].mxu1  ;;  %v1624_v4 = vadd.f32 %v2058_v63, %v1623_v0 }
 0xb78   : > { %v1626_v3 = vpop.f32.mrb[38].mxu1 }
 0xb79   : > { %v1627_v6 = vadd.f32 %v2058_v63, %v1626_v3  ;;  %v2282_v10 = vpop.f32.mrb[39].mxu1  ;;  %v2077_v63 = vld [vmem:[%s2766_s11] ss:$0 sm:$0xff] }
 0xb7b   : > { %v1697_v12 = vpack.c.bf16 %v1627_v6, %v1624_v4 }
 0xb7d   : > { %v1702_v13 = vsel %vm635_vm2, %v1697_v12, 0 }
 0xb7e   : > { %2292 = vmatpush3.bf16.xpose.msra.mxu1 %v1702_v13 }
 0xb7f   : > { %2303 = vmatprep.subr.bf16.mxu1 %v2369_v1 }
 0xb85   : > { %2294 = vmatmul.mubr.msk.bf16.vlgmr.msra.gmra.mrb[40].mxu1 %vm635_vm2, %v1696_v14 }
 0xb86   : > { %2305 = vmatprep.mubr.msk.bf16.mxu1 %vm2370_vm0, %v2369_v1  ;;  %v2067_v1 = vld [vmem:[%s2762_s7 + $0x3] ss:$0 sm:$0xff]  ;;  %2304 = vmatpush3.bf16.msra.mxu1 %v1810_v35 }
 0xb87   : > { %v1690_v8 = vadd.f32 %v2067_v1, %v1689_v22  ;;  %v1693_v31 = vadd.f32 %v2067_v1, %v1692_v29 }
 0xb89   : > { %v1756_v32 = vpack.c.bf16 %v1693_v31, %v1690_v8 }
 0xb8b   : > { %v1761_v33 = vsel %vm699_vm4, %v1756_v32, 0 }
 0xb8c   : > { %2298 = vmatpush3.bf16.msra.mxu0 %v1761_v33 }
 0xc58   : > { %v1738_v17 = vpop.f32.mrb[40].mxu1 }
 0xc59   : > { %v2295_v18 = vpop.f32.mrb[41].mxu1  ;;  %v1744_v19 = vsel %vm682_vm3, %v1738_v17, -inf }
 0xc5a   : > { %1745 = vmax.xlane.f32.xlu0 %v1744_v19  ;;  %v1741_v20 = vpop.f32.mrb[42].mxu1 }
 0xc5b   : > { %v2296_v21 = vpop.f32.mrb[43].mxu1 }
 0xce7   : > { %v1746_v24 = vpop.xlane.xlu0 %1745 }
 0xce8   : > { %v1747_v25 = vsub.f32 %v1738_v17, %v1746_v24 }
 0xcea   : > { %v1748_v26 = vmul.f32 1.442695, %v1747_v25 }
 0xcec   : > { %2355 = vpow2.f32 %v1748_v26 }
 0xcf6   : > { %v2356_v27 = vpop.eup %2355 }
 0xcf7   : > { %v1750_v28 = vsel %vm682_vm3, %v2356_v27, 0.0 }
 0xcf8   : > { %1751 = vadd.xlane.f32.xlu1 %v1750_v28 }
 0xd85   : > { %v1752_v36 = vpop.xlane.xlu1 %1751 }
 0xd86   : > { %2357 = vrcp.f32 %v1752_v36 }
 0xd90   : > { %v2358_v37 = vpop.eup %2357 }
 0xd91   : > { %v1754_v38 = vmul.f32 %v2358_v37, %v2356_v27 }
 0xd93   : > { %v1755_v39 = vpack.c.bf16 %v1754_v38, %v1754_v38 }
 0xd95   : > { %2300 = vmatmul.mubr.msk.bf16.vlgmr.msra.gmra.mrb[44].mxu0 %vm682_vm3, %v1755_v39 }
 0xe68   : > { %v1797_v40 = vpop.f32.mrb[44].mxu0 }
 0xe69   : > { %v1803_v41 = vpack.c.bf16 %v1797_v40, %v1797_v40  ;;  %v2301_v42 = vpop.f32.mrb[45].mxu0 }
 0xe6a   : > { %v1800_v43 = vpop.f32.mrb[46].mxu0 }
 0xe6b   : > { %v2302_v44 = vpop.f32.mrb[47].mxu0  ;;  %2306 = vmatmul.mubr.msk.bf16.vlgmr.msra.gmra.mrb[44].mxu1 %vm635_vm2, %v1803_v41 }
 0xf3e   : > { %v1846_v45 = vpop.f32.mrb[44].mxu1 }
 0xf3f   : > { %v1852_v47 = vadd.f32 %v1846_v45, %v2696_v59  ;;  %v2307_v48 = vpop.f32.mrb[45].mxu1 }
 0xf40   : > { %v1849_v49 = vpop.f32.mrb[46].mxu1 }
 0xf41   : > { %v1860_v50 = vadd.f32 %v2075_v46, %v1852_v47  ;;  %v2308_v51 = vpop.f32.mrb[47].mxu1 }
 0xf43   : > { %v1861_v52 = vadd.f32 %v1860_v50, %v2477_v7  ;;  %v2076_v7 = vld [vmem:[%s2765_s10] ss:$0 sm:$0xff] }
 0xf45   : > { %v1862_v53 = vsel %vm458_vm1, %v1861_v52, 0.0 }
 0xf46   : > { %1863 = vadd.xlane.f32.xlu0 %v1862_v53 }
 0xfd3   : > { %v1864_v54 = vpop.xlane.xlu0 %1863 }
 0xfd4   : > { %v1866_v9 = vmul.f32 0.03125, %v1864_v54 }
 0xfd6   : > { %v1867_v55 = vsub.f32 %v1861_v52, %v1866_v9 }
 0xfd8   : > { %v1868_v56 = vmul.f32 %v1867_v55, %v1867_v55 }
 0xfda   : > { %v1869_v57 = vsel %vm458_vm1, %v1868_v56, 0.0 }
 0xfdb   : > { %1870 = vadd.xlane.f32.xlu1 %v1869_v57 }
0x1068   : > { %v1871_v58 = vpop.xlane.xlu1 %1870 }
0x1069   : > { %v1872_v60 = vmul.f32 0.03125, %v1871_v58 }
0x106b   : > { %v1873_v59 = vadd.f32 1e-05, %v1872_v60 }
0x106d   : > { %2359 = vrsqrt.f32 %v1873_v59 }
0x1077   : > { %v2360_v61 = vpop.eup %2359 }
0x1078   : > { %v1875_v62 = vmul.f32 %v2360_v61, %v1867_v55 }
0x107a   : > { %v1883_v0 = vmul.f32 %v2076_v7, %v1875_v62 }
0x107c   : > { %v1891_v2 = vadd.f32 %v2077_v63, %v1883_v0 }
0x107e   : > { %1892 = vst.msk [vmem:[%s428_s28] sm:$0xff] %vm458_vm1, %v1891_v2 }
0x107f PF: > { %s22_s21 = sadd.s32 1, %s2367_s21  }
0x1080   : > { %p19_p4 = scmp.ge.s32.totalorder %s22_s21, 4  }
0x1082   :  { %21 = sbr.rel (!%p19_p4) target bundleno = 1 (0x1), region = 122 }

// kernel: model_forward.25
= control target key start
LH: loop header
LB: loop body
LE: loop exit
PB: predicated region body
PF: predicated region fallthrough
CT: control target
= control target key end

     0   :  { %8 = vsyncpa [#allocation3], 0  ;;  %s575_s0 = inlined_call_operand.vmem [shape: f32[2,8,32], index: 0, kind: input, shape index: {}]   ;;  %s576_s1 = inlined_call_operand.vmem [shape: bf16[32,60], index: 1, kind: input, shape index: {}]   ;;  %s577_s2 = inlined_call_operand.vmem [shape: f32[1,60], index: 2, kind: input, shape index: {}]   ;;  %s578_s3 = inlined_call_operand.hbm [shape: f32[2,8,60], index: 3, kind: output, shape index: {}]  }
   0x1   :  { %10 = vsyncpa [#allocation3 + $0x1], 0  ;;  %s466_s12 = smov 0   ;;  %s468_s13 = smov 0  }
   0x2   :  { %s470_s14 = smov 0   ;;  %s472_s15 = smov 0  }
   0x3 LB: > { %s487_s16 = sadd.s32 4294967295, %s441_s15   ;;  %s311_s17 = sadd.s32 4294967294, %s441_s15   ;;  %s441_s15 = sphi %s472_s15, %s584_s15   ;;  %s437_s14 = sphi %s470_s14, %s583_s14   ;;  %s433_s13 = sphi %s468_s13, %s582_s13   ;;  %s429_s12 = sphi %s466_s12, %s581_s12  }
   0x4   : > { %s491_s18 = sadd.s32 1, %s441_s15   ;;  %s91_s19 = sadd.s32 1, %s437_s14 }
   0x5   : > { %s88_s20 = ssub.s32 %s441_s15, %s491_s18  ;;  %p101_p0 = scmp.ne.s32.totalorder %s437_s14, %s433_s13 }
   0x6   : > { %p89_p1 = scmp.eq.s32.totalorder %s88_s20, 0  ;;  %p102_p2 = scmp.eq.s32.totalorder %s487_s16, 1 }
   0x7   : > { %p107_p3 = scmp.ne.s32.totalorder %s433_s13, %s429_s12  ;;  %p108_p4 = scmp.eq.s32.totalorder %s311_s17, 1 }
   0x8   : > { %s502_s21 = scalar_select %p89_p1, %s437_s14, %s91_s19  }
   0x9   : > { %p504_p5 = por %p102_p2, %p101_p0  ;;  %p508_p6 = por %p108_p4, %p107_p3 }
   0xa   : > { %p314_p7 = scmp.ge.s32.totalorder %s441_s15, 1  ;;  %p139_p8 = scmp.lt.s32.totalorder %s441_s15, 3 }
   0xc   : > { %p140_p9 = pnand %p314_p7, %p139_p8 }
   0xd   : > { %v377_v0 = vld [vmem:[%s576_s1] sm:$0xff] (!%p140_p9)   ;;  %v443_v1 = vmov (!%p140_p9), 0.0   ;;  %v378_v2 = vld [vmem:[%s576_s1 + $0x8] sm:$0xff] (!%p140_p9)   ;;  %vm444_vm0 = vmmov (!%p140_p9), 0   ;;  %p162_p10 = scmp.lt.s32.totalorder (!%p140_p9), %s487_s16, 1  ;;  %vm192_vm1 = vcmask (!%p140_p9), 261120  }
   0xe   : > { %143 = sbr.rel (%p140_p9) target bundleno = 256 (0x100), region = 32  ;;  %328 = vmatprep.subr.bf16.mxu0 (!%p140_p9), %v443_v1  ;;  %332 = vmatprep.mubr.msk.bf16.mxu0 (!%p140_p9), %vm444_vm0, %v443_v1  ;;  %s159_s6 = sand.u32 (!%p140_p9), 1, %s433_s13   ;;  %v317_v5 = vld [vmem:[%s577_s2] ss:$0 sm:$0xff] (!%p140_p9)  ;;  %vm236_vm2 = vcmask (!%p140_p9), 490496  }
   0xf   : > { %329 = vmatpush3.bf16.msra.mxu0 (!%p140_p9), %v377_v0  ;;  %s315_s7 = sshll.u32 (!%p140_p9), %s159_s6, 3  ;;  %s322_s10 = sshll.u32 (!%p140_p9), %s487_s16, 7 }
  0x10   : > { %330 = vmatprep.subr.bf16.mxu0 (!%p140_p9), %v443_v1  ;;  %s161_s11 = scalar_lea.vmem (!%p140_p9), [#allocation2], %s315_s7  ;;  %s533_s24 = scalar_lea.hbm (!%p140_p9), %s578_s3, %s322_s10 }
  0x11   : > { %s252_s17 = sshll.u32 (!%p140_p9), %s161_s11, 4  ;;  %s445_s26 = smov (!%p140_p9), [#allocation2]   ;;  %s535_s17 = int_to_ptr.vmem [resolvable:$true] %s252_s17 }
  0x12   : > { %s379_s25 = scalar_lea.vmem (!%p140_p9), %s535_s17, 128  ;;  %s383_s27 = sshll.u32 (!%p140_p9), %s445_s26, 4  ;;  %s384_s27 = int_to_ptr.vmem [resolvable:$false] %s383_s27 }
  0x13   : > { %331 = vmatpush3.bf16.msra.mxu0 (!%p140_p9), %v378_v2  ;;  %p380_p11 = scmp.ne.s32.totalorder (!%p140_p9), %s535_s17, %s379_s25  ;;  %p386_p0 = scmp.lt.s32.totalorder (!%p140_p9), %s535_s17, %s384_s27 }
  0x15   : > { %s163_s28 = scalar_select %p162_p10, %s487_s16, 1 }
  0x16   : > { %s239_s16 = scalar_lea.sflag [#allocation3], %s159_s6  ;;  %p381_p12 = pnand %p380_p11, %p504_p5 }
  0x17   : > { %s316_s29 = sshll.u32 %s163_s28, 3  ;;  %s385_s28 = scalar_lea.vmem %s384_s27, 256 }
  0x18   : > { %s165_s5 = scalar_lea.vmem %s575_s0, %s316_s29  ;;  %p382_p13 = pneg %p381_p12 }
  0x19   : > { %v167_v3 = vld [vmem:[%s165_s5] sm:$0xff]  ;;  %p387_p1 = scmp.lt.s32.totalorder %s385_s28, %s379_s25 }
  0x1a   : > { %v168_v4 = vpack.c.bf16 %v167_v3, %v167_v3 }
  0x1b   : > { %p388_p2 = por %p387_p1, %p386_p0 }
  0x1c   : > { %333 = vmatmul.mubr.msk.bf16.vlgmr.msra.gmra.mrb[0].mxu0 %vm192_vm1, %v168_v4 }
  0x1d   : > { %p389_p3 = pnand %p388_p2, %p382_p13 }
  0xef   : > { %v230_v6 = vpop.f32.mrb[0].mxu0 }
  0xf0   : > { %v231_v7 = vadd.f32 %v317_v5, %v230_v6  ;;  %v334_v8 = vpop.f32.mrb[1].mxu0 }
  0xf1   : > { %v233_v9 = vpop.f32.mrb[2].mxu0 }
  0xf2   : > { %v335_v10 = vpop.f32.mrb[3].mxu0  ;;  %237 = vst.msk [vmem:[%s161_s11] sm:$0xff] %vm236_vm2, %v231_v7 }
  0xf3   : > { %392 = shalt.err (!%p389_p3)
}
  0xf4   : > { %s393_s29 = scalar_lea.hbm %s533_s24, 128  ;;  %s397_s5 = scalar_lea.hbm %s578_s3, 256 }
  0xf5   : > { %p394_p4 = scmp.ne.s32.totalorder %s533_s24, %s393_s29  ;;  %p398_p9 = scmp.lt.u32.totalorder %s533_s24, %s578_s3 }
  0xf6   : > { %p399_p10 = scmp.lt.u32.totalorder %s397_s5, %s393_s29  ;;  %p401_p12 = scmp.lt.u32.totalorder %s393_s29, %s533_s24 }
  0xf7   : > { %p395_p7 = pnand %p394_p4, %p504_p5 }
  0xf8   : > { %p400_p11 = por %p399_p10, %p398_p9 }
  0xf9   : > { %p396_p8 = pneg %p395_p7 }
  0xfa   : > { %p402_p13 = por %p401_p12, %p400_p11 }
  0xfc   : > { %p403_p0 = pnand %p402_p13, %p396_p8 }
  0xfe   : > { %406 = shalt.err (!%p403_p0)
}
  0xff   : > { %336 = dma.vmem_to_hbm [thread:$0]  (%p504_p5), %s535_s17, 128, %s533_s24, %s239_s16  }
 0x100 PF: > { %p342_p1 = scmp.ge.s32.totalorder %s441_s15, 2  ;;  %s264_s8 = sand.u32 1, %s429_s12  }
 0x101   : > { %s265_s9 = scalar_lea.sflag [#allocation3], %s264_s8 }
 0x102   : > { %p339_p2 = pnand %p342_p1, %p508_p6 }
 0x104   : > { %424 = dma.done.wait (!%p339_p2), %s265_s9, 128  }
 0x105   : > { %426 = vsyncadd (!%p339_p2), %s265_s9, 4294967168  ;;  %p13_p3 = scmp.ge.s32.totalorder %s491_s18, 4   ;;  %s581_s12 = smov %s433_s13 }
 0x106   : > { %s582_s13 = smov %s437_s14  ;;  %s583_s14 = smov %s502_s21 }
 0x107   : > { %s584_s15 = smov %s491_s18  ;;  %15 = sbr.rel (!%p13_p3) target bundleno = 3 (0x3), region = 67 }
 0x10e   :  { %270 = vsyncpa [#allocation3], 1 }
 0x10f   :  { %272 = vsyncpa [#allocation3 + $0x1], 1 }

</bundles_post_ra>
